<compile_context>
chip_gen: v7x
topology: tpu7x:2x2x1
jax: 0.10.0
libtpu: 0.0.40
codegen_flags: <defaults>
</compile_context>

<pallas_src>
import functools
import math

import jax
import jax.numpy as jnp
import numpy as np
from jax.experimental import pallas as pl
from jax.experimental.pallas import tpu as pltpu


# -----------------------------------------------------------------------------
# small helpers
# -----------------------------------------------------------------------------
@functools.lru_cache(maxsize=None)
def _vmem_cap_bytes():
    """Generation-aware VMEM cap (~3/4 of physical); safe fallback off-TPU."""
    try:
        phys = int(getattr(pltpu.get_tpu_info(), "vmem_capacity_bytes", 128 << 20))
    except Exception:
        phys = 128 << 20
    return max((phys * 3) // 4, 16 << 20)


def _vmem_limit_bytes(blocks):
    """blocks: list of (block_shape, dtype); inputs/outputs are double-buffered."""
    need = 0
    for shape, dtype in blocks:
        need += 2 * math.prod(shape) * jnp.dtype(dtype).itemsize
    need += 4 << 20                      # slack for compiler-internal scratch
    return int(min(max(need, 16 << 20), _vmem_cap_bytes()))


def _pick_m_tile(m, max_lanes=4096):
    """Largest multiple-of-128 divisor of m that is <= max_lanes (lane-dense
    stores, bounded VMEM); fall back to the full extent."""
    best = None
    for t in range(128, min(m, max_lanes) + 1, 128):
        if m % t == 0:
            best = t
    return best if best is not None else m


def _tap_slab(x_nchw):
    """Pad + phase-split a (N, C, H, W) image into the 3x3/stride-2 tap slab
    (N, 9*C, (H//2)*(W//2)) bf16, tap-major (t = kh*3 + kw).  Single fused XLA
    pad/slice/concat: ~2.25x input bytes, halved again by bf16 (no 9x im2col)."""
    N, C, H, W = x_nchw.shape
    assert H % 2 == 0 and W % 2 == 0
    ho, wo = H // 2, W // 2
    xp = jnp.pad(x_nchw.astype(jnp.bfloat16), ((0, 0), (0, 0), (1, 1), (1, 1)))
    taps = [xp[:, :, kh:kh + 2 * ho:2, kw:kw + 2 * wo:2]
            for kh in range(3) for kw in range(3)]
    g = jnp.concatenate(taps, axis=1)                       # (N, 9C, ho, wo)
    return g.reshape(N, 9 * C, ho * wo), ho, wo


def _flatten_w9(w9):
    """(9, Cout, Cin) tap-major -> (Cout, 9*Cin) matching _tap_slab order."""
    t, co, ci = w9.shape
    return jnp.transpose(w9, (1, 0, 2)).reshape(co, t * ci)


# -----------------------------------------------------------------------------
# Interpolation constants (host-side numpy only; cached safely across traces)
# -----------------------------------------------------------------------------
@functools.lru_cache(maxsize=None)
def _interp_mats_np(out_h, out_w, in_h, in_w):
    """align_corners=True bilinear: A_h (out_h, in_h), A_w (out_w, in_w)."""
    def mat(o, i):
        if o == 1:
            src = np.zeros((1,), np.float64)
        else:
            src = np.arange(o, dtype=np.float64) * ((i - 1) / (o - 1))
        i0 = np.clip(np.floor(src).astype(np.int64), 0, i - 1)
        i1 = np.minimum(i0 + 1, i - 1)
        frac = (src - i0).astype(np.float32)
        A = np.zeros((o, i), np.float32)
        rows = np.arange(o)
        A[rows, i0] += (1.0 - frac)
        A[rows, i1] += frac
        return A
    return mat(out_h, in_h), mat(out_w, in_w)


@functools.lru_cache(maxsize=None)
def _interp_kron_np(out_h, out_w, in_h, in_w):
    """K[(y*in_w+x), (Y*out_w+X)] = A_h[Y,y] * A_w[X,x], so that
    upsampled_flat = pred_flat @ K  (one lane-dense GEMM)."""
    ah, aw = _interp_mats_np(out_h, out_w, in_h, in_w)
    k = np.einsum("Yy,Xx->yxYX", ah, aw).reshape(in_h * in_w, out_h * out_w)
    return np.ascontiguousarray(k.astype(np.float32))


# -----------------------------------------------------------------------------
# Fused conv-as-GEMM kernel.
#   out[co, m] = relu( Wflat[co, 9Cin] @ taps[9Cin, m] + b )
# Optional fused head: decoder 1x1 conv + bilinear-upsample GEMM epilogue.
# -----------------------------------------------------------------------------
def _conv_gemm_kernel(*refs, relu, fuse_head):
    if fuse_head:
        g_ref, w_ref, b_ref, pw_ref, pb_ref, k_ref, o_ref = refs
    else:
        g_ref, w_ref, b_ref, o_ref = refs

    acc = jnp.dot(w_ref[...], g_ref[0], preferred_element_type=jnp.float32)
    acc = acc + b_ref[...]                       # (Co, 1) broadcast over lanes
    if relu:
        acc = jnp.maximum(acc, 0.0)
    if fuse_head:
        # decoder 1x1 conv (f32, rides on the VMEM-resident tile)
        pred = jnp.dot(pw_ref[...].astype(jnp.float32), acc,
                       preferred_element_type=jnp.float32) + pb_ref[...]
        # bilinear upsample (align_corners=True) as one lane-dense GEMM
        acc = jnp.dot(pred, k_ref[...], preferred_element_type=jnp.float32)
    o_ref[0] = acc.astype(o_ref.dtype)


def conv3x3_s2(x_nchw, w9, b, *, relu=True, out_dtype=jnp.bfloat16):
    """3x3 / stride-2 / pad-1 conv (+bias +ReLU) as a single K=9*Cin GEMM.
    x: (N, Cin, H, W);  w9: (9, Cout, Cin) bf16;  b: (Cout, 1) f32.
    Returns (N, Cout, (H/2)*(W/2))."""
    N, C, H, W = x_nchw.shape
    g, ho, wo = _tap_slab(x_nchw)
    m_all = ho * wo
    m_tile = _pick_m_tile(m_all)
    n_mt = m_all // m_tile
    co = w9.shape[1]
    kc = 9 * C
    w_flat = _flatten_w9(w9)

    blocks = [((1, kc, m_tile), jnp.bfloat16),
              ((co, kc), jnp.bfloat16),
              ((co, 1), jnp.float32),
              ((1, co, m_tile), out_dtype)]
    flops = 2 * N * m_all * kc * co
    bytes_accessed = (N * kc * m_all * 2 + co * kc * 2 + co * 4
                      + N * co * m_all * jnp.dtype(out_dtype).itemsize)

    kernel = functools.partial(_conv_gemm_kernel, relu=relu, fuse_head=False)
    return pl.pallas_call(
        kernel,
        out_shape=jax.ShapeDtypeStruct((N, co, m_all), out_dtype),
        grid=(N, n_mt),
        in_specs=[
            pl.BlockSpec((1, kc, m_tile), lambda n, r: (n, 0, r)),
            pl.BlockSpec((co, kc), lambda n, r: (0, 0)),
            pl.BlockSpec((co, 1), lambda n, r: (0, 0)),
        ],
        out_specs=pl.BlockSpec((1, co, m_tile), lambda n, r: (n, 0, r)),
        compiler_params=pltpu.CompilerParams(
            dimension_semantics=("parallel", "parallel"),
            vmem_limit_bytes=_vmem_limit_bytes(blocks)),
        cost_estimate=pl.CostEstimate(flops=flops, transcendentals=0,
                                      bytes_accessed=bytes_accessed),
    )(g, w_flat, b)


def conv3x3_s2_fused_head(x_nchw, w9, b, proj_w, proj_b, out_h, out_w):
    """conv3x3/s2 (+bias+ReLU) + fused decoder 1x1 conv + fused bilinear
    upsample (align_corners=True) back to (out_h, out_w).
    Returns (N, num_classes, out_h, out_w) f32."""
    N, C, H, W = x_nchw.shape
    g, ho, wo = _tap_slab(x_nchw)
    m_in = ho * wo
    m_out = out_h * out_w
    co = w9.shape[1]
    nc = proj_w.shape[0]
    kc = 9 * C
    w_flat = _flatten_w9(w9)
    # TODO(synk): for large images the kron upsample matrix grows as
    # (H/4*W/4, H*W); beyond a few MiB switch to a separate class-blocked
    # separable upsample kernel instead of this fused epilogue.
    k_mat = jnp.asarray(_interp_kron_np(out_h, out_w, ho, wo))  # (m_in, m_out)

    blocks = [((1, kc, m_in), jnp.bfloat16),
              ((co, kc), jnp.bfloat16),
              ((co, 1), jnp.float32),
              ((nc, co), jnp.bfloat16),
              ((nc, 1), jnp.float32),
              ((m_in, m_out), jnp.float32),
              ((1, nc, m_out), jnp.float32)]
    flops = 2 * N * (m_in * kc * co + m_in * co * nc + nc * m_in * m_out)
    bytes_accessed = (N * kc * m_in * 2 + co * kc * 2 + nc * co * 2
                      + m_in * m_out * 4 + N * nc * m_out * 4)

    kernel = functools.partial(_conv_gemm_kernel, relu=True, fuse_head=True)
    out_flat = pl.pallas_call(
        kernel,
        out_shape=jax.ShapeDtypeStruct((N, nc, m_out), jnp.float32),
        grid=(N,),
        in_specs=[
            pl.BlockSpec((1, kc, m_in), lambda n: (n, 0, 0)),
            pl.BlockSpec((co, kc), lambda n: (0, 0)),
            pl.BlockSpec((co, 1), lambda n: (0, 0)),
            pl.BlockSpec((nc, co), lambda n: (0, 0)),
            pl.BlockSpec((nc, 1), lambda n: (0, 0)),
            pl.BlockSpec((m_in, m_out), lambda n: (0, 0)),
        ],
        out_specs=pl.BlockSpec((1, nc, m_out), lambda n: (n, 0, 0)),
        compiler_params=pltpu.CompilerParams(
            dimension_semantics=("parallel",),
            vmem_limit_bytes=_vmem_limit_bytes(blocks)),
        cost_estimate=pl.CostEstimate(flops=flops, transcendentals=0,
                                      bytes_accessed=bytes_accessed),
    )(g, w_flat, b, proj_w, proj_b, k_mat)
    return out_flat.reshape(N, nc, out_h, out_w)


# -----------------------------------------------------------------------------
# Parameters (synthetic; BN folded into conv weights, identity stats)
# -----------------------------------------------------------------------------
def init_params(key, cin, c1, c2, num_classes):
    k1, k2, k3, k4, k5, k6 = jax.random.split(key, 6)

    def conv_w(k, co, ci):
        fan_in = 9 * ci
        w = jax.random.normal(k, (9, co, ci), jnp.float32) * np.sqrt(2.0 / fan_in)
        return w.astype(jnp.bfloat16)

    return {
        "w1": conv_w(k1, c1, cin),
        "b1": 0.1 * jax.random.normal(k4, (c1, 1), jnp.float32),
        "w2": conv_w(k2, c2, c1),
        "b2": 0.1 * jax.random.normal(k5, (c2, 1), jnp.float32),
        "wd": (jax.random.normal(k3, (num_classes, c2), jnp.float32)
               * np.sqrt(2.0 / c2)).astype(jnp.bfloat16),
        "bd": 0.1 * jax.random.normal(k6, (num_classes, 1), jnp.float32),
    }


# -----------------------------------------------------------------------------
# ModelBuilder.forward  (main branch) -> (outs, None)
# -----------------------------------------------------------------------------
@jax.jit
def model_forward(params, x_nchw):
    N, C, H, W = x_nchw.shape
    # encoder stage 1: conv3x3/s2 + (folded BN) + ReLU
    y1 = conv3x3_s2(x_nchw, params["w1"], params["b1"], relu=True,
                    out_dtype=jnp.bfloat16)                   # (N, c1, H/2*W/2)
    y1 = y1.reshape(N, y1.shape[1], H // 2, W // 2)
    # encoder stage 2 + fused decoder 1x1 + fused bilinear upsample to (H, W)
    out = conv3x3_s2_fused_head(y1, params["w2"], params["b2"],
                                params["wd"], params["bd"], H, W)
    return out, None


# -----------------------------------------------------------------------------
# Pure-JAX reference (validation only)
# -----------------------------------------------------------------------------
def _reference_forward(params, x_nchw):
    N, C, H, W = x_nchw.shape

    def conv_ref(x, w9, b, relu):
        co = w9.shape[1]
        w_hwio = jnp.transpose(w9.astype(jnp.float32), (0, 2, 1)).reshape(3, 3, -1, co)
        y = jax.lax.conv_general_dilated(
            x.astype(jnp.float32), w_hwio, window_strides=(2, 2),
            padding=((1, 1), (1, 1)),
            dimension_numbers=("NCHW", "HWIO", "NCHW"))
        y = y + b.astype(jnp.float32).reshape(1, co, 1, 1)
        return jnp.maximum(y, 0.0) if relu else y

    y1 = conv_ref(x_nchw, params["w1"], params["b1"], True)
    y2 = conv_ref(y1, params["w2"], params["b2"], True)
    wd = params["wd"].astype(jnp.float32)
    pred = jnp.einsum("nchw,kc->nkhw", y2, wd) \
        + params["bd"].astype(jnp.float32).reshape(1, -1, 1, 1)
    ah, aw = _interp_mats_np(H, W, pred.shape[2], pred.shape[3])
    return jnp.einsum("Hh,nkhw,Ww->nkHW",
                      jnp.asarray(ah), pred, jnp.asarray(aw))


# -----------------------------------------------------------------------------
if __name__ == "__main__":
    key = jax.random.PRNGKey(0)
    kx, kp = jax.random.split(key)

    N, C, H, W = 2, 3, 64, 64
    num_classes, c1, c2 = 5, 16, 32

    x = jax.random.normal(kx, (N, C, H, W), jnp.float32)
    params = init_params(kp, C, c1, c2, num_classes)

    pred, aux = model_forward(params, x)
    pred = jax.block_until_ready(pred)

    assert pred.shape == (N, num_classes, H, W), pred.shape
    assert aux is None
    assert bool(jnp.all(jnp.isfinite(pred)))

    ref = _reference_forward(params, x)
    err = float(jnp.max(jnp.abs(pred - ref)))
    assert err < 0.25, f"max abs error vs reference: {err}"

    print("KERNEL_OK")
</pallas_src>

<mosaic_0001>
module attributes {stable_mosaic.version = 11 : i64} {
  func.func @_conv_gemm_kernel(%arg0: i32, %arg1: i32, %arg2: memref<1x27x1024xbf16, #tpu.memory_space<vmem>>, %arg3: memref<16x27xbf16, #tpu.memory_space<vmem>>, %arg4: memref<16x1xf32, #tpu.memory_space<vmem>>, %arg5: memref<1x16x1024xbf16, #tpu.memory_space<vmem>>) attributes {dimension_semantics = [#tpu.dimension_semantics<parallel>, #tpu.dimension_semantics<parallel>], iteration_bounds = array<i64: 2, 1>, scalar_prefetch = 0 : i64, scratch_operands = 0 : i64, tpu.core_type = #tpu.core_type<tc>, window_params = [{transform_indices = @transform_0, window_bounds = array<i64: 1, 27, 1024>}, {pipeline_mode = #tpu.pipeline_mode<synchronous>, transform_indices = @transform_1, window_bounds = array<i64: 16, 27>}, {pipeline_mode = #tpu.pipeline_mode<synchronous>, transform_indices = @transform_2, window_bounds = array<i64: 16, 1>}, {transform_indices = @transform_3, window_bounds = array<i64: 1, 16, 1024>}]} {
    %c0 = arith.constant 0 : index
    %c0_0 = arith.constant 0 : index
    %0 = vector.load %arg3[%c0, %c0_0] : memref<16x27xbf16, #tpu.memory_space<vmem>>, vector<16x27xbf16>
    %c0_1 = arith.constant 0 : index
    %c0_2 = arith.constant 0 : index
    %c0_3 = arith.constant 0 : index
    %1 = vector.load %arg2[%c0_1, %c0_2, %c0_3] : memref<1x27x1024xbf16, #tpu.memory_space<vmem>>, vector<1x27x1024xbf16>
    %2 = vector.shape_cast %1 : vector<1x27x1024xbf16> to vector<27x1024xbf16>
    %cst = arith.constant dense<0.000000e+00> : vector<16x1024xf32>
    %3 = tpu.matmul %0, %2, %cst {dimension_numbers = #tpu.dot_dimension_numbers<[1], [0], [0], [1], [0, 0, 1, 1], [], []>} : vector<16x27xbf16>, vector<27x1024xbf16>, vector<16x1024xf32> -> vector<16x1024xf32>
    %c0_4 = arith.constant 0 : index
    %c0_5 = arith.constant 0 : index
    %4 = vector.load %arg4[%c0_4, %c0_5] : memref<16x1xf32, #tpu.memory_space<vmem>>, vector<16x1xf32>
    %5 = vector.broadcast %4 : vector<16x1xf32> to vector<16x1024xf32>
    %6 = arith.addf %3, %5 : vector<16x1024xf32>
    %cst_6 = arith.constant 0.000000e+00 : f32
    %7 = vector.broadcast %cst_6 : f32 to vector<16x1024xf32>
    %8 = arith.maximumf %6, %7 : vector<16x1024xf32>
    %9 = arith.truncf %8 : vector<16x1024xf32> to vector<16x1024xbf16>
    %c0_7 = arith.constant 0 : index
    %c0_8 = arith.constant 0 : index
    %c0_9 = arith.constant 0 : index
    %10 = vector.load %arg5[%c0_7, %c0_8, %c0_9] : memref<1x16x1024xbf16, #tpu.memory_space<vmem>>, vector<1x16x1024xbf16>
    %11 = vector.shape_cast %10 : vector<1x16x1024xbf16> to vector<16x1024xbf16>
    %12 = vector.shape_cast %9 : vector<16x1024xbf16> to vector<1x16x1024xbf16>
    tpu.vector_store %arg5[%c0_7, %c0_8, %c0_9], %12 {strides = array<i32>} : memref<1x16x1024xbf16, #tpu.memory_space<vmem>>, vector<1x16x1024xbf16>,
    return
  }
  func.func @transform_0(%arg0: i32, %arg1: i32) -> (i32, i32, i32) {
    %c0_i32 = arith.constant 0 : i32
    %c0_i32_0 = arith.constant 0 : i32
    return %arg0, %c0_i32, %arg1 : i32, i32, i32
  }
  func.func @transform_1(%arg0: i32, %arg1: i32) -> (i32, i32) {
    %c0_i32 = arith.constant 0 : i32
    %c0_i32_0 = arith.constant 0 : i32
    %c0_i32_1 = arith.constant 0 : i32
    return %c0_i32, %c0_i32_0 : i32, i32
  }
  func.func @transform_2(%arg0: i32, %arg1: i32) -> (i32, i32) {
    %c0_i32 = arith.constant 0 : i32
    %c0_i32_0 = arith.constant 0 : i32
    %c0_i32_1 = arith.constant 0 : i32
    return %c0_i32, %c0_i32_0 : i32, i32
  }
  func.func @transform_3(%arg0: i32, %arg1: i32) -> (i32, i32, i32) {
    %c0_i32 = arith.constant 0 : i32
    %c0_i32_0 = arith.constant 0 : i32
    return %arg0, %c0_i32, %arg1 : i32, i32, i32
  }
}

module attributes {stable_mosaic.version = 11 : i64} {
  func.func @_conv_gemm_kernel(%arg0: i32, %arg1: memref<1x144x256xbf16, #tpu.memory_space<vmem>>, %arg2: memref<32x144xbf16, #tpu.memory_space<vmem>>, %arg3: memref<32x1xf32, #tpu.memory_space<vmem>>, %arg4: memref<5x32xbf16, #tpu.memory_space<vmem>>, %arg5: memref<5x1xf32, #tpu.memory_space<vmem>>, %arg6: memref<256x4096xf32, #tpu.memory_space<vmem>>, %arg7: memref<1x5x4096xf32, #tpu.memory_space<vmem>>) attributes {dimension_semantics = [#tpu.dimension_semantics<parallel>], iteration_bounds = array<i64: 2>, scalar_prefetch = 0 : i64, scratch_operands = 0 : i64, tpu.core_type = #tpu.core_type<tc>, window_params = [{transform_indices = @transform_0, window_bounds = array<i64: 1, 144, 256>}, {pipeline_mode = #tpu.pipeline_mode<synchronous>, transform_indices = @transform_1, window_bounds = array<i64: 32, 144>}, {pipeline_mode = #tpu.pipeline_mode<synchronous>, transform_indices = @transform_2, window_bounds = array<i64: 32, 1>}, {pipeline_mode = #tpu.pipeline_mode<synchronous>, transform_indices = @transform_3, window_bounds = array<i64: 5, 32>}, {pipeline_mode = #tpu.pipeline_mode<synchronous>, transform_indices = @transform_4, window_bounds = array<i64: 5, 1>}, {pipeline_mode = #tpu.pipeline_mode<synchronous>, transform_indices = @transform_5, window_bounds = array<i64: 256, 4096>}, {transform_indices = @transform_6, window_bounds = array<i64: 1, 5, 4096>}]} {
    %c0 = arith.constant 0 : index
    %c0_0 = arith.constant 0 : index
    %0 = vector.load %arg2[%c0, %c0_0] : memref<32x144xbf16, #tpu.memory_space<vmem>>, vector<32x144xbf16>
    %c0_1 = arith.constant 0 : index
    %c0_2 = arith.constant 0 : index
    %c0_3 = arith.constant 0 : index
    %1 = vector.load %arg1[%c0_1, %c0_2, %c0_3] : memref<1x144x256xbf16, #tpu.memory_space<vmem>>, vector<1x144x256xbf16>
    %2 = vector.shape_cast %1 : vector<1x144x256xbf16> to vector<144x256xbf16>
    %cst = arith.constant dense<0.000000e+00> : vector<32x256xf32>
    %3 = tpu.matmul %0, %2, %cst {dimension_numbers = #tpu.dot_dimension_numbers<[1], [0], [0], [1], [0, 0, 1, 1], [], []>} : vector<32x144xbf16>, vector<144x256xbf16>, vector<32x256xf32> -> vector<32x256xf32>
    %c0_4 = arith.constant 0 : index
    %c0_5 = arith.constant 0 : index
    %4 = vector.load %arg3[%c0_4, %c0_5] : memref<32x1xf32, #tpu.memory_space<vmem>>, vector<32x1xf32>
    %5 = vector.broadcast %4 : vector<32x1xf32> to vector<32x256xf32>
    %6 = arith.addf %3, %5 : vector<32x256xf32>
    %cst_6 = arith.constant 0.000000e+00 : f32
    %7 = vector.broadcast %cst_6 : f32 to vector<32x256xf32>
    %8 = arith.maximumf %6, %7 : vector<32x256xf32>
    %c0_7 = arith.constant 0 : index
    %c0_8 = arith.constant 0 : index
    %9 = vector.load %arg4[%c0_7, %c0_8] : memref<5x32xbf16, #tpu.memory_space<vmem>>, vector<5x32xbf16>
    %10 = arith.extf %9 : vector<5x32xbf16> to vector<5x32xf32>
    %cst_9 = arith.constant dense<0.000000e+00> : vector<5x256xf32>
    %11 = tpu.matmul %10, %8, %cst_9 {dimension_numbers = #tpu.dot_dimension_numbers<[1], [0], [0], [1], [0, 0, 1, 1], [], []>} : vector<5x32xf32>, vector<32x256xf32>, vector<5x256xf32> -> vector<5x256xf32>
    %c0_10 = arith.constant 0 : index
    %c0_11 = arith.constant 0 : index
    %12 = vector.load %arg5[%c0_10, %c0_11] : memref<5x1xf32, #tpu.memory_space<vmem>>, vector<5x1xf32>
    %13 = vector.broadcast %12 : vector<5x1xf32> to vector<5x256xf32>
    %14 = arith.addf %11, %13 : vector<5x256xf32>
    %c0_12 = arith.constant 0 : index
    %c0_13 = arith.constant 0 : index
    %15 = vector.load %arg6[%c0_12, %c0_13] : memref<256x4096xf32, #tpu.memory_space<vmem>>, vector<256x4096xf32>
    %cst_14 = arith.constant dense<0.000000e+00> : vector<5x4096xf32>
    %16 = tpu.matmul %14, %15, %cst_14 {dimension_numbers = #tpu.dot_dimension_numbers<[1], [0], [0], [1], [0, 0, 1, 1], [], []>} : vector<5x256xf32>, vector<256x4096xf32>, vector<5x4096xf32> -> vector<5x4096xf32>
    %c0_15 = arith.constant 0 : index
    %c0_16 = arith.constant 0 : index
    %c0_17 = arith.constant 0 : index
    %17 = vector.load %arg7[%c0_15, %c0_16, %c0_17] : memref<1x5x4096xf32, #tpu.memory_space<vmem>>, vector<1x5x4096xf32>
    %18 = vector.shape_cast %17 : vector<1x5x4096xf32> to vector<5x4096xf32>
    %19 = vector.shape_cast %16 : vector<5x4096xf32> to vector<1x5x4096xf32>
    tpu.vector_store %arg7[%c0_15, %c0_16, %c0_17], %19 {strides = array<i32>} : memref<1x5x4096xf32, #tpu.memory_space<vmem>>, vector<1x5x4096xf32>,
    return
  }
  func.func @transform_0(%arg0: i32) -> (i32, i32, i32) {
    %c0_i32 = arith.constant 0 : i32
    %c0_i32_0 = arith.constant 0 : i32
    %c0_i32_1 = arith.constant 0 : i32
    return %arg0, %c0_i32, %c0_i32_0 : i32, i32, i32
  }
  func.func @transform_1(%arg0: i32) -> (i32, i32) {
    %c0_i32 = arith.constant 0 : i32
    %c0_i32_0 = arith.constant 0 : i32
    %c0_i32_1 = arith.constant 0 : i32
    return %c0_i32, %c0_i32_0 : i32, i32
  }
  func.func @transform_2(%arg0: i32) -> (i32, i32) {
    %c0_i32 = arith.constant 0 : i32
    %c0_i32_0 = arith.constant 0 : i32
    %c0_i32_1 = arith.constant 0 : i32
    return %c0_i32, %c0_i32_0 : i32, i32
  }
  func.func @transform_3(%arg0: i32) -> (i32, i32) {
    %c0_i32 = arith.constant 0 : i32
    %c0_i32_0 = arith.constant 0 : i32
    %c0_i32_1 = arith.constant 0 : i32
    return %c0_i32, %c0_i32_0 : i32, i32
  }
  func.func @transform_4(%arg0: i32) -> (i32, i32) {
    %c0_i32 = arith.constant 0 : i32
    %c0_i32_0 = arith.constant 0 : i32
    %c0_i32_1 = arith.constant 0 : i32
    return %c0_i32, %c0_i32_0 : i32, i32
  }
  func.func @transform_5(%arg0: i32) -> (i32, i32) {
    %c0_i32 = arith.constant 0 : i32
    %c0_i32_0 = arith.constant 0 : i32
    %c0_i32_1 = arith.constant 0 : i32
    return %c0_i32, %c0_i32_0 : i32, i32
  }
  func.func @transform_6(%arg0: i32) -> (i32, i32, i32) {
    %c0_i32 = arith.constant 0 : i32
    %c0_i32_0 = arith.constant 0 : i32
    %c0_i32_1 = arith.constant 0 : i32
    return %arg0, %c0_i32, %c0_i32_0 : i32, i32, i32
  }
}

</mosaic_0001>

<bundles_post_ra>
// kernel: model_forward.2
= control target key start
LH: loop header
LB: loop body
LE: loop exit
PB: predicated region body
PF: predicated region fallthrough
CT: control target
= control target key end

     0   :  { %s805_s12 = smov 0   ;;  %s807_s13 = smov 0   ;;  %s888_s0 = inlined_call_operand.vmem [shape: bf16[2,27,1024], index: 0, kind: input, shape index: {}]   ;;  %s889_s1 = inlined_call_operand.vmem [shape: bf16[16,27], index: 1, kind: input, shape index: {}]   ;;  %s890_s2 = inlined_call_operand.vmem [shape: f32[16,1], index: 2, kind: input, shape index: {}]   ;;  %s891_s3 = inlined_call_operand.vmem [shape: bf16[2,16,1024], index: 3, kind: output, shape index: {}]  }
   0x1   :  { %s809_s14 = smov 0  }
   0x2 LB: > { %s25_s15 = sadd.s32 1, %s777_s13  ;;  %p685_p0 = scmp.ge.s32.totalorder %s781_s14, 1  ;;  %s781_s14 = sphi %s809_s14, %s13_s14   ;;  %s777_s13 = sphi %s807_s13, %s893_s13   ;;  %s773_s12 = sphi %s805_s12, %s892_s12  }
   0x3   : > { %p27_p1 = scmp.ge.s32.totalorder %s25_s15, 2  ;;  %p158_p2 = scmp.lt.s32.totalorder %s781_s14, 3 }
   0x5   : > { %s895_s15 = smov (%p27_p1, %s25_s15), 0  ;;  %p159_p3 = pnand %p685_p0, %p158_p2 }
   0x6   : > { %p191_p4 = scmp.lt.s32.totalorder (!%p159_p3), %s773_s12, 1  ;;  %vm322_vm0 = vcmask (!%p159_p3), 1044480   ;;  %v783_v0 = vmov (!%p159_p3), 0   ;;  %v229_v1 = vld [vmem:[%s890_s2] sm:$0xff] (!%p159_p3)  ;;  %vm323_vm1 = vcmask (!%p159_p3), 1045504   ;;  %v784_v2 = vmov (!%p159_p3), 65535  }
   0x7   : > { %162 = sbr.rel (%p159_p3) target bundleno = 260 (0x104), region = 32  ;;  %382 = vmatprep.mubr.bf16.mxu0 (!%p159_p3), %v783_v0  ;;  %425 = vmatprep.mubr.bf16.mxu1 (!%p159_p3), %v783_v0  ;;  %v324_v3 = vsel (!%p159_p3), %vm322_vm0, 4294967295, %v784_v2  ;;  %v230_v4 = vld [vmem:[%s890_s2 + $0x8] sm:$0xff] (!%p159_p3)  ;;  %v758_v37 = vld [vmem:[%s889_s1] sm:$0xff] (!%p159_p3)   ;;  %vm318_vm2 = vcmask (!%p159_p3), 220160  }
   0x8   : > { %757 = vset.pattern.permute.xlu0 (!%p159_p3), %v783_v0  ;;  %v325_v13 = vsel (!%p159_p3), %vm323_vm1, %v324_v3, 0 }
   0x9   : > { %233 = vperm.xlu0 (!%p159_p3), %757, %v229_v1  }
   0xd   : > { %238 = vperm.xlu0 (!%p159_p3), %757, %v230_v4  }
   0xe   : > { %s897_s12 = smov (!%p191_p4, %s773_s12), 1 }
   0xf   : > { %s721_s18 = sshll.u32 %s897_s12, 7  ;;  %s722_s26 = sshll.u32 %s897_s12, 6 }
  0x10   : > { %s838_s23 = scalar_lea.vmem %s888_s0, %s721_s18  ;;  %s869_s29 = scalar_lea.vmem %s891_s3, %s722_s26 }
  0x11   : > { %v213_v5 = vld [vmem:[%s838_s23] sm:$0xff]  ;;  %v214_v7 = vld [vmem:[%s838_s23 + $0x8] sm:$0xff]  ;;  %v215_v20 = vld [vmem:[%s838_s23 + $0x10] sm:$0xff] }
  0x12   : > { %v217_v6 = vld [vmem:[%s838_s23 + $0x20] sm:$0xff]  ;;  %v218_v9 = vld [vmem:[%s838_s23 + $0x28] sm:$0xff]  ;;  %v219_v23 = vld [vmem:[%s838_s23 + $0x30] sm:$0xff] }
  0x13   : > { %v692_v8 = vcombine.high %v213_v5, %v217_v6  ;;  %v691_v10 = vcombine.low %v213_v5, %v217_v6  ;;  %v221_v11 = vld [vmem:[%s838_s23 + $0x40] sm:$0xff]  ;;  %v694_v14 = vcombine.high %v214_v7, %v218_v9  ;;  %v693_v15 = vcombine.low %v214_v7, %v218_v9  ;;  %v222_v17 = vld [vmem:[%s838_s23 + $0x48] sm:$0xff]  ;;  %v216_v24 = vld [vmem:[%s838_s23 + $0x18] sm:$0xff] }
  0x14   : > { %v225_v12 = vld [vmem:[%s838_s23 + $0x60] sm:$0x33]  ;;  %v226_v18 = vld [vmem:[%s838_s23 + $0x68] sm:$0x33]  ;;  %v220_v25 = vld [vmem:[%s838_s23 + $0x38] sm:$0xff]  ;;  %v696_v33 = vcombine.high %v215_v20, %v219_v23  ;;  %v695_v39 = vcombine.low %v215_v20, %v219_v23 }
  0x15   : > { %v700_v16 = vcombine.high %v221_v11, %v225_v12  ;;  %v699_v19 = vcombine.low %v221_v11, %v225_v12  ;;  %350 = vmatprep.subr.bf16.mxu0 %v692_v8  ;;  %v702_v21 = vcombine.high %v222_v17, %v226_v18  ;;  %v701_v22 = vcombine.low %v222_v17, %v226_v18  ;;  %v223_v28 = vld [vmem:[%s838_s23 + $0x50] sm:$0xff]  ;;  %v224_v30 = vld [vmem:[%s838_s23 + $0x58] sm:$0xff] }
  0x16   : > { %393 = vmatprep.subr.bf16.mxu1 %v694_v14  ;;  %351 = vmatpush1.bf16.msra.mxu0 %v691_v10  ;;  %v227_v29 = vld [vmem:[%s838_s23 + $0x70] sm:$0x33]  ;;  %v228_v34 = vld [vmem:[%s838_s23 + $0x78] sm:$0x33]  ;;  %v698_v35 = vcombine.high %v216_v24, %v220_v25  ;;  %v697_v41 = vcombine.low %v216_v24, %v220_v25 }
  0x17   : > { %v330_v26 = vand.u32 %v700_v16, %v325_v13  ;;  %v327_v27 = vand.u32 %v699_v19, %v325_v13  ;;  %394 = vmatpush1.bf16.msra.mxu1 %v693_v15  ;;  %v336_v31 = vand.u32 %v702_v21, %v325_v13  ;;  %v333_v32 = vand.u32 %v701_v22, %v325_v13 }
  0x18   : > { %v704_v36 = vcombine.high %v223_v28, %v227_v29  ;;  %v706_v38 = vcombine.high %v224_v30, %v228_v34  ;;  %v703_v40 = vcombine.low %v223_v28, %v227_v29  ;;  %v705_v43 = vcombine.low %v224_v30, %v228_v34 }
  0x19   : > { %352 = vmatprep.subr.bf16.mxu0 %v330_v26  ;;  %395 = vmatprep.subr.bf16.mxu1 %v336_v31 }
  0x1a   : > { %353 = vmatpush1.bf16.msra.mxu0 %v327_v27  ;;  %v342_v42 = vand.u32 %v704_v36, %v325_v13  ;;  %v348_v44 = vand.u32 %v706_v38, %v325_v13  ;;  %v339_v45 = vand.u32 %v703_v40, %v325_v13  ;;  %v345_v46 = vand.u32 %v705_v43, %v325_v13 }
  0x1b   : > { %396 = vmatpush1.bf16.msra.mxu1 %v333_v32  ;;  %436 = vmatprep.subr.bf16.mxu0 %v696_v33 }
  0x1c   : > { %479 = vmatprep.subr.bf16.mxu1 %v698_v35 }
  0x1d   : > { %707 = vmatmul.mubr.msk.bf16.vlgmr.msra.gmra.mrb[0].mxu0 %vm318_vm2, %v758_v37 }
  0x1e   : > { %708 = vmatmul.mubr.msk.bf16.vlgmr.msra.gmra.mrb[0].mxu1 %vm318_vm2, %v758_v37  ;;  %437 = vmatpush1.bf16.msra.mxu0 %v695_v39 }
  0x1f   : > { %480 = vmatpush1.bf16.msra.mxu1 %v697_v41  ;;  %438 = vmatprep.subr.bf16.mxu0 %v342_v42 }
  0x20   : > { %481 = vmatprep.subr.bf16.mxu1 %v348_v44  ;;  %468 = vmatprep.mubr.bf16.mxu0 %v783_v0 }
  0x21   : > { %511 = vmatprep.mubr.bf16.mxu1 %v783_v0 }
  0x22   : > { %439 = vmatpush1.bf16.msra.mxu0 %v339_v45 }
  0x23   : > { %482 = vmatpush1.bf16.msra.mxu1 %v345_v46 }
  0x25   : > { %709 = vmatmul.mubr.msk.bf16.vlgmr.msra.gmra.mrb[4].mxu0 %vm318_vm2, %v758_v37 }
  0x26   : > { %710 = vmatmul.mubr.msk.bf16.vlgmr.msra.gmra.mrb[4].mxu1 %vm318_vm2, %v758_v37 }
  0x88   : > { %v234_v47 = vpop.permute.xlu0 %233 }
  0x8c   : > { %v239_v49 = vpop.permute.xlu0 %238 }
  0xf0   : > { %v384_v48 = vpop.f32.mrb[0].mxu0 }
  0xf1   : > { %v385_v50 = vadd.f32 %v384_v48, %v234_v47  ;;  %v427_v51 = vpop.f32.mrb[0].mxu1  ;;  %v386_v52 = vpop.f32.mrb[1].mxu0 }
  0xf2   : > { %v428_v53 = vadd.f32 %v427_v51, %v234_v47  ;;  %v387_v54 = vadd.f32 %v386_v52, %v234_v47  ;;  %v429_v55 = vpop.f32.mrb[1].mxu1  ;;  %v388_v56 = vpop.f32.mrb[2].mxu0 }
  0xf3   : > { %v522_v57 = vmax.f32 %v385_v50, 0.0  ;;  %v430_v58 = vadd.f32 %v429_v55, %v234_v47  ;;  %v389_v59 = vadd.f32 %v388_v56, %v239_v49  ;;  %v431_v60 = vpop.f32.mrb[2].mxu1  ;;  %v390_v61 = vpop.f32.mrb[3].mxu0 }
  0xf4   : > { %v524_v62 = vmax.f32 %v428_v53, 0.0  ;;  %v523_v63 = vmax.f32 %v387_v54, 0.0  ;;  %v432_v0 = vadd.f32 %v431_v60, %v239_v49  ;;  %v391_v1 = vadd.f32 %v390_v61, %v239_v49  ;;  %v433_v2 = vpop.f32.mrb[3].mxu1 }
  0xf5   : > { %v525_v3 = vmax.f32 %v430_v58, 0.0  ;;  %v530_v4 = vmax.f32 %v389_v59, 0.0  ;;  %v434_v5 = vadd.f32 %v433_v2, %v239_v49 }
  0xf6   : > { %v723_v6 = vpack.c.bf16 %v523_v63, %v522_v57  ;;  %v532_v7 = vmax.f32 %v432_v0, 0.0  ;;  %v531_v8 = vmax.f32 %v391_v1, 0.0 }
  0xf7   : > { %v724_v9 = vpack.c.bf16 %v525_v3, %v524_v62  ;;  %v533_v10 = vmax.f32 %v434_v5, 0.0 }
  0xf8   : > { %586 = vst [vmem:[%s869_s29] sm:$0xff] %v723_v6  ;;  %v727_v11 = vpack.c.bf16 %v531_v8, %v530_v4  ;;  %v470_v12 = vpop.f32.mrb[4].mxu0 }
  0xf9   : > { %587 = vst [vmem:[%s869_s29 + $0x8] sm:$0xff] %v724_v9  ;;  %v728_v13 = vpack.c.bf16 %v533_v10, %v532_v7  ;;  %v471_v14 = vadd.f32 %v470_v12, %v234_v47  ;;  %v513_v15 = vpop.f32.mrb[4].mxu1  ;;  %v472_v16 = vpop.f32.mrb[5].mxu0 }
  0xfa   : > { %590 = vst [vmem:[%s869_s29 + $0x20] sm:$0xff] %v727_v11  ;;  %v514_v17 = vadd.f32 %v513_v15, %v234_v47  ;;  %v473_v18 = vadd.f32 %v472_v16, %v234_v47  ;;  %v515_v19 = vpop.f32.mrb[5].mxu1  ;;  %v474_v20 = vpop.f32.mrb[6].mxu0 }
  0xfb   : > { %591 = vst [vmem:[%s869_s29 + $0x28] sm:$0xff] %v728_v13  ;;  %v526_v21 = vmax.f32 %v471_v14, 0.0  ;;  %v516_v22 = vadd.f32 %v515_v19, %v234_v47  ;;  %v475_v23 = vadd.f32 %v474_v20, %v239_v49  ;;  %v517_v24 = vpop.f32.mrb[6].mxu1  ;;  %v476_v25 = vpop.f32.mrb[7].mxu0 }
  0xfc   : > { %v528_v26 = vmax.f32 %v514_v17, 0.0  ;;  %v527_v27 = vmax.f32 %v473_v18, 0.0  ;;  %v518_v28 = vadd.f32 %v517_v24, %v239_v49  ;;  %v477_v29 = vadd.f32 %v476_v25, %v239_v49  ;;  %v519_v30 = vpop.f32.mrb[7].mxu1 }
  0xfd   : > { %v529_v31 = vmax.f32 %v516_v22, 0.0  ;;  %v534_v32 = vmax.f32 %v475_v23, 0.0  ;;  %v520_v33 = vadd.f32 %v519_v30, %v239_v49 }
  0xfe   : > { %v725_v34 = vpack.c.bf16 %v527_v27, %v526_v21  ;;  %v536_v35 = vmax.f32 %v518_v28, 0.0  ;;  %v535_v36 = vmax.f32 %v477_v29, 0.0 }
  0xff   : > { %v726_v37 = vpack.c.bf16 %v529_v31, %v528_v26  ;;  %v537_v38 = vmax.f32 %v520_v33, 0.0 }
 0x100   : > { %588 = vst [vmem:[%s869_s29 + $0x10] sm:$0xff] %v725_v34  ;;  %v729_v39 = vpack.c.bf16 %v535_v36, %v534_v32 }
 0x101   : > { %589 = vst [vmem:[%s869_s29 + $0x18] sm:$0xff] %v726_v37  ;;  %v730_v40 = vpack.c.bf16 %v537_v38, %v536_v35 }
 0x102   : > { %592 = vst [vmem:[%s869_s29 + $0x30] sm:$0xff] %v729_v39 }
 0x103   : > { %593 = vst [vmem:[%s869_s29 + $0x38] sm:$0xff] %v730_v40 }
 0x104 PF: > { %s13_s14 = sadd.s32 1, %s781_s14   ;;  %s892_s12 = smov %s777_s13 }
 0x105   : > { %p10_p5 = scmp.ge.s32.totalorder %s13_s14, 4   ;;  %s893_s13 = smov %s895_s15 }
 0x107   :  { %12 = sbr.rel (!%p10_p5) target bundleno = 2 (0x2), region = 62 }

// kernel: model_forward.3
= control target key start
LH: loop header
LB: loop body
LE: loop exit
PB: predicated region body
PF: predicated region fallthrough
CT: control target
= control target key end

     0   :  { %s3964_s21 = smov 0   ;;  %s7179_s0 = inlined_call_operand.vmem [shape: bf16[2,144,256], index: 0, kind: input, shape index: {}]   ;;  %s7180_s1 = inlined_call_operand.vmem [shape: bf16[32,144], index: 1, kind: input, shape index: {}]   ;;  %s7181_s2 = inlined_call_operand.vmem [shape: f32[32,1], index: 2, kind: input, shape index: {}]   ;;  %s7182_s3 = inlined_call_operand.vmem [shape: bf16[5,32], index: 3, kind: input, shape index: {}]   ;;  %s7183_s4 = inlined_call_operand.vmem [shape: f32[5,1], index: 4, kind: input, shape index: {}]   ;;  %s7184_s5 = inlined_call_operand.vmem [shape: f32[256,4096], index: 5, kind: input, shape index: {}]   ;;  %s7185_s6 = inlined_call_operand.vmem [shape: f32[2,5,4096], index: 6, kind: output, shape index: {}]  }
   0x1 LB: > { %s2805_s22 = sadd.s32 4294967295, %s3925_s21   ;;  %p2809_p0 = scmp.ge.s32.totalorder %s3925_s21, 1  ;;  %s3925_s21 = sphi %s3964_s21, %s16_s21  }
   0x2   : > { %p212_p1 = scmp.lt.s32.totalorder %s3925_s21, 3 }
   0x4   : > { %p213_p2 = pnand %p2809_p0, %p212_p1 }
   0x5   : > { %p242_p3 = scmp.lt.s32.totalorder (!%p213_p2), %s2805_s22, 1  ;;  %vm407_vm0 = vcmask (!%p213_p2), 130048   ;;  %v3915_v0 = vld [vmem:[%s7180_s1 + $0x4] ss:$8 sps:$4 sm:$0xff] (!%p213_p2)   ;;  %v3927_v1 = vmov (!%p213_p2), 0   ;;  %v277_v3 = vld [vmem:[%s7181_s2 + $0x10] sm:$0xff] (!%p213_p2) }
   0x6   : > { %216 = sbr.rel (%p213_p2) target bundleno = 1166 (0x48e), region = 44  ;;  %3884 = vset.pattern.permute.xlu0 (!%p213_p2), %v3927_v1  ;;  %v275_v2 = vld [vmem:[%s7181_s2] sm:$0xff] (!%p213_p2)  ;;  %3885 = vset.pattern.permute.xlu1 (!%p213_p2), %v3927_v1  ;;  %v276_v4 = vld [vmem:[%s7181_s2 + $0x8] sm:$0xff] (!%p213_p2)  ;;  %v278_v5 = vld [vmem:[%s7181_s2 + $0x18] sm:$0xff] (!%p213_p2)  ;;  %v3928_v28 = vmov (!%p213_p2), 0.0   ;;  %vm483_vm1 = vcmask (!%p213_p2), 261120  }
   0x7   : > { %2835 = vmatprep.mubr.msk.bf16.mxu0 (!%p213_p2), %vm407_vm0, %v3915_v0  ;;  %281 = vperm.xlu0 (!%p213_p2), %3884, %v275_v2   ;;  %v477_v6 = vld [vmem:[%s7183_s4] sm:$0x1f] (!%p213_p2)  ;;  %v3916_v26 = vld [vmem:[%s7180_s1 + $0x14] ss:$8 sps:$4 sm:$0xff] (!%p213_p2)   ;;  %v3918_v27 = vld [vmem:[%s7180_s1 + $0x10] ss:$8 sps:$4 sm:$0xff] (!%p213_p2)  }
   0x8   : > { %291 = vperm.xlu1 (!%p213_p2), %3885, %v277_v3   ;;  %v3913_v25 = vld [vmem:[%s7180_s1] ss:$8 sps:$4 sm:$0xff] (!%p213_p2)   ;;  %551 = vmatprep.mubr.f32.mxu1 (!%p213_p2), %v3928_v28  ;;  %v561_v29 = vld [vmem:[%s7184_s5 + $0x18] sm:$0xff] (!%p213_p2)  ;;  %v560_v32 = vld [vmem:[%s7184_s5 + $0x10] sm:$0xff] (!%p213_p2) }
   0x9   : > { %v593_v30 = vld [vmem:[%s7184_s5 + $0x118] sm:$0xff] (!%p213_p2)  ;;  %v592_v33 = vld [vmem:[%s7184_s5 + $0x110] sm:$0xff] (!%p213_p2) }
   0xa   : > { %v2913_v31 = vpack.c.bf16 (!%p213_p2), %v593_v30, %v561_v29  ;;  %v2915_v34 = vpack.c.bf16 (!%p213_p2), %v592_v33, %v560_v32  ;;  %v625_v35 = vld [vmem:[%s7184_s5 + $0x218] sm:$0xff] (!%p213_p2)  ;;  %v624_v38 = vld [vmem:[%s7184_s5 + $0x210] sm:$0xff] (!%p213_p2) }
   0xb   : > { %286 = vperm.xlu0 (!%p213_p2), %3884, %v276_v4   ;;  %v657_v36 = vld [vmem:[%s7184_s5 + $0x318] sm:$0xff] (!%p213_p2)  ;;  %v656_v39 = vld [vmem:[%s7184_s5 + $0x310] sm:$0xff] (!%p213_p2) }
   0xc   : > { %296 = vperm.xlu1 (!%p213_p2), %3885, %v278_v5   ;;  %v2917_v37 = vpack.c.bf16 (!%p213_p2), %v657_v36, %v625_v35  ;;  %v2919_v40 = vpack.c.bf16 (!%p213_p2), %v656_v39, %v624_v38  ;;  %v689_v41 = vld [vmem:[%s7184_s5 + $0x418] sm:$0xff] (!%p213_p2)  ;;  %v688_v44 = vld [vmem:[%s7184_s5 + $0x410] sm:$0xff] (!%p213_p2) }
   0xd   : > { %s7187_s22 = smov (!%p242_p3, %s2805_s22), 1  ;;  %v721_v42 = vld [vmem:[%s7184_s5 + $0x518] sm:$0xff]  ;;  %v720_v45 = vld [vmem:[%s7184_s5 + $0x510] sm:$0xff] }
   0xe   : > { %s3873_s29 = smul.u32 144, %s7187_s22  ;;  %v2921_v43 = vpack.c.bf16 %v721_v42, %v689_v41  ;;  %v2923_v46 = vpack.c.bf16 %v720_v45, %v688_v44  ;;  %v753_v47 = vld [vmem:[%s7184_s5 + $0x618] sm:$0xff]  ;;  %v752_v50 = vld [vmem:[%s7184_s5 + $0x610] sm:$0xff]  ;;  %s2840_s13 = sshll.u32 %s7187_s22, 8 }
   0xf   : > { %480 = vperm.xlu0 %3884, %v477_v6   ;;  %v785_v48 = vld [vmem:[%s7184_s5 + $0x718] sm:$0xff]  ;;  %v784_v51 = vld [vmem:[%s7184_s5 + $0x710] sm:$0xff]  ;;  %s5748_s9 = scalar_lea.vmem %s7185_s6, %s2840_s13 }
  0x10   : > { %s3994_s12 = scalar_lea.vmem %s7179_s0, %s3873_s29  ;;  %v2925_v49 = vpack.c.bf16 %v785_v48, %v753_v47  ;;  %v2927_v52 = vpack.c.bf16 %v784_v51, %v752_v50  ;;  %v817_v53 = vld [vmem:[%s7184_s5 + $0x818] sm:$0xff]  ;;  %v816_v56 = vld [vmem:[%s7184_s5 + $0x810] sm:$0xff] }
  0x11   : > { %v3886_v7 = vld [vmem:[%s3994_s12 + $0x4] ss:$8 sps:$4 sm:$0xff]   ;;  %v3888_v8 = vld [vmem:[%s3994_s12] ss:$8 sps:$4 sm:$0xff]   ;;  %v3889_v9 = vld [vmem:[%s3994_s12 + $0x14] ss:$8 sps:$4 sm:$0xff]  }
  0x12   : > { %414 = vmatprep.subr.bf16.mxu0 %v3886_v7  ;;  %v3891_v10 = vld [vmem:[%s3994_s12 + $0x10] ss:$8 sps:$4 sm:$0xff]   ;;  %v3892_v11 = vld [vmem:[%s3994_s12 + $0x24] ss:$8 sps:$4 sm:$0xff]   ;;  %v3894_v12 = vld [vmem:[%s3994_s12 + $0x20] ss:$8 sps:$4 sm:$0xff]  }
  0x13   : > { %415 = vmatpush1.bf16.msra.mxu0 %v3888_v8  ;;  %v3895_v13 = vld [vmem:[%s3994_s12 + $0x34] ss:$8 sps:$4 sm:$0xff]   ;;  %v3897_v14 = vld [vmem:[%s3994_s12 + $0x30] ss:$8 sps:$4 sm:$0xff]   ;;  %v3898_v15 = vld [vmem:[%s3994_s12 + $0x44] ss:$8 sps:$4 sm:$0xff]  }
  0x14   : > { %416 = vmatprep.subr.bf16.mxu0 %v3889_v9  ;;  %v3900_v16 = vld [vmem:[%s3994_s12 + $0x40] ss:$8 sps:$4 sm:$0xff]   ;;  %v3901_v17 = vld [vmem:[%s3994_s12 + $0x54] ss:$8 sps:$4 sm:$0xff]   ;;  %v3903_v18 = vld [vmem:[%s3994_s12 + $0x50] ss:$8 sps:$4 sm:$0xff]  }
  0x15   : > { %v3904_v19 = vld [vmem:[%s3994_s12 + $0x64] ss:$8 sps:$4 sm:$0xff]   ;;  %v3906_v20 = vld [vmem:[%s3994_s12 + $0x60] ss:$8 sps:$4 sm:$0xff]   ;;  %v3907_v21 = vld [vmem:[%s3994_s12 + $0x74] ss:$8 sps:$4 sm:$0xff]  }
  0x16   : > { %v3909_v22 = vld [vmem:[%s3994_s12 + $0x70] ss:$8 sps:$4 sm:$0xff]   ;;  %v3910_v23 = vld [vmem:[%s3994_s12 + $0x84] ss:$8 sps:$4 sm:$0xff]   ;;  %v3912_v24 = vld [vmem:[%s3994_s12 + $0x80] ss:$8 sps:$4 sm:$0xff]  }
  0x17   : > { %417 = vmatpush1.bf16.msra.mxu0 %v3891_v10  ;;  %v849_v54 = vld [vmem:[%s7184_s5 + $0x918] sm:$0xff]  ;;  %v848_v57 = vld [vmem:[%s7184_s5 + $0x910] sm:$0xff] }
  0x18   : > { %418 = vmatprep.subr.bf16.mxu0 %v3892_v11  ;;  %v2929_v55 = vpack.c.bf16 %v849_v54, %v817_v53  ;;  %v2931_v58 = vpack.c.bf16 %v848_v57, %v816_v56  ;;  %v881_v59 = vld [vmem:[%s7184_s5 + $0xa18] sm:$0xff]  ;;  %v880_v62 = vld [vmem:[%s7184_s5 + $0xa10] sm:$0xff] }
  0x19   : > { %v913_v60 = vld [vmem:[%s7184_s5 + $0xb18] sm:$0xff]  ;;  %v912_v63 = vld [vmem:[%s7184_s5 + $0xb10] sm:$0xff] }
  0x1a   : > { %v2933_v61 = vpack.c.bf16 %v913_v60, %v881_v59  ;;  %v2935_v0 = vpack.c.bf16 %v912_v63, %v880_v62  ;;  %v945_v1 = vld [vmem:[%s7184_s5 + $0xc18] sm:$0xff]  ;;  %v944_v4 = vld [vmem:[%s7184_s5 + $0xc10] sm:$0xff] }
  0x1b   : > { %419 = vmatpush1.bf16.msra.mxu0 %v3894_v12  ;;  %v977_v2 = vld [vmem:[%s7184_s5 + $0xd18] sm:$0xff]  ;;  %v976_v5 = vld [vmem:[%s7184_s5 + $0xd10] sm:$0xff] }
  0x1c   : > { %420 = vmatprep.subr.bf16.mxu0 %v3895_v13  ;;  %v2937_v3 = vpack.c.bf16 %v977_v2, %v945_v1  ;;  %v2939_v6 = vpack.c.bf16 %v976_v5, %v944_v4  ;;  %v1009_v7 = vld [vmem:[%s7184_s5 + $0xe18] sm:$0xff]  ;;  %v1008_v10 = vld [vmem:[%s7184_s5 + $0xe10] sm:$0xff] }
  0x1d   : > { %v1041_v8 = vld [vmem:[%s7184_s5 + $0xf18] sm:$0xff]  ;;  %v1040_v11 = vld [vmem:[%s7184_s5 + $0xf10] sm:$0xff] }
  0x1e   : > { %v2941_v9 = vpack.c.bf16 %v1041_v8, %v1009_v7  ;;  %v2943_v12 = vpack.c.bf16 %v1040_v11, %v1008_v10  ;;  %v1073_v13 = vld [vmem:[%s7184_s5 + $0x1018] sm:$0xff]  ;;  %v1200_v28 = vld [vmem:[%s7184_s5 + $0x1410] sm:$0xff] }
  0x1f   : > { %421 = vmatpush1.bf16.msra.mxu0 %v3897_v14  ;;  %v1105_v14 = vld [vmem:[%s7184_s5 + $0x1118] sm:$0xff]  ;;  %v1232_v29 = vld [vmem:[%s7184_s5 + $0x1510] sm:$0xff] }
  0x20   : > { %422 = vmatprep.subr.bf16.mxu0 %v3898_v15  ;;  %v2945_v15 = vpack.c.bf16 %v1105_v14, %v1073_v13  ;;  %v2955_v30 = vpack.c.bf16 %v1232_v29, %v1200_v28  ;;  %v1297_v32 = vld [vmem:[%s7184_s5 + $0x1718] sm:$0xff]  ;;  %v1296_v35 = vld [vmem:[%s7184_s5 + $0x1710] sm:$0xff]  ;;  %v590_v28 = vld [vmem:[%s7184_s5 + $0x100] sm:$0xff] }
  0x21   : > { %v1361_v38 = vld [vmem:[%s7184_s5 + $0x1918] sm:$0xff]  ;;  %v1360_v41 = vld [vmem:[%s7184_s5 + $0x1910] sm:$0xff]  ;;  %v623_v29 = vld [vmem:[%s7184_s5 + $0x208] sm:$0xff] }
  0x22   : > { %v1425_v44 = vld [vmem:[%s7184_s5 + $0x1b18] sm:$0xff]  ;;  %v1424_v47 = vld [vmem:[%s7184_s5 + $0x1b10] sm:$0xff] }
  0x23   : > { %423 = vmatpush1.bf16.msra.mxu0 %v3900_v16  ;;  %v1072_v16 = vld [vmem:[%s7184_s5 + $0x1010] sm:$0xff]  ;;  %v1489_v50 = vld [vmem:[%s7184_s5 + $0x1d18] sm:$0xff] }
  0x24   : > { %424 = vmatprep.subr.bf16.mxu0 %v3901_v17  ;;  %v1104_v17 = vld [vmem:[%s7184_s5 + $0x1110] sm:$0xff] }
  0x25   : > { %v1488_v53 = vld [vmem:[%s7184_s5 + $0x1d10] sm:$0xff] }
  0x27   : > { %425 = vmatpush1.bf16.msra.mxu0 %v3903_v18  ;;  %v2947_v18 = vpack.c.bf16 %v1104_v17, %v1072_v16 }
  0x28   : > { %426 = vmatprep.subr.bf16.mxu0 %v3904_v19  ;;  %v1137_v19 = vld [vmem:[%s7184_s5 + $0x1218] sm:$0xff] }
  0x2b   : > { %427 = vmatpush1.bf16.msra.mxu0 %v3906_v20  ;;  %v1169_v20 = vld [vmem:[%s7184_s5 + $0x1318] sm:$0xff] }
  0x2c   : > { %428 = vmatprep.subr.bf16.mxu0 %v3907_v21  ;;  %v2949_v21 = vpack.c.bf16 %v1169_v20, %v1137_v19  ;;  %v559_v19 = vld [vmem:[%s7184_s5 + $0x8] sm:$0xff] }
  0x2d   : > { %v591_v20 = vld [vmem:[%s7184_s5 + $0x108] sm:$0xff] }
  0x2f   : > { %429 = vmatpush1.bf16.msra.mxu0 %v3909_v22  ;;  %v1136_v22 = vld [vmem:[%s7184_s5 + $0x1210] sm:$0xff] }
  0x30   : > { %430 = vmatprep.subr.bf16.mxu0 %v3910_v23  ;;  %v1168_v23 = vld [vmem:[%s7184_s5 + $0x1310] sm:$0xff] }
  0x33   : > { %431 = vmatpush1.bf16.msra.mxu0 %v3912_v24  ;;  %v2951_v24 = vpack.c.bf16 %v1168_v23, %v1136_v22 }
  0x34   : > { %2914 = vmatprep.subr.bf16.mxu0 %v2913_v31  ;;  %v1265_v31 = vld [vmem:[%s7184_s5 + $0x1618] sm:$0xff] }
  0x35   : > { %v2957_v33 = vpack.c.bf16 %v1297_v32, %v1265_v31 }
  0x36   : > { %447 = vmatmul.mubr.bf16.vlgmr.msra.gmra.mrb[0].mxu0 %v3913_v25  ;;  %v1201_v25 = vld [vmem:[%s7184_s5 + $0x1418] sm:$0xff] }
  0x37   : > { %2836 = vmatprep.mubr.msk.bf16.mxu0 %vm407_vm0, %v3916_v26  ;;  %2916 = vmatpush1.bf16.msra.mxu0 %v2915_v34  ;;  %v1233_v26 = vld [vmem:[%s7184_s5 + $0x1518] sm:$0xff]  ;;  %v1264_v34 = vld [vmem:[%s7184_s5 + $0x1610] sm:$0xff] }
  0x38   : > { %2918 = vmatprep.subr.bf16.mxu0 %v2917_v37  ;;  %v2959_v36 = vpack.c.bf16 %v1296_v35, %v1264_v34  ;;  %v1329_v37 = vld [vmem:[%s7184_s5 + $0x1818] sm:$0xff]  ;;  %v622_v34 = vld [vmem:[%s7184_s5 + $0x200] sm:$0xff] }
  0x39   : > { %v2961_v39 = vpack.c.bf16 %v1361_v38, %v1329_v37  ;;  %v654_v35 = vld [vmem:[%s7184_s5 + $0x300] sm:$0xff]  ;;  %v719_v37 = vld [vmem:[%s7184_s5 + $0x508] sm:$0xff] }
  0x3a   : > { %v2855_v38 = vpack.c.bf16 %v654_v35, %v622_v34 }
  0x3b   : > { %2920 = vmatpush1.bf16.msra.mxu0 %v2919_v40  ;;  %v1328_v40 = vld [vmem:[%s7184_s5 + $0x1810] sm:$0xff] }
  0x3c   : > { %2922 = vmatprep.subr.bf16.mxu0 %v2921_v43  ;;  %v2963_v42 = vpack.c.bf16 %v1360_v41, %v1328_v40  ;;  %v1393_v43 = vld [vmem:[%s7184_s5 + $0x1a18] sm:$0xff]  ;;  %v686_v40 = vld [vmem:[%s7184_s5 + $0x400] sm:$0xff] }
  0x3d   : > { %v2965_v45 = vpack.c.bf16 %v1425_v44, %v1393_v43  ;;  %v718_v41 = vld [vmem:[%s7184_s5 + $0x500] sm:$0xff]  ;;  %v783_v43 = vld [vmem:[%s7184_s5 + $0x708] sm:$0xff] }
  0x3e   : > { %457 = vmatmul.mubr.bf16.gmra.mrb[4].mxu0 %v3918_v27  ;;  %v2953_v27 = vpack.c.bf16 %v1233_v26, %v1201_v25  ;;  %v2849_v26 = vpack.c.bf16 %v591_v20, %v559_v19  ;;  %v2859_v44 = vpack.c.bf16 %v718_v41, %v686_v40  ;;  %v1166_v19 = vld [vmem:[%s7184_s5 + $0x1300] sm:$0xff]  ;;  %v1199_v20 = vld [vmem:[%s7184_s5 + $0x1408] sm:$0xff] }
  0x3f   : > { %2924 = vmatpush1.bf16.msra.mxu0 %v2923_v46  ;;  %v1392_v46 = vld [vmem:[%s7184_s5 + $0x1a10] sm:$0xff] }
  0x40   : > { %2926 = vmatprep.subr.bf16.mxu0 %v2925_v49  ;;  %v2967_v48 = vpack.c.bf16 %v1424_v47, %v1392_v46  ;;  %v1457_v49 = vld [vmem:[%s7184_s5 + $0x1c18] sm:$0xff]  ;;  %v750_v46 = vld [vmem:[%s7184_s5 + $0x600] sm:$0xff] }
  0x41   : > { %v2969_v51 = vpack.c.bf16 %v1489_v50, %v1457_v49  ;;  %v782_v47 = vld [vmem:[%s7184_s5 + $0x700] sm:$0xff]  ;;  %v847_v49 = vld [vmem:[%s7184_s5 + $0x908] sm:$0xff] }
  0x42   : > { %v2863_v50 = vpack.c.bf16 %v782_v47, %v750_v46 }
  0x43   : > { %2928 = vmatpush1.bf16.msra.mxu0 %v2927_v52  ;;  %v1456_v52 = vld [vmem:[%s7184_s5 + $0x1c10] sm:$0xff] }
  0x44   : > { %2930 = vmatprep.subr.bf16.mxu0 %v2929_v55  ;;  %v2971_v54 = vpack.c.bf16 %v1488_v53, %v1456_v52  ;;  %v814_v52 = vld [vmem:[%s7184_s5 + $0x800] sm:$0xff] }
  0x45   : > { %v846_v53 = vld [vmem:[%s7184_s5 + $0x900] sm:$0xff] }
  0x47   : > { %2932 = vmatpush1.bf16.msra.mxu0 %v2931_v58 }
  0x48   : > { %2934 = vmatprep.subr.bf16.mxu0 %v2933_v61 }
  0x4b   : > { %2936 = vmatpush1.bf16.msra.mxu0 %v2935_v0 }
  0x4c   : > { %2938 = vmatprep.subr.bf16.mxu0 %v2937_v3 }
  0x4f   : > { %2940 = vmatpush1.bf16.msra.mxu0 %v2939_v6 }
  0x50   : > { %2942 = vmatprep.subr.bf16.mxu0 %v2941_v9 }
  0x53   : > { %2944 = vmatpush1.bf16.msra.mxu0 %v2943_v12 }
  0x54   : > { %2946 = vmatprep.subr.bf16.mxu0 %v2945_v15 }
  0x57   : > { %2948 = vmatpush1.bf16.msra.mxu0 %v2947_v18 }
  0x58   : > { %2950 = vmatprep.subr.bf16.mxu0 %v2949_v21 }
  0x5b   : > { %2952 = vmatpush1.bf16.msra.mxu0 %v2951_v24  ;;  %v475_v24 = vld [vmem:[%s7182_s3] sm:$0x7] }
  0x5c   : > { %2954 = vmatprep.subr.bf16.mxu0 %v2953_v27  ;;  %v558_v27 = vld [vmem:[%s7184_s5] sm:$0xff]  ;;  %v476_v31 = vunpack.c.l.bf16 %v475_v24 }
  0x5d   : > { %v2851_v32 = vpack.c.bf16 %v590_v28, %v558_v27  ;;  %v1198_v24 = vld [vmem:[%s7184_s5 + $0x1400] sm:$0xff]  ;;  %v1295_v27 = vld [vmem:[%s7184_s5 + $0x1708] sm:$0xff] }
  0x5f   : > { %2956 = vmatpush1.bf16.msra.mxu0 %v2955_v30  ;;  %v655_v30 = vld [vmem:[%s7184_s5 + $0x308] sm:$0xff] }
  0x60   : > { %2958 = vmatprep.subr.bf16.mxu0 %v2957_v33  ;;  %v2853_v33 = vpack.c.bf16 %v655_v30, %v623_v29  ;;  %v1262_v30 = vld [vmem:[%s7184_s5 + $0x1600] sm:$0xff] }
  0x63   : > { %2960 = vmatpush1.bf16.msra.mxu0 %v2959_v36  ;;  %v687_v36 = vld [vmem:[%s7184_s5 + $0x408] sm:$0xff] }
  0x64   : > { %2962 = vmatprep.subr.bf16.mxu0 %v2961_v39  ;;  %v2857_v39 = vpack.c.bf16 %v719_v37, %v687_v36  ;;  %v1326_v36 = vld [vmem:[%s7184_s5 + $0x1800] sm:$0xff] }
  0x65   : > { %v1358_v37 = vld [vmem:[%s7184_s5 + $0x1900] sm:$0xff] }
  0x66   : > { %v2899_v40 = vpack.c.bf16 %v1358_v37, %v1326_v36  ;;  %v692_v36 = vld [vmem:[%s7184_s5 + $0x430] sm:$0xff] }
  0x67   : > { %2964 = vmatpush1.bf16.msra.mxu0 %v2963_v42  ;;  %v751_v42 = vld [vmem:[%s7184_s5 + $0x608] sm:$0xff]  ;;  %v724_v37 = vld [vmem:[%s7184_s5 + $0x530] sm:$0xff] }
  0x68   : > { %2966 = vmatprep.subr.bf16.mxu0 %v2965_v45  ;;  %v2861_v45 = vpack.c.bf16 %v783_v43, %v751_v42  ;;  %v1390_v42 = vld [vmem:[%s7184_s5 + $0x1a00] sm:$0xff] }
  0x69   : > { %v1422_v43 = vld [vmem:[%s7184_s5 + $0x1b00] sm:$0xff] }
  0x6a   : > { %v2903_v46 = vpack.c.bf16 %v1422_v43, %v1390_v42  ;;  %v3051_v43 = vpack.c.bf16 %v724_v37, %v692_v36  ;;  %v1075_v36 = vld [vmem:[%s7184_s5 + $0x1028] sm:$0xff] }
  0x6b   : > { %2968 = vmatpush1.bf16.msra.mxu0 %v2967_v48  ;;  %v815_v48 = vld [vmem:[%s7184_s5 + $0x808] sm:$0xff] }
  0x6c   : > { %2970 = vmatprep.subr.bf16.mxu0 %v2969_v51  ;;  %v2865_v51 = vpack.c.bf16 %v847_v49, %v815_v48  ;;  %v1454_v48 = vld [vmem:[%s7184_s5 + $0x1c00] sm:$0xff]  ;;  %v1107_v37 = vld [vmem:[%s7184_s5 + $0x1128] sm:$0xff] }
  0x6d   : > { %v1486_v49 = vld [vmem:[%s7184_s5 + $0x1d00] sm:$0xff] }
  0x6f   : > { %2972 = vmatpush1.bf16.msra.mxu0 %v2971_v54  ;;  %v879_v54 = vld [vmem:[%s7184_s5 + $0xa08] sm:$0xff] }
  0x86   : > { %v282_v55 = vpop.permute.xlu0 %281 }
  0x87   : > { %v292_v0 = vpop.permute.xlu1 %291 }
  0x8a   : > { %v287_v59 = vpop.permute.xlu0 %286 }
  0x8b   : > { %v297_v11 = vpop.permute.xlu1 %296 }
 0x109   : > { %v448_v56 = vpop.f32.mrb[0].mxu0 }
 0x10a   : > { %v449_v57 = vadd.f32 %v448_v56, %v282_v55  ;;  %v450_v58 = vpop.f32.mrb[1].mxu0  ;;  %v2867_v56 = vpack.c.bf16 %v846_v53, %v814_v52  ;;  %v1551_v52 = vld [vmem:[%s7184_s5 + $0x1f08] sm:$0xff]  ;;  %v1521_v53 = vld [vmem:[%s7184_s5 + $0x1e18] sm:$0xff] }
 0x10b   : > { %v451_v60 = vadd.f32 %v450_v58, %v282_v55  ;;  %v452_v61 = vpop.f32.mrb[2].mxu0  ;;  %v911_v55 = vld [vmem:[%s7184_s5 + $0xb08] sm:$0xff]  ;;  %v878_v58 = vld [vmem:[%s7184_s5 + $0xa00] sm:$0xff] }
 0x10c   : > { %v453_v62 = vadd.f32 %v452_v61, %v287_v59  ;;  %v454_v63 = vpop.f32.mrb[3].mxu0  ;;  %v467_v2 = vmax.f32 %v449_v57, 0.0  ;;  %v2869_v57 = vpack.c.bf16 %v911_v55, %v879_v54  ;;  %v975_v61 = vld [vmem:[%s7184_s5 + $0xd08] sm:$0xff]  ;;  %v1553_v55 = vld [vmem:[%s7184_s5 + $0x1f18] sm:$0xff] }
 0x10d   : > { %v455_v1 = vadd.f32 %v454_v63, %v287_v59  ;;  %v468_v4 = vmax.f32 %v451_v60, 0.0  ;;  %v910_v59 = vld [vmem:[%s7184_s5 + $0xb00] sm:$0xff]  ;;  %v943_v60 = vld [vmem:[%s7184_s5 + $0xc08] sm:$0xff] }
 0x10e   : > { %v469_v3 = vmax.f32 %v453_v62, 0.0  ;;  %v2871_v62 = vpack.c.bf16 %v910_v59, %v878_v58  ;;  %v2873_v63 = vpack.c.bf16 %v975_v61, %v943_v60  ;;  %v2973_v58 = vpack.c.bf16 %v1553_v55, %v1521_v53  ;;  %v1520_v60 = vld [vmem:[%s7184_s5 + $0x1e10] sm:$0xff]  ;;  %v853_v53 = vld [vmem:[%s7184_s5 + $0x938] sm:$0xff] }
 0x10f   : > { %v470_v5 = vmax.f32 %v455_v1, 0.0  ;;  %v974_v1 = vld [vmem:[%s7184_s5 + $0xd00] sm:$0xff]  ;;  %v1552_v61 = vld [vmem:[%s7184_s5 + $0x1f10] sm:$0xff] }
 0x110   : > { %v2843_v6 = vpack.c.bf16 %v469_v3, %v467_v2  ;;  %v1007_v2 = vld [vmem:[%s7184_s5 + $0xe08] sm:$0xff]  ;;  %2974 = vmatprep.subr.bf16.mxu0 %v2973_v58 }
 0x111   : > { %v458_v7 = vpop.f32.mrb[4].mxu0  ;;  %v2841_v8 = vpack.c.bf16 %v470_v5, %v468_v4  ;;  %v1039_v3 = vld [vmem:[%s7184_s5 + $0xf08] sm:$0xff] }
 0x112   : > { %v459_v9 = vadd.f32 %v458_v7, %v292_v0  ;;  %v460_v10 = vpop.f32.mrb[5].mxu0  ;;  %v2877_v5 = vpack.c.bf16 %v1039_v3, %v1007_v2  ;;  %v1038_v7 = vld [vmem:[%s7184_s5 + $0xf00] sm:$0xff]  ;;  %v597_v3 = vld [vmem:[%s7184_s5 + $0x138] sm:$0xff] }
 0x113   : > { %v461_v12 = vadd.f32 %v460_v10, %v292_v0  ;;  %v462_v13 = vpop.f32.mrb[6].mxu0  ;;  %2842 = vmatprep.subr.bf16.mxu1 %v2841_v8  ;;  %v942_v0 = vld [vmem:[%s7184_s5 + $0xc00] sm:$0xff]  ;;  %v1071_v8 = vld [vmem:[%s7184_s5 + $0x1008] sm:$0xff] }
 0x114   : > { %v463_v14 = vadd.f32 %v462_v13, %v297_v11  ;;  %v464_v15 = vpop.f32.mrb[7].mxu0  ;;  %2844 = vmatpush1.bf16.msra.mxu1 %v2843_v6  ;;  %v471_v17 = vmax.f32 %v459_v9, 0.0  ;;  %v2875_v4 = vpack.c.bf16 %v974_v1, %v942_v0  ;;  %v1006_v6 = vld [vmem:[%s7184_s5 + $0xe00] sm:$0xff]  ;;  %v1103_v9 = vld [vmem:[%s7184_s5 + $0x1108] sm:$0xff]  ;;  %v565_v1 = vld [vmem:[%s7184_s5 + $0x38] sm:$0xff] }
 0x115   : > { %v465_v16 = vadd.f32 %v464_v15, %v297_v11  ;;  %v472_v21 = vmax.f32 %v461_v12, 0.0  ;;  %v2879_v10 = vpack.c.bf16 %v1038_v7, %v1006_v6  ;;  %v2881_v11 = vpack.c.bf16 %v1103_v9, %v1071_v8  ;;  %v1070_v12 = vld [vmem:[%s7184_s5 + $0x1000] sm:$0xff]  ;;  %v1167_v15 = vld [vmem:[%s7184_s5 + $0x1308] sm:$0xff]  ;;  %v564_v7 = vld [vmem:[%s7184_s5 + $0x30] sm:$0xff] }
 0x116   : > { %v473_v18 = vmax.f32 %v463_v14, 0.0  ;;  %v1102_v13 = vld [vmem:[%s7184_s5 + $0x1100] sm:$0xff]  ;;  %v1135_v14 = vld [vmem:[%s7184_s5 + $0x1208] sm:$0xff]  ;;  %v596_v8 = vld [vmem:[%s7184_s5 + $0x130] sm:$0xff] }
 0x117   : > { %v474_v22 = vmax.f32 %v465_v16, 0.0  ;;  %v2883_v16 = vpack.c.bf16 %v1102_v13, %v1070_v12  ;;  %v595_v0 = vld [vmem:[%s7184_s5 + $0x128] sm:$0xff]  ;;  %v594_v6 = vld [vmem:[%s7184_s5 + $0x120] sm:$0xff] }
 0x118   : > { %v2847_v23 = vpack.c.bf16 %v473_v18, %v471_v17  ;;  %v2885_v17 = vpack.c.bf16 %v1167_v15, %v1135_v14  ;;  %v1134_v18 = vld [vmem:[%s7184_s5 + $0x1200] sm:$0xff]  ;;  %v659_v13 = vld [vmem:[%s7184_s5 + $0x328] sm:$0xff]  ;;  %v629_v14 = vld [vmem:[%s7184_s5 + $0x238] sm:$0xff] }
 0x119   : > { %v2845_v25 = vpack.c.bf16 %v474_v22, %v472_v21  ;;  %v1231_v21 = vld [vmem:[%s7184_s5 + $0x1508] sm:$0xff]  ;;  %v2887_v22 = vpack.c.bf16 %v1166_v19, %v1134_v18  ;;  %v661_v15 = vld [vmem:[%s7184_s5 + $0x338] sm:$0xff]  ;;  %v3043_v18 = vpack.c.bf16 %v596_v8, %v564_v7  ;;  %v626_v19 = vld [vmem:[%s7184_s5 + $0x220] sm:$0xff] }
 0x11a   : > { %v884_v8 = vld [vmem:[%s7184_s5 + $0xa30] sm:$0xff] }
 0x11b   : > { %2846 = vmatprep.subr.bf16.mxu1 %v2845_v25  ;;  %v1230_v25 = vld [vmem:[%s7184_s5 + $0x1500] sm:$0xff] }
 0x11c   : > { %2848 = vmatpush1.bf16.msra.mxu1 %v2847_v23  ;;  %v2889_v23 = vpack.c.bf16 %v1231_v21, %v1199_v20  ;;  %v2891_v28 = vpack.c.bf16 %v1230_v25, %v1198_v24  ;;  %v658_v20 = vld [vmem:[%s7184_s5 + $0x320] sm:$0xff]  ;;  %v691_v24 = vld [vmem:[%s7184_s5 + $0x428] sm:$0xff] }
 0x11d   : > { %2850 = vmatprep.subr.bf16.mxu1 %v2849_v26  ;;  %v1263_v26 = vld [vmem:[%s7184_s5 + $0x1608] sm:$0xff] }
 0x11e   : > { %v2893_v29 = vpack.c.bf16 %v1295_v27, %v1263_v26  ;;  %v3045_v26 = vpack.c.bf16 %v661_v15, %v629_v14  ;;  %v723_v27 = vld [vmem:[%s7184_s5 + $0x528] sm:$0xff] }
 0x11f   : > { %2837 = vmatmul.mubr.msk.f32.vlgmr.msra.gmra.mrb[0].mxu1 %vm483_vm1, %v476_v31  ;;  %v1294_v31 = vld [vmem:[%s7184_s5 + $0x1700] sm:$0xff] }
 0x120   : > { %2852 = vmatpush1.bf16.msra.mxu1 %v2851_v32  ;;  %v1327_v32 = vld [vmem:[%s7184_s5 + $0x1808] sm:$0xff]  ;;  %v2895_v34 = vpack.c.bf16 %v1294_v31, %v1262_v30  ;;  %v2983_v30 = vpack.c.bf16 %v658_v20, %v626_v19 }
 0x121   : > { %2854 = vmatprep.subr.bf16.mxu1 %v2853_v33  ;;  %v1359_v33 = vld [vmem:[%s7184_s5 + $0x1908] sm:$0xff] }
 0x122   : > { %v2897_v35 = vpack.c.bf16 %v1359_v33, %v1327_v32  ;;  %v690_v32 = vld [vmem:[%s7184_s5 + $0x420] sm:$0xff] }
 0x123   : > { %v722_v33 = vld [vmem:[%s7184_s5 + $0x520] sm:$0xff] }
 0x124   : > { %2856 = vmatpush1.bf16.msra.mxu1 %v2855_v38  ;;  %v1391_v38 = vld [vmem:[%s7184_s5 + $0x1a08] sm:$0xff]  ;;  %v2987_v42 = vpack.c.bf16 %v722_v33, %v690_v32 }
 0x125   : > { %2858 = vmatprep.subr.bf16.mxu1 %v2857_v39  ;;  %v1423_v39 = vld [vmem:[%s7184_s5 + $0x1b08] sm:$0xff] }
 0x126   : > { %v2901_v41 = vpack.c.bf16 %v1423_v39, %v1391_v38  ;;  %v755_v38 = vld [vmem:[%s7184_s5 + $0x628] sm:$0xff] }
 0x127   : > { %v787_v39 = vld [vmem:[%s7184_s5 + $0x728] sm:$0xff] }
 0x128   : > { %2860 = vmatpush1.bf16.msra.mxu1 %v2859_v44  ;;  %v1455_v44 = vld [vmem:[%s7184_s5 + $0x1c08] sm:$0xff] }
 0x129   : > { %2862 = vmatprep.subr.bf16.mxu1 %v2861_v45  ;;  %v1487_v45 = vld [vmem:[%s7184_s5 + $0x1d08] sm:$0xff] }
 0x12a   : > { %v2905_v47 = vpack.c.bf16 %v1487_v45, %v1455_v44  ;;  %v754_v44 = vld [vmem:[%s7184_s5 + $0x620] sm:$0xff] }
 0x12b   : > { %v786_v45 = vld [vmem:[%s7184_s5 + $0x720] sm:$0xff] }
 0x12c   : > { %2864 = vmatpush1.bf16.msra.mxu1 %v2863_v50  ;;  %v2907_v50 = vpack.c.bf16 %v1486_v49, %v1454_v48  ;;  %v756_v48 = vld [vmem:[%s7184_s5 + $0x630] sm:$0xff] }
 0x12d   : > { %2866 = vmatprep.subr.bf16.mxu1 %v2865_v51  ;;  %v1519_v51 = vld [vmem:[%s7184_s5 + $0x1e08] sm:$0xff]  ;;  %v788_v49 = vld [vmem:[%s7184_s5 + $0x730] sm:$0xff] }
 0x12e   : > { %v2909_v54 = vpack.c.bf16 %v1551_v52, %v1519_v51  ;;  %v851_v51 = vld [vmem:[%s7184_s5 + $0x928] sm:$0xff]  ;;  %v821_v52 = vld [vmem:[%s7184_s5 + $0x838] sm:$0xff]  ;;  %v3055_v55 = vpack.c.bf16 %v788_v49, %v756_v48 }
 0x12f   : > { %v1139_v48 = vld [vmem:[%s7184_s5 + $0x1228] sm:$0xff] }
 0x130   : > { %2868 = vmatpush1.bf16.msra.mxu1 %v2867_v56  ;;  %v1518_v56 = vld [vmem:[%s7184_s5 + $0x1e00] sm:$0xff]  ;;  %v1171_v49 = vld [vmem:[%s7184_s5 + $0x1328] sm:$0xff] }
 0x131   : > { %2870 = vmatprep.subr.bf16.mxu1 %v2869_v57  ;;  %v1550_v57 = vld [vmem:[%s7184_s5 + $0x1f00] sm:$0xff] }
 0x132   : > { %v2911_v59 = vpack.c.bf16 %v1550_v57, %v1518_v56  ;;  %v818_v56 = vld [vmem:[%s7184_s5 + $0x820] sm:$0xff] }
 0x133   : > { %v850_v57 = vld [vmem:[%s7184_s5 + $0x920] sm:$0xff] }
 0x134   : > { %2872 = vmatpush1.bf16.msra.mxu1 %v2871_v62  ;;  %v2975_v62 = vpack.c.bf16 %v1552_v61, %v1520_v60  ;;  %v820_v60 = vld [vmem:[%s7184_s5 + $0x830] sm:$0xff] }
 0x135   : > { %2874 = vmatprep.subr.bf16.mxu1 %v2873_v63  ;;  %v563_v63 = vld [vmem:[%s7184_s5 + $0x28] sm:$0xff]  ;;  %v852_v61 = vld [vmem:[%s7184_s5 + $0x930] sm:$0xff] }
 0x136   : > { %2976 = vmatpush1.bf16.msra.mxu0 %v2975_v62  ;;  %v2977_v2 = vpack.c.bf16 %v595_v0, %v563_v63  ;;  %v883_v62 = vld [vmem:[%s7184_s5 + $0xa28] sm:$0xff]  ;;  %v885_v0 = vld [vmem:[%s7184_s5 + $0xa38] sm:$0xff] }
 0x137   : > { %v915_v63 = vld [vmem:[%s7184_s5 + $0xb28] sm:$0xff] }
 0x138   : > { %2876 = vmatpush1.bf16.msra.mxu1 %v2875_v4  ;;  %v3041_v4 = vpack.c.bf16 %v597_v3, %v565_v1  ;;  %v917_v1 = vld [vmem:[%s7184_s5 + $0xb38] sm:$0xff]  ;;  %v3059_v3 = vpack.c.bf16 %v852_v61, %v820_v60  ;;  %v1203_v60 = vld [vmem:[%s7184_s5 + $0x1428] sm:$0xff] }
 0x139   : > { %2878 = vmatprep.subr.bf16.mxu1 %v2877_v5  ;;  %v562_v5 = vld [vmem:[%s7184_s5 + $0x20] sm:$0xff]  ;;  %v3061_v7 = vpack.c.bf16 %v917_v1, %v885_v0  ;;  %v1235_v61 = vld [vmem:[%s7184_s5 + $0x1528] sm:$0xff] }
 0x13a   : > { %3042 = vmatprep.subr.bf16.mxu0 %v3041_v4  ;;  %v882_v4 = vld [vmem:[%s7184_s5 + $0xa20] sm:$0xff] }
 0x13c   : > { %2880 = vmatpush1.bf16.msra.mxu1 %v2879_v10  ;;  %v627_v10 = vld [vmem:[%s7184_s5 + $0x228] sm:$0xff] }
 0x13d   : > { %2882 = vmatprep.subr.bf16.mxu1 %v2881_v11  ;;  %v481_v11 = vpop.permute.xlu0 %480  ;;  %v2981_v25 = vpack.c.bf16 %v659_v13, %v627_v10  ;;  %v947_v10 = vld [vmem:[%s7184_s5 + $0xc28] sm:$0xff]  ;;  %v981_v13 = vld [vmem:[%s7184_s5 + $0xd38] sm:$0xff] }
 0x140   : > { %2884 = vmatpush1.bf16.msra.mxu1 %v2883_v16 }
 0x141   : > { %2886 = vmatprep.subr.bf16.mxu1 %v2885_v17  ;;  %v2979_v17 = vpack.c.bf16 %v594_v6, %v562_v5  ;;  %v914_v5 = vld [vmem:[%s7184_s5 + $0xb20] sm:$0xff]  ;;  %v2997_v6 = vpack.c.bf16 %v915_v63, %v883_v62  ;;  %v1205_v62 = vld [vmem:[%s7184_s5 + $0x1438] sm:$0xff] }
 0x142   : > { %v2999_v14 = vpack.c.bf16 %v914_v5, %v882_v4  ;;  %v1237_v63 = vld [vmem:[%s7184_s5 + $0x1538] sm:$0xff]  ;;  %v3017_v4 = vpack.c.bf16 %v1235_v61, %v1203_v60 }
 0x143   : > { %v3081_v5 = vpack.c.bf16 %v1237_v63, %v1205_v62  ;;  %v1525_v60 = vld [vmem:[%s7184_s5 + $0x1e38] sm:$0xff] }
 0x144   : > { %2888 = vmatpush1.bf16.msra.mxu1 %v2887_v22  ;;  %v628_v22 = vld [vmem:[%s7184_s5 + $0x230] sm:$0xff]  ;;  %v1557_v61 = vld [vmem:[%s7184_s5 + $0x1f38] sm:$0xff] }
 0x145   : > { %2890 = vmatprep.subr.bf16.mxu1 %v2889_v23  ;;  %v660_v23 = vld [vmem:[%s7184_s5 + $0x330] sm:$0xff] }
 0x146   : > { %v3047_v31 = vpack.c.bf16 %v660_v23, %v628_v22  ;;  %v948_v22 = vld [vmem:[%s7184_s5 + $0xc30] sm:$0xff] }
 0x147   : > { %v980_v23 = vld [vmem:[%s7184_s5 + $0xd30] sm:$0xff] }
 0x148   : > { %2892 = vmatpush1.bf16.msra.mxu1 %v2891_v28  ;;  %v693_v28 = vld [vmem:[%s7184_s5 + $0x438] sm:$0xff] }
 0x149   : > { %2894 = vmatprep.subr.bf16.mxu1 %v2893_v29  ;;  %v725_v29 = vld [vmem:[%s7184_s5 + $0x538] sm:$0xff] }
 0x14c   : > { %2896 = vmatpush1.bf16.msra.mxu1 %v2895_v34  ;;  %v2985_v34 = vpack.c.bf16 %v723_v27, %v691_v24  ;;  %v1011_v24 = vld [vmem:[%s7184_s5 + $0xe28] sm:$0xff]  ;;  %v1045_v27 = vld [vmem:[%s7184_s5 + $0xf38] sm:$0xff] }
 0x14d   : > { %2898 = vmatprep.subr.bf16.mxu1 %v2897_v35  ;;  %v3049_v35 = vpack.c.bf16 %v725_v29, %v693_v28  ;;  %v3067_v29 = vpack.c.bf16 %v980_v23, %v948_v22  ;;  %v1331_v22 = vld [vmem:[%s7184_s5 + $0x1828] sm:$0xff] }
 0x14e   : > { %v1363_v23 = vld [vmem:[%s7184_s5 + $0x1928] sm:$0xff] }
 0x150   : > { %2900 = vmatpush1.bf16.msra.mxu1 %v2899_v40  ;;  %v757_v40 = vld [vmem:[%s7184_s5 + $0x638] sm:$0xff] }
 0x151   : > { %2902 = vmatprep.subr.bf16.mxu1 %v2901_v41  ;;  %v789_v41 = vld [vmem:[%s7184_s5 + $0x738] sm:$0xff] }
 0x154   : > { %2904 = vmatpush1.bf16.msra.mxu1 %v2903_v46  ;;  %v2989_v46 = vpack.c.bf16 %v787_v39, %v755_v38  ;;  %v1077_v38 = vld [vmem:[%s7184_s5 + $0x1038] sm:$0xff] }
 0x155   : > { %2906 = vmatprep.subr.bf16.mxu1 %v2905_v47  ;;  %v3053_v47 = vpack.c.bf16 %v789_v41, %v757_v40  ;;  %v1109_v39 = vld [vmem:[%s7184_s5 + $0x1138] sm:$0xff] }
 0x158   : > { %2908 = vmatpush1.bf16.msra.mxu1 %v2907_v50  ;;  %v819_v50 = vld [vmem:[%s7184_s5 + $0x828] sm:$0xff] }
 0x159   : > { %2910 = vmatprep.subr.bf16.mxu1 %v2909_v54  ;;  %v2991_v54 = vpack.c.bf16 %v786_v45, %v754_v44  ;;  %v2993_v58 = vpack.c.bf16 %v851_v51, %v819_v50  ;;  %v3009_v44 = vpack.c.bf16 %v1107_v37, %v1075_v36  ;;  %v3073_v45 = vpack.c.bf16 %v1109_v39, %v1077_v38  ;;  %v1141_v50 = vld [vmem:[%s7184_s5 + $0x1238] sm:$0xff] }
 0x15a   : > { %v1173_v51 = vld [vmem:[%s7184_s5 + $0x1338] sm:$0xff] }
 0x15b   : > { %v1397_v36 = vld [vmem:[%s7184_s5 + $0x1a38] sm:$0xff] }
 0x15c   : > { %2912 = vmatpush1.bf16.msra.mxu1 %v2911_v59  ;;  %v3057_v59 = vpack.c.bf16 %v853_v53, %v821_v52  ;;  %v1429_v37 = vld [vmem:[%s7184_s5 + $0x1b38] sm:$0xff] }
 0x15d   : > { %2978 = vmatprep.subr.bf16.mxu1 %v2977_v2  ;;  %v2995_v2 = vpack.c.bf16 %v850_v57, %v818_v56  ;;  %v3013_v56 = vpack.c.bf16 %v1171_v49, %v1139_v48  ;;  %v3077_v57 = vpack.c.bf16 %v1173_v51, %v1141_v50  ;;  %v1461_v48 = vld [vmem:[%s7184_s5 + $0x1c38] sm:$0xff] }
 0x15e   : > { %v1493_v49 = vld [vmem:[%s7184_s5 + $0x1d38] sm:$0xff] }
 0x1f2   : > { %v553_v9 = vpop.f32.mrb[0].mxu1 }
 0x1f3   : > { %v555_v12 = vpop.f32.mrb[1].mxu1  ;;  %v4458_v21 = vadd.f32 %v553_v9, %v481_v11  ;;  %v916_v9 = vld [vmem:[%s7184_s5 + $0xb30] sm:$0xff] }
 0x1f4   : > { %v4450_v16 = vadd.f32 %v555_v12, %v481_v11  ;;  %v979_v11 = vld [vmem:[%s7184_s5 + $0xd28] sm:$0xff]  ;;  %v949_v12 = vld [vmem:[%s7184_s5 + $0xc38] sm:$0xff]  ;;  %v3063_v15 = vpack.c.bf16 %v916_v9, %v884_v8 }
 0x1f5   : > { %v3001_v19 = vpack.c.bf16 %v979_v11, %v947_v10  ;;  %v3065_v20 = vpack.c.bf16 %v981_v13, %v949_v12  ;;  %v1267_v8 = vld [vmem:[%s7184_s5 + $0x1628] sm:$0xff]  ;;  %v1269_v10 = vld [vmem:[%s7184_s5 + $0x1638] sm:$0xff] }
 0x1f6   : > { %1646 = vmatprep.mubr.f32.mxu1 %v4450_v16  ;;  %1717 = vmatprep.mubr.f32.mxu0 %v4450_v16  ;;  %v1299_v9 = vld [vmem:[%s7184_s5 + $0x1728] sm:$0xff]  ;;  %v1301_v11 = vld [vmem:[%s7184_s5 + $0x1738] sm:$0xff] }
 0x1f7   : > { %1647 = vmatmul.mubr.f32.vlgmr.msra.gmra.mrb[2].mxu1 %v4458_v21  ;;  %1718 = vmatmul.mubr.f32.vlgmr.msra.gmra.mrb[8].mxu0 %v4458_v21 }
 0x1f8   : > { %2980 = vmatpush1.bf16.msra.mxu1 %v2979_v17  ;;  %3044 = vmatpush1.bf16.msra.mxu0 %v3043_v18  ;;  %v946_v17 = vld [vmem:[%s7184_s5 + $0xc20] sm:$0xff] }
 0x1f9   : > { %1788 = vmatprep.mubr.f32.mxu1 %v4450_v16  ;;  %1859 = vmatprep.mubr.f32.mxu0 %v4450_v16  ;;  %v978_v18 = vld [vmem:[%s7184_s5 + $0xd20] sm:$0xff] }
 0x1fa   : > { %2982 = vmatprep.subr.bf16.mxu1 %v2981_v25  ;;  %3046 = vmatprep.subr.bf16.mxu0 %v3045_v26  ;;  %v1043_v25 = vld [vmem:[%s7184_s5 + $0xf28] sm:$0xff]  ;;  %v1013_v26 = vld [vmem:[%s7184_s5 + $0xe38] sm:$0xff]  ;;  %v3003_v28 = vpack.c.bf16 %v978_v18, %v946_v17  ;;  %v3021_v17 = vpack.c.bf16 %v1299_v9, %v1267_v8  ;;  %v3085_v18 = vpack.c.bf16 %v1301_v11, %v1269_v10 }
 0x1fb   : > { %v3005_v32 = vpack.c.bf16 %v1043_v25, %v1011_v24  ;;  %v3069_v33 = vpack.c.bf16 %v1045_v27, %v1013_v26  ;;  %v1333_v24 = vld [vmem:[%s7184_s5 + $0x1838] sm:$0xff] }
 0x1fc   : > { %2984 = vmatpush1.bf16.msra.mxu1 %v2983_v30  ;;  %3048 = vmatpush1.bf16.msra.mxu0 %v3047_v31  ;;  %v1010_v30 = vld [vmem:[%s7184_s5 + $0xe20] sm:$0xff]  ;;  %v1365_v25 = vld [vmem:[%s7184_s5 + $0x1938] sm:$0xff] }
 0x1fd   : > { %2986 = vmatprep.subr.bf16.mxu1 %v2985_v34  ;;  %3050 = vmatprep.subr.bf16.mxu0 %v3049_v35  ;;  %v1042_v31 = vld [vmem:[%s7184_s5 + $0xf20] sm:$0xff]  ;;  %v1012_v34 = vld [vmem:[%s7184_s5 + $0xe30] sm:$0xff]  ;;  %v569_v8 = vld [vmem:[%s7184_s5 + $0x58] sm:$0xff] }
 0x1fe   : > { %v1044_v35 = vld [vmem:[%s7184_s5 + $0xf30] sm:$0xff]  ;;  %v3007_v40 = vpack.c.bf16 %v1042_v31, %v1010_v30  ;;  %v3025_v30 = vpack.c.bf16 %v1363_v23, %v1331_v22  ;;  %v3089_v31 = vpack.c.bf16 %v1365_v25, %v1333_v24  ;;  %v601_v9 = vld [vmem:[%s7184_s5 + $0x158] sm:$0xff] }
 0x1ff   : > { %v3071_v41 = vpack.c.bf16 %v1044_v35, %v1012_v34  ;;  %v1395_v34 = vld [vmem:[%s7184_s5 + $0x1a28] sm:$0xff]  ;;  %v633_v22 = vld [vmem:[%s7184_s5 + $0x258] sm:$0xff] }
 0x200   : > { %2988 = vmatpush1.bf16.msra.mxu1 %v2987_v42  ;;  %3052 = vmatpush1.bf16.msra.mxu0 %v3051_v43  ;;  %v1074_v42 = vld [vmem:[%s7184_s5 + $0x1020] sm:$0xff]  ;;  %v1427_v35 = vld [vmem:[%s7184_s5 + $0x1b28] sm:$0xff]  ;;  %v665_v23 = vld [vmem:[%s7184_s5 + $0x358] sm:$0xff] }
 0x201   : > { %2990 = vmatprep.subr.bf16.mxu1 %v2989_v46  ;;  %3054 = vmatprep.subr.bf16.mxu0 %v3053_v47  ;;  %v1106_v43 = vld [vmem:[%s7184_s5 + $0x1120] sm:$0xff]  ;;  %v1076_v46 = vld [vmem:[%s7184_s5 + $0x1030] sm:$0xff] }
 0x202   : > { %v1108_v47 = vld [vmem:[%s7184_s5 + $0x1130] sm:$0xff]  ;;  %v3011_v52 = vpack.c.bf16 %v1106_v43, %v1074_v42  ;;  %v3029_v42 = vpack.c.bf16 %v1427_v35, %v1395_v34  ;;  %v3093_v43 = vpack.c.bf16 %v1429_v37, %v1397_v36  ;;  %v697_v34 = vld [vmem:[%s7184_s5 + $0x458] sm:$0xff] }
 0x203   : > { %v3075_v53 = vpack.c.bf16 %v1108_v47, %v1076_v46  ;;  %v1459_v46 = vld [vmem:[%s7184_s5 + $0x1c28] sm:$0xff]  ;;  %v729_v35 = vld [vmem:[%s7184_s5 + $0x558] sm:$0xff] }
 0x204   : > { %2992 = vmatpush1.bf16.msra.mxu1 %v2991_v54  ;;  %3056 = vmatpush1.bf16.msra.mxu0 %v3055_v55  ;;  %v1138_v54 = vld [vmem:[%s7184_s5 + $0x1220] sm:$0xff]  ;;  %v1491_v47 = vld [vmem:[%s7184_s5 + $0x1d28] sm:$0xff] }
 0x205   : > { %2994 = vmatprep.subr.bf16.mxu1 %v2993_v58  ;;  %3058 = vmatprep.subr.bf16.mxu0 %v3057_v59  ;;  %v1170_v55 = vld [vmem:[%s7184_s5 + $0x1320] sm:$0xff]  ;;  %v1140_v58 = vld [vmem:[%s7184_s5 + $0x1230] sm:$0xff] }
 0x206   : > { %v1172_v59 = vld [vmem:[%s7184_s5 + $0x1330] sm:$0xff]  ;;  %v3015_v0 = vpack.c.bf16 %v1170_v55, %v1138_v54  ;;  %v3033_v54 = vpack.c.bf16 %v1491_v47, %v1459_v46  ;;  %v3097_v55 = vpack.c.bf16 %v1493_v49, %v1461_v48  ;;  %v761_v46 = vld [vmem:[%s7184_s5 + $0x658] sm:$0xff] }
 0x207   : > { %v3079_v1 = vpack.c.bf16 %v1172_v59, %v1140_v58  ;;  %v1523_v58 = vld [vmem:[%s7184_s5 + $0x1e28] sm:$0xff]  ;;  %v793_v47 = vld [vmem:[%s7184_s5 + $0x758] sm:$0xff] }
 0x208   : > { %2996 = vmatpush1.bf16.msra.mxu1 %v2995_v2  ;;  %3060 = vmatpush1.bf16.msra.mxu0 %v3059_v3  ;;  %v1202_v2 = vld [vmem:[%s7184_s5 + $0x1420] sm:$0xff]  ;;  %v1555_v59 = vld [vmem:[%s7184_s5 + $0x1f28] sm:$0xff] }
 0x209   : > { %2998 = vmatprep.subr.bf16.mxu1 %v2997_v6  ;;  %3062 = vmatprep.subr.bf16.mxu0 %v3061_v7  ;;  %v1234_v3 = vld [vmem:[%s7184_s5 + $0x1520] sm:$0xff]  ;;  %v1204_v6 = vld [vmem:[%s7184_s5 + $0x1430] sm:$0xff] }
 0x20a   : > { %v1236_v7 = vld [vmem:[%s7184_s5 + $0x1530] sm:$0xff]  ;;  %v3019_v12 = vpack.c.bf16 %v1234_v3, %v1202_v2  ;;  %v3037_v2 = vpack.c.bf16 %v1555_v59, %v1523_v58  ;;  %v3101_v3 = vpack.c.bf16 %v1557_v61, %v1525_v60  ;;  %v825_v58 = vld [vmem:[%s7184_s5 + $0x858] sm:$0xff] }
 0x20b   : > { %v3083_v13 = vpack.c.bf16 %v1236_v7, %v1204_v6  ;;  %v567_v6 = vld [vmem:[%s7184_s5 + $0x48] sm:$0xff]  ;;  %v857_v59 = vld [vmem:[%s7184_s5 + $0x958] sm:$0xff] }
 0x20c   : > { %3000 = vmatpush1.bf16.msra.mxu1 %v2999_v14  ;;  %3064 = vmatpush1.bf16.msra.mxu0 %v3063_v15  ;;  %v1266_v14 = vld [vmem:[%s7184_s5 + $0x1620] sm:$0xff]  ;;  %v599_v7 = vld [vmem:[%s7184_s5 + $0x148] sm:$0xff] }
 0x20d   : > { %3002 = vmatprep.subr.bf16.mxu1 %v3001_v19  ;;  %3066 = vmatprep.subr.bf16.mxu0 %v3065_v20  ;;  %v1298_v15 = vld [vmem:[%s7184_s5 + $0x1720] sm:$0xff]  ;;  %v1268_v19 = vld [vmem:[%s7184_s5 + $0x1630] sm:$0xff] }
 0x20e   : > { %v1300_v20 = vld [vmem:[%s7184_s5 + $0x1730] sm:$0xff]  ;;  %v3023_v26 = vpack.c.bf16 %v1298_v15, %v1266_v14  ;;  %v566_v14 = vld [vmem:[%s7184_s5 + $0x40] sm:$0xff] }
 0x20f   : > { %v3087_v27 = vpack.c.bf16 %v1300_v20, %v1268_v19  ;;  %v598_v15 = vld [vmem:[%s7184_s5 + $0x140] sm:$0xff]  ;;  %v631_v19 = vld [vmem:[%s7184_s5 + $0x248] sm:$0xff] }
 0x210   : > { %3004 = vmatpush1.bf16.msra.mxu1 %v3003_v28  ;;  %3068 = vmatpush1.bf16.msra.mxu0 %v3067_v29  ;;  %v1330_v28 = vld [vmem:[%s7184_s5 + $0x1820] sm:$0xff]  ;;  %v663_v20 = vld [vmem:[%s7184_s5 + $0x348] sm:$0xff]  ;;  %v3107_v24 = vpack.c.bf16 %v598_v15, %v566_v14  ;;  %v920_v15 = vld [vmem:[%s7184_s5 + $0xb50] sm:$0xff] }
 0x211   : > { %3006 = vmatprep.subr.bf16.mxu1 %v3005_v32  ;;  %3070 = vmatprep.subr.bf16.mxu0 %v3069_v33  ;;  %v1362_v29 = vld [vmem:[%s7184_s5 + $0x1920] sm:$0xff]  ;;  %v1332_v32 = vld [vmem:[%s7184_s5 + $0x1830] sm:$0xff] }
 0x212   : > { %v1364_v33 = vld [vmem:[%s7184_s5 + $0x1930] sm:$0xff]  ;;  %v3027_v38 = vpack.c.bf16 %v1362_v29, %v1330_v28  ;;  %v3109_v29 = vpack.c.bf16 %v663_v20, %v631_v19  ;;  %v953_v19 = vld [vmem:[%s7184_s5 + $0xc58] sm:$0xff] }
 0x213   : > { %v3091_v39 = vpack.c.bf16 %v1364_v33, %v1332_v32  ;;  %v632_v28 = vld [vmem:[%s7184_s5 + $0x250] sm:$0xff]  ;;  %v695_v32 = vld [vmem:[%s7184_s5 + $0x448] sm:$0xff]  ;;  %v985_v20 = vld [vmem:[%s7184_s5 + $0xd58] sm:$0xff] }
 0x214   : > { %3008 = vmatpush1.bf16.msra.mxu1 %v3007_v40  ;;  %3072 = vmatpush1.bf16.msra.mxu0 %v3071_v41  ;;  %v1394_v40 = vld [vmem:[%s7184_s5 + $0x1a20] sm:$0xff]  ;;  %v727_v33 = vld [vmem:[%s7184_s5 + $0x548] sm:$0xff] }
 0x215   : > { %3010 = vmatprep.subr.bf16.mxu1 %v3009_v44  ;;  %3074 = vmatprep.subr.bf16.mxu0 %v3073_v45  ;;  %v1426_v41 = vld [vmem:[%s7184_s5 + $0x1b20] sm:$0xff]  ;;  %v1396_v44 = vld [vmem:[%s7184_s5 + $0x1a30] sm:$0xff] }
 0x216   : > { %v1428_v45 = vld [vmem:[%s7184_s5 + $0x1b30] sm:$0xff]  ;;  %v3031_v50 = vpack.c.bf16 %v1426_v41, %v1394_v40  ;;  %v726_v40 = vld [vmem:[%s7184_s5 + $0x540] sm:$0xff] }
 0x217   : > { %v3095_v51 = vpack.c.bf16 %v1428_v45, %v1396_v44  ;;  %v696_v41 = vld [vmem:[%s7184_s5 + $0x450] sm:$0xff]  ;;  %v759_v44 = vld [vmem:[%s7184_s5 + $0x648] sm:$0xff] }
 0x218   : > { %3012 = vmatpush1.bf16.msra.mxu1 %v3011_v52  ;;  %3076 = vmatpush1.bf16.msra.mxu0 %v3075_v53  ;;  %v1458_v52 = vld [vmem:[%s7184_s5 + $0x1c20] sm:$0xff]  ;;  %v791_v45 = vld [vmem:[%s7184_s5 + $0x748] sm:$0xff] }
 0x219   : > { %3014 = vmatprep.subr.bf16.mxu1 %v3013_v56  ;;  %3078 = vmatprep.subr.bf16.mxu0 %v3077_v57  ;;  %v1490_v53 = vld [vmem:[%s7184_s5 + $0x1d20] sm:$0xff]  ;;  %v1460_v56 = vld [vmem:[%s7184_s5 + $0x1c30] sm:$0xff] }
 0x21a   : > { %v1492_v57 = vld [vmem:[%s7184_s5 + $0x1d30] sm:$0xff]  ;;  %v3035_v62 = vpack.c.bf16 %v1490_v53, %v1458_v52  ;;  %v790_v52 = vld [vmem:[%s7184_s5 + $0x740] sm:$0xff] }
 0x21b   : > { %v3099_v63 = vpack.c.bf16 %v1492_v57, %v1460_v56  ;;  %v760_v53 = vld [vmem:[%s7184_s5 + $0x650] sm:$0xff]  ;;  %v823_v56 = vld [vmem:[%s7184_s5 + $0x848] sm:$0xff] }
 0x21c   : > { %3016 = vmatpush1.bf16.msra.mxu1 %v3015_v0  ;;  %3080 = vmatpush1.bf16.msra.mxu0 %v3079_v1  ;;  %v1522_v0 = vld [vmem:[%s7184_s5 + $0x1e20] sm:$0xff]  ;;  %v855_v57 = vld [vmem:[%s7184_s5 + $0x948] sm:$0xff] }
 0x21d   : > { %3018 = vmatprep.subr.bf16.mxu1 %v3017_v4  ;;  %3082 = vmatprep.subr.bf16.mxu0 %v3081_v5  ;;  %v1554_v1 = vld [vmem:[%s7184_s5 + $0x1f20] sm:$0xff]  ;;  %v1524_v4 = vld [vmem:[%s7184_s5 + $0x1e30] sm:$0xff] }
 0x21e   : > { %v1556_v5 = vld [vmem:[%s7184_s5 + $0x1f30] sm:$0xff]  ;;  %v3039_v10 = vpack.c.bf16 %v1554_v1, %v1522_v0  ;;  %v854_v0 = vld [vmem:[%s7184_s5 + $0x940] sm:$0xff] }
 0x21f   : > { %v3103_v11 = vpack.c.bf16 %v1556_v5, %v1524_v4  ;;  %v824_v1 = vld [vmem:[%s7184_s5 + $0x850] sm:$0xff]  ;;  %v887_v4 = vld [vmem:[%s7184_s5 + $0xa48] sm:$0xff] }
 0x220   : > { %3020 = vmatpush1.bf16.msra.mxu1 %v3019_v12  ;;  %3084 = vmatpush1.bf16.msra.mxu0 %v3083_v13  ;;  %v3105_v12 = vpack.c.bf16 %v599_v7, %v567_v6  ;;  %v3169_v13 = vpack.c.bf16 %v601_v9, %v569_v8  ;;  %v919_v5 = vld [vmem:[%s7184_s5 + $0xb48] sm:$0xff]  ;;  %v889_v6 = vld [vmem:[%s7184_s5 + $0xa58] sm:$0xff] }
 0x221   : > { %3022 = vmatprep.subr.bf16.mxu1 %v3021_v17  ;;  %3086 = vmatprep.subr.bf16.mxu0 %v3085_v18  ;;  %v568_v17 = vld [vmem:[%s7184_s5 + $0x50] sm:$0xff]  ;;  %v921_v7 = vld [vmem:[%s7184_s5 + $0xb58] sm:$0xff] }
 0x222   : > { %v600_v18 = vld [vmem:[%s7184_s5 + $0x150] sm:$0xff]  ;;  %v3189_v14 = vpack.c.bf16 %v921_v7, %v889_v6 }
 0x223   : > { %v3171_v25 = vpack.c.bf16 %v600_v18, %v568_v17  ;;  %v951_v17 = vld [vmem:[%s7184_s5 + $0xc48] sm:$0xff] }
 0x224   : > { %3024 = vmatpush1.bf16.msra.mxu1 %v3023_v26  ;;  %3088 = vmatpush1.bf16.msra.mxu0 %v3087_v27  ;;  %v630_v26 = vld [vmem:[%s7184_s5 + $0x240] sm:$0xff]  ;;  %v983_v18 = vld [vmem:[%s7184_s5 + $0xd48] sm:$0xff] }
 0x225   : > { %3026 = vmatprep.subr.bf16.mxu1 %v3025_v30  ;;  %3090 = vmatprep.subr.bf16.mxu0 %v3089_v31  ;;  %v662_v27 = vld [vmem:[%s7184_s5 + $0x340] sm:$0xff]  ;;  %v3173_v30 = vpack.c.bf16 %v665_v23, %v633_v22  ;;  %v664_v31 = vld [vmem:[%s7184_s5 + $0x350] sm:$0xff] }
 0x226   : > { %v3111_v36 = vpack.c.bf16 %v662_v27, %v630_v26  ;;  %v3175_v37 = vpack.c.bf16 %v664_v31, %v632_v28  ;;  %v982_v26 = vld [vmem:[%s7184_s5 + $0xd40] sm:$0xff]  ;;  %v952_v27 = vld [vmem:[%s7184_s5 + $0xc50] sm:$0xff]  ;;  %v3193_v28 = vpack.c.bf16 %v985_v20, %v953_v19  ;;  %v1047_v31 = vld [vmem:[%s7184_s5 + $0xf48] sm:$0xff] }
 0x228   : > { %3028 = vmatpush1.bf16.msra.mxu1 %v3027_v38  ;;  %3092 = vmatpush1.bf16.msra.mxu0 %v3091_v39  ;;  %v3113_v38 = vpack.c.bf16 %v727_v33, %v695_v32  ;;  %v694_v39 = vld [vmem:[%s7184_s5 + $0x440] sm:$0xff]  ;;  %v1017_v32 = vld [vmem:[%s7184_s5 + $0xe58] sm:$0xff] }
 0x229   : > { %3030 = vmatprep.subr.bf16.mxu1 %v3029_v42  ;;  %3094 = vmatprep.subr.bf16.mxu0 %v3093_v43  ;;  %v3177_v42 = vpack.c.bf16 %v729_v35, %v697_v34  ;;  %v728_v43 = vld [vmem:[%s7184_s5 + $0x550] sm:$0xff]  ;;  %v3115_v48 = vpack.c.bf16 %v726_v40, %v694_v39  ;;  %v1049_v33 = vld [vmem:[%s7184_s5 + $0xf58] sm:$0xff] }
 0x22a   : > { %v3179_v49 = vpack.c.bf16 %v728_v43, %v696_v41  ;;  %v1016_v39 = vld [vmem:[%s7184_s5 + $0xe50] sm:$0xff]  ;;  %v3197_v40 = vpack.c.bf16 %v1049_v33, %v1017_v32  ;;  %v1111_v43 = vld [vmem:[%s7184_s5 + $0x1148] sm:$0xff] }
 0x22b   : > { %v1048_v41 = vld [vmem:[%s7184_s5 + $0xf50] sm:$0xff] }
 0x22c   : > { %3032 = vmatpush1.bf16.msra.mxu1 %v3031_v50  ;;  %3096 = vmatpush1.bf16.msra.mxu0 %v3095_v51  ;;  %v3117_v50 = vpack.c.bf16 %v791_v45, %v759_v44  ;;  %v758_v51 = vld [vmem:[%s7184_s5 + $0x640] sm:$0xff]  ;;  %v1081_v44 = vld [vmem:[%s7184_s5 + $0x1058] sm:$0xff] }
 0x22d   : > { %3034 = vmatprep.subr.bf16.mxu1 %v3033_v54  ;;  %3098 = vmatprep.subr.bf16.mxu0 %v3097_v55  ;;  %v3181_v54 = vpack.c.bf16 %v793_v47, %v761_v46  ;;  %v792_v55 = vld [vmem:[%s7184_s5 + $0x750] sm:$0xff]  ;;  %v3119_v60 = vpack.c.bf16 %v790_v52, %v758_v51  ;;  %v1113_v45 = vld [vmem:[%s7184_s5 + $0x1158] sm:$0xff]  ;;  %v3199_v47 = vpack.c.bf16 %v1048_v41, %v1016_v39  ;;  %v1431_v41 = vld [vmem:[%s7184_s5 + $0x1b48] sm:$0xff] }
 0x22e   : > { %v3183_v61 = vpack.c.bf16 %v792_v55, %v760_v53  ;;  %v1080_v51 = vld [vmem:[%s7184_s5 + $0x1050] sm:$0xff]  ;;  %v3201_v52 = vpack.c.bf16 %v1113_v45, %v1081_v44  ;;  %v1175_v55 = vld [vmem:[%s7184_s5 + $0x1348] sm:$0xff] }
 0x22f   : > { %v1112_v53 = vld [vmem:[%s7184_s5 + $0x1150] sm:$0xff] }
 0x230   : > { %3036 = vmatpush1.bf16.msra.mxu1 %v3035_v62  ;;  %3100 = vmatpush1.bf16.msra.mxu0 %v3099_v63  ;;  %v3121_v62 = vpack.c.bf16 %v855_v57, %v823_v56  ;;  %v822_v63 = vld [vmem:[%s7184_s5 + $0x840] sm:$0xff]  ;;  %v1145_v56 = vld [vmem:[%s7184_s5 + $0x1258] sm:$0xff]  ;;  %v1368_v39 = vld [vmem:[%s7184_s5 + $0x1950] sm:$0xff] }
 0x231   : > { %3038 = vmatprep.subr.bf16.mxu1 %v3037_v2  ;;  %3102 = vmatprep.subr.bf16.mxu0 %v3101_v3  ;;  %v3185_v2 = vpack.c.bf16 %v857_v59, %v825_v58  ;;  %v856_v3 = vld [vmem:[%s7184_s5 + $0x950] sm:$0xff]  ;;  %v3123_v8 = vpack.c.bf16 %v854_v0, %v822_v63  ;;  %v1177_v57 = vld [vmem:[%s7184_s5 + $0x1358] sm:$0xff]  ;;  %v3203_v59 = vpack.c.bf16 %v1112_v53, %v1080_v51  ;;  %v1495_v53 = vld [vmem:[%s7184_s5 + $0x1d48] sm:$0xff] }
 0x232   : > { %v3187_v9 = vpack.c.bf16 %v856_v3, %v824_v1  ;;  %v1144_v63 = vld [vmem:[%s7184_s5 + $0x1250] sm:$0xff]  ;;  %v3205_v0 = vpack.c.bf16 %v1177_v57, %v1145_v56  ;;  %v1239_v3 = vld [vmem:[%s7184_s5 + $0x1548] sm:$0xff] }
 0x233   : > { %v1176_v1 = vld [vmem:[%s7184_s5 + $0x1350] sm:$0xff] }
 0x234   : > { %3040 = vmatpush1.bf16.msra.mxu1 %v3039_v10  ;;  %3104 = vmatpush1.bf16.msra.mxu0 %v3103_v11  ;;  %v3125_v10 = vpack.c.bf16 %v919_v5, %v887_v4  ;;  %v886_v11 = vld [vmem:[%s7184_s5 + $0xa40] sm:$0xff]  ;;  %v1209_v4 = vld [vmem:[%s7184_s5 + $0x1458] sm:$0xff]  ;;  %v3207_v7 = vpack.c.bf16 %v1176_v1, %v1144_v63  ;;  %v1432_v51 = vld [vmem:[%s7184_s5 + $0x1b50] sm:$0xff] }
 0x235   : > { %3106 = vmatprep.subr.bf16.mxu1 %v3105_v12  ;;  %3170 = vmatprep.subr.bf16.mxu0 %v3169_v13  ;;  %v918_v12 = vld [vmem:[%s7184_s5 + $0xb40] sm:$0xff]  ;;  %v888_v13 = vld [vmem:[%s7184_s5 + $0xa50] sm:$0xff]  ;;  %v1241_v5 = vld [vmem:[%s7184_s5 + $0x1558] sm:$0xff] }
 0x236   : > { %v3127_v22 = vpack.c.bf16 %v918_v12, %v886_v11  ;;  %v3191_v23 = vpack.c.bf16 %v920_v15, %v888_v13  ;;  %v1208_v11 = vld [vmem:[%s7184_s5 + $0x1450] sm:$0xff]  ;;  %v3209_v12 = vpack.c.bf16 %v1241_v5, %v1209_v4  ;;  %v1303_v15 = vld [vmem:[%s7184_s5 + $0x1748] sm:$0xff] }
 0x237   : > { %1789 = vmatmul.mubr.f32.vlgmr.msra.gmra.mrb[4].mxu1 %v4458_v21  ;;  %1860 = vmatmul.mubr.f32.vlgmr.msra.gmra.mrb[10].mxu0 %v4458_v21  ;;  %v1240_v13 = vld [vmem:[%s7184_s5 + $0x1550] sm:$0xff]  ;;  %v1559_v1 = vld [vmem:[%s7184_s5 + $0x1f48] sm:$0xff] }
 0x238   : > { %3108 = vmatpush1.bf16.msra.mxu1 %v3107_v24  ;;  %1930 = vmatprep.mubr.f32.mxu1 %v4450_v16  ;;  %v3129_v24 = vpack.c.bf16 %v983_v18, %v951_v17  ;;  %v1273_v17 = vld [vmem:[%s7184_s5 + $0x1658] sm:$0xff]  ;;  %v3211_v20 = vpack.c.bf16 %v1240_v13, %v1208_v11  ;;  %v1496_v63 = vld [vmem:[%s7184_s5 + $0x1d50] sm:$0xff]  ;;  %v603_v13 = vld [vmem:[%s7184_s5 + $0x168] sm:$0xff] }
 0x239   : > { %3172 = vmatpush1.bf16.msra.mxu0 %v3171_v25  ;;  %2001 = vmatprep.mubr.f32.mxu0 %v4450_v16  ;;  %v950_v25 = vld [vmem:[%s7184_s5 + $0xc40] sm:$0xff]  ;;  %v1305_v18 = vld [vmem:[%s7184_s5 + $0x1758] sm:$0xff]  ;;  %v1560_v11 = vld [vmem:[%s7184_s5 + $0x1f50] sm:$0xff] }
 0x23a   : > { %3110 = vmatprep.subr.bf16.mxu1 %v3109_v29  ;;  %3174 = vmatprep.subr.bf16.mxu0 %v3173_v30  ;;  %v984_v29 = vld [vmem:[%s7184_s5 + $0xd50] sm:$0xff]  ;;  %v1015_v30 = vld [vmem:[%s7184_s5 + $0xe48] sm:$0xff]  ;;  %v3131_v34 = vpack.c.bf16 %v982_v26, %v950_v25  ;;  %v3213_v26 = vpack.c.bf16 %v1305_v18, %v1273_v17 }
 0x23b   : > { %v3195_v35 = vpack.c.bf16 %v984_v29, %v952_v27  ;;  %v1272_v25 = vld [vmem:[%s7184_s5 + $0x1650] sm:$0xff]  ;;  %v1367_v29 = vld [vmem:[%s7184_s5 + $0x1948] sm:$0xff] }
 0x23c   : > { %3112 = vmatpush1.bf16.msra.mxu1 %v3111_v36  ;;  %v3133_v36 = vpack.c.bf16 %v1047_v31, %v1015_v30  ;;  %v1304_v27 = vld [vmem:[%s7184_s5 + $0x1750] sm:$0xff]  ;;  %v1337_v30 = vld [vmem:[%s7184_s5 + $0x1858] sm:$0xff] }
 0x23d   : > { %3176 = vmatpush1.bf16.msra.mxu0 %v3175_v37  ;;  %3114 = vmatprep.subr.bf16.mxu1 %v3113_v38  ;;  %v1014_v37 = vld [vmem:[%s7184_s5 + $0xe40] sm:$0xff]  ;;  %v1369_v31 = vld [vmem:[%s7184_s5 + $0x1958] sm:$0xff]  ;;  %v3215_v33 = vpack.c.bf16 %v1304_v27, %v1272_v25  ;;  %v604_v25 = vld [vmem:[%s7184_s5 + $0x170] sm:$0xff] }
 0x23e   : > { %3178 = vmatprep.subr.bf16.mxu0 %v3177_v42  ;;  %v1046_v38 = vld [vmem:[%s7184_s5 + $0xf40] sm:$0xff]  ;;  %v1079_v42 = vld [vmem:[%s7184_s5 + $0x1048] sm:$0xff] }
 0x23f   : > { %v3135_v46 = vpack.c.bf16 %v1046_v38, %v1014_v37  ;;  %v1336_v37 = vld [vmem:[%s7184_s5 + $0x1850] sm:$0xff]  ;;  %v3217_v38 = vpack.c.bf16 %v1369_v31, %v1337_v30  ;;  %v667_v27 = vld [vmem:[%s7184_s5 + $0x368] sm:$0xff]  ;;  %v669_v30 = vld [vmem:[%s7184_s5 + $0x378] sm:$0xff] }
 0x240   : > { %3116 = vmatpush1.bf16.msra.mxu1 %v3115_v48  ;;  %v3137_v48 = vpack.c.bf16 %v1111_v43, %v1079_v42  ;;  %v1401_v42 = vld [vmem:[%s7184_s5 + $0x1a58] sm:$0xff]  ;;  %v3219_v45 = vpack.c.bf16 %v1368_v39, %v1336_v37  ;;  %v699_v37 = vld [vmem:[%s7184_s5 + $0x468] sm:$0xff] }
 0x241   : > { %3180 = vmatpush1.bf16.msra.mxu0 %v3179_v49  ;;  %3118 = vmatprep.subr.bf16.mxu1 %v3117_v50  ;;  %v1078_v49 = vld [vmem:[%s7184_s5 + $0x1040] sm:$0xff]  ;;  %v1433_v43 = vld [vmem:[%s7184_s5 + $0x1b58] sm:$0xff] }
 0x242   : > { %3182 = vmatprep.subr.bf16.mxu0 %v3181_v54  ;;  %v1110_v50 = vld [vmem:[%s7184_s5 + $0x1140] sm:$0xff]  ;;  %v1143_v54 = vld [vmem:[%s7184_s5 + $0x1248] sm:$0xff] }
 0x243   : > { %v3139_v58 = vpack.c.bf16 %v1110_v50, %v1078_v49  ;;  %v1400_v49 = vld [vmem:[%s7184_s5 + $0x1a50] sm:$0xff]  ;;  %v3221_v50 = vpack.c.bf16 %v1433_v43, %v1401_v42 }
 0x244   : > { %3120 = vmatpush1.bf16.msra.mxu1 %v3119_v60  ;;  %v3141_v60 = vpack.c.bf16 %v1175_v55, %v1143_v54  ;;  %v1465_v54 = vld [vmem:[%s7184_s5 + $0x1c58] sm:$0xff]  ;;  %v3223_v57 = vpack.c.bf16 %v1432_v51, %v1400_v49  ;;  %v732_v49 = vld [vmem:[%s7184_s5 + $0x570] sm:$0xff]  ;;  %v795_v51 = vld [vmem:[%s7184_s5 + $0x768] sm:$0xff] }
 0x245   : > { %3184 = vmatpush1.bf16.msra.mxu0 %v3183_v61  ;;  %3122 = vmatprep.subr.bf16.mxu1 %v3121_v62  ;;  %v1142_v61 = vld [vmem:[%s7184_s5 + $0x1240] sm:$0xff]  ;;  %v1497_v55 = vld [vmem:[%s7184_s5 + $0x1d58] sm:$0xff] }
 0x246   : > { %3186 = vmatprep.subr.bf16.mxu0 %v3185_v2  ;;  %v1174_v62 = vld [vmem:[%s7184_s5 + $0x1340] sm:$0xff]  ;;  %v1207_v2 = vld [vmem:[%s7184_s5 + $0x1448] sm:$0xff] }
 0x247   : > { %v3143_v6 = vpack.c.bf16 %v1174_v62, %v1142_v61  ;;  %v1464_v61 = vld [vmem:[%s7184_s5 + $0x1c50] sm:$0xff]  ;;  %v3225_v62 = vpack.c.bf16 %v1497_v55, %v1465_v54 }
 0x248   : > { %3124 = vmatpush1.bf16.msra.mxu1 %v3123_v8  ;;  %v3145_v8 = vpack.c.bf16 %v1239_v3, %v1207_v2  ;;  %v1529_v2 = vld [vmem:[%s7184_s5 + $0x1e58] sm:$0xff]  ;;  %v3227_v5 = vpack.c.bf16 %v1496_v63, %v1464_v61  ;;  %v796_v61 = vld [vmem:[%s7184_s5 + $0x770] sm:$0xff]  ;;  %v859_v63 = vld [vmem:[%s7184_s5 + $0x968] sm:$0xff] }
 0x249   : > { %3188 = vmatpush1.bf16.msra.mxu0 %v3187_v9  ;;  %3126 = vmatprep.subr.bf16.mxu1 %v3125_v10  ;;  %v1206_v9 = vld [vmem:[%s7184_s5 + $0x1440] sm:$0xff]  ;;  %v1561_v3 = vld [vmem:[%s7184_s5 + $0x1f58] sm:$0xff] }
 0x24a   : > { %3190 = vmatprep.subr.bf16.mxu0 %v3189_v14  ;;  %v1238_v10 = vld [vmem:[%s7184_s5 + $0x1540] sm:$0xff]  ;;  %v1271_v14 = vld [vmem:[%s7184_s5 + $0x1648] sm:$0xff] }
 0x24b   : > { %v3147_v19 = vpack.c.bf16 %v1238_v10, %v1206_v9  ;;  %v1528_v9 = vld [vmem:[%s7184_s5 + $0x1e50] sm:$0xff]  ;;  %v3229_v10 = vpack.c.bf16 %v1561_v3, %v1529_v2 }
 0x24c   : > { %3128 = vmatpush1.bf16.msra.mxu1 %v3127_v22  ;;  %v3149_v22 = vpack.c.bf16 %v1303_v15, %v1271_v14  ;;  %v573_v14 = vld [vmem:[%s7184_s5 + $0x78] sm:$0xff]  ;;  %v3231_v18 = vpack.c.bf16 %v1560_v11, %v1528_v9  ;;  %v860_v9 = vld [vmem:[%s7184_s5 + $0x970] sm:$0xff]  ;;  %v923_v11 = vld [vmem:[%s7184_s5 + $0xb68] sm:$0xff] }
 0x24d   : > { %3192 = vmatpush1.bf16.msra.mxu0 %v3191_v23  ;;  %3130 = vmatprep.subr.bf16.mxu1 %v3129_v24  ;;  %v1270_v23 = vld [vmem:[%s7184_s5 + $0x1640] sm:$0xff]  ;;  %v605_v15 = vld [vmem:[%s7184_s5 + $0x178] sm:$0xff] }
 0x24e   : > { %3194 = vmatprep.subr.bf16.mxu0 %v3193_v28  ;;  %v1302_v24 = vld [vmem:[%s7184_s5 + $0x1740] sm:$0xff]  ;;  %v1335_v28 = vld [vmem:[%s7184_s5 + $0x1848] sm:$0xff] }
 0x24f   : > { %v3151_v32 = vpack.c.bf16 %v1302_v24, %v1270_v23  ;;  %v3297_v23 = vpack.c.bf16 %v605_v15, %v573_v14  ;;  %v572_v24 = vld [vmem:[%s7184_s5 + $0x70] sm:$0xff] }
 0x250   : > { %3132 = vmatpush1.bf16.msra.mxu1 %v3131_v34  ;;  %v3153_v34 = vpack.c.bf16 %v1367_v29, %v1335_v28  ;;  %v637_v29 = vld [vmem:[%s7184_s5 + $0x278] sm:$0xff]  ;;  %v3299_v31 = vpack.c.bf16 %v604_v25, %v572_v24  ;;  %v955_v24 = vld [vmem:[%s7184_s5 + $0xc68] sm:$0xff] }
 0x251   : > { %3196 = vmatpush1.bf16.msra.mxu0 %v3195_v35  ;;  %3134 = vmatprep.subr.bf16.mxu1 %v3133_v36  ;;  %v1334_v35 = vld [vmem:[%s7184_s5 + $0x1840] sm:$0xff]  ;;  %v3301_v39 = vpack.c.bf16 %v669_v30, %v637_v29  ;;  %v987_v25 = vld [vmem:[%s7184_s5 + $0xd68] sm:$0xff] }
 0x252   : > { %3198 = vmatprep.subr.bf16.mxu0 %v3197_v40  ;;  %v1366_v36 = vld [vmem:[%s7184_s5 + $0x1940] sm:$0xff]  ;;  %v1399_v40 = vld [vmem:[%s7184_s5 + $0x1a48] sm:$0xff]  ;;  %v3257_v30 = vpack.c.bf16 %v987_v25, %v955_v24  ;;  %v1277_v24 = vld [vmem:[%s7184_s5 + $0x1678] sm:$0xff] }
 0x253   : > { %v3155_v44 = vpack.c.bf16 %v1366_v36, %v1334_v35  ;;  %v668_v36 = vld [vmem:[%s7184_s5 + $0x370] sm:$0xff]  ;;  %v1309_v25 = vld [vmem:[%s7184_s5 + $0x1778] sm:$0xff] }
 0x254   : > { %3136 = vmatpush1.bf16.msra.mxu1 %v3135_v46  ;;  %v3157_v46 = vpack.c.bf16 %v1431_v41, %v1399_v40  ;;  %v701_v40 = vld [vmem:[%s7184_s5 + $0x478] sm:$0xff] }
 0x255   : > { %3200 = vmatpush1.bf16.msra.mxu0 %v3199_v47  ;;  %3138 = vmatprep.subr.bf16.mxu1 %v3137_v48  ;;  %v1398_v47 = vld [vmem:[%s7184_s5 + $0x1a40] sm:$0xff]  ;;  %v733_v41 = vld [vmem:[%s7184_s5 + $0x578] sm:$0xff] }
 0x256   : > { %3202 = vmatprep.subr.bf16.mxu0 %v3201_v52  ;;  %v1430_v48 = vld [vmem:[%s7184_s5 + $0x1b40] sm:$0xff]  ;;  %v1463_v52 = vld [vmem:[%s7184_s5 + $0x1c48] sm:$0xff] }
 0x257   : > { %v3159_v56 = vpack.c.bf16 %v1430_v48, %v1398_v47  ;;  %v700_v47 = vld [vmem:[%s7184_s5 + $0x470] sm:$0xff]  ;;  %v3305_v48 = vpack.c.bf16 %v733_v41, %v701_v40 }
 0x258   : > { %3140 = vmatpush1.bf16.msra.mxu1 %v3139_v58  ;;  %v3161_v58 = vpack.c.bf16 %v1495_v53, %v1463_v52  ;;  %v765_v52 = vld [vmem:[%s7184_s5 + $0x678] sm:$0xff]  ;;  %v3307_v55 = vpack.c.bf16 %v732_v49, %v700_v47  ;;  %v1052_v47 = vld [vmem:[%s7184_s5 + $0xf70] sm:$0xff]  ;;  %v1115_v49 = vld [vmem:[%s7184_s5 + $0x1168] sm:$0xff] }
 0x259   : > { %3204 = vmatpush1.bf16.msra.mxu0 %v3203_v59  ;;  %3142 = vmatprep.subr.bf16.mxu1 %v3141_v60  ;;  %v1462_v59 = vld [vmem:[%s7184_s5 + $0x1c40] sm:$0xff]  ;;  %v797_v53 = vld [vmem:[%s7184_s5 + $0x778] sm:$0xff] }
 0x25a   : > { %3206 = vmatprep.subr.bf16.mxu0 %v3205_v0  ;;  %v1494_v60 = vld [vmem:[%s7184_s5 + $0x1d40] sm:$0xff]  ;;  %v1527_v0 = vld [vmem:[%s7184_s5 + $0x1e48] sm:$0xff] }
 0x25b   : > { %v3163_v4 = vpack.c.bf16 %v1494_v60, %v1462_v59  ;;  %v764_v59 = vld [vmem:[%s7184_s5 + $0x670] sm:$0xff]  ;;  %v3309_v60 = vpack.c.bf16 %v797_v53, %v765_v52 }
 0x25c   : > { %3144 = vmatpush1.bf16.msra.mxu1 %v3143_v6  ;;  %v3165_v6 = vpack.c.bf16 %v1559_v1, %v1527_v0  ;;  %v829_v0 = vld [vmem:[%s7184_s5 + $0x878] sm:$0xff]  ;;  %v3311_v3 = vpack.c.bf16 %v796_v61, %v764_v59  ;;  %v1116_v59 = vld [vmem:[%s7184_s5 + $0x1170] sm:$0xff]  ;;  %v1179_v61 = vld [vmem:[%s7184_s5 + $0x1368] sm:$0xff] }
 0x25d   : > { %3208 = vmatpush1.bf16.msra.mxu0 %v3207_v7  ;;  %3146 = vmatprep.subr.bf16.mxu1 %v3145_v8  ;;  %v1526_v7 = vld [vmem:[%s7184_s5 + $0x1e40] sm:$0xff]  ;;  %v861_v1 = vld [vmem:[%s7184_s5 + $0x978] sm:$0xff] }
 0x25e   : > { %3210 = vmatprep.subr.bf16.mxu0 %v3209_v12  ;;  %v1558_v8 = vld [vmem:[%s7184_s5 + $0x1f40] sm:$0xff]  ;;  %v571_v12 = vld [vmem:[%s7184_s5 + $0x68] sm:$0xff] }
 0x25f   : > { %v3167_v17 = vpack.c.bf16 %v1558_v8, %v1526_v7  ;;  %v828_v7 = vld [vmem:[%s7184_s5 + $0x870] sm:$0xff]  ;;  %v3313_v8 = vpack.c.bf16 %v861_v1, %v829_v0 }
 0x260   : > { %3148 = vmatpush1.bf16.msra.mxu1 %v3147_v19  ;;  %v3233_v19 = vpack.c.bf16 %v603_v13, %v571_v12  ;;  %v893_v12 = vld [vmem:[%s7184_s5 + $0xa78] sm:$0xff]  ;;  %v3315_v15 = vpack.c.bf16 %v860_v9, %v828_v7  ;;  %v1180_v7 = vld [vmem:[%s7184_s5 + $0x1370] sm:$0xff]  ;;  %v1243_v9 = vld [vmem:[%s7184_s5 + $0x1568] sm:$0xff] }
 0x261   : > { %3212 = vmatpush1.bf16.msra.mxu0 %v3211_v20  ;;  %3150 = vmatprep.subr.bf16.mxu1 %v3149_v22  ;;  %v570_v20 = vld [vmem:[%s7184_s5 + $0x60] sm:$0xff]  ;;  %v925_v13 = vld [vmem:[%s7184_s5 + $0xb78] sm:$0xff] }
 0x262   : > { %3214 = vmatprep.subr.bf16.mxu0 %v3213_v26  ;;  %v602_v22 = vld [vmem:[%s7184_s5 + $0x160] sm:$0xff]  ;;  %v635_v26 = vld [vmem:[%s7184_s5 + $0x268] sm:$0xff] }
 0x263   : > { %v3235_v28 = vpack.c.bf16 %v602_v22, %v570_v20  ;;  %v3237_v35 = vpack.c.bf16 %v667_v27, %v635_v26  ;;  %v892_v20 = vld [vmem:[%s7184_s5 + $0xa70] sm:$0xff]  ;;  %v3317_v22 = vpack.c.bf16 %v925_v13, %v893_v12  ;;  %v957_v26 = vld [vmem:[%s7184_s5 + $0xc78] sm:$0xff] }
 0x264   : > { %3152 = vmatpush1.bf16.msra.mxu1 %v3151_v32  ;;  %v634_v32 = vld [vmem:[%s7184_s5 + $0x260] sm:$0xff]  ;;  %v989_v27 = vld [vmem:[%s7184_s5 + $0xd78] sm:$0xff] }
 0x265   : > { %3216 = vmatpush1.bf16.msra.mxu0 %v3215_v33  ;;  %3154 = vmatprep.subr.bf16.mxu1 %v3153_v34  ;;  %v666_v33 = vld [vmem:[%s7184_s5 + $0x360] sm:$0xff]  ;;  %v636_v34 = vld [vmem:[%s7184_s5 + $0x270] sm:$0xff] }
 0x266   : > { %3218 = vmatprep.subr.bf16.mxu0 %v3217_v38  ;;  %v731_v38 = vld [vmem:[%s7184_s5 + $0x568] sm:$0xff]  ;;  %v3239_v42 = vpack.c.bf16 %v666_v33, %v634_v32  ;;  %v3303_v43 = vpack.c.bf16 %v668_v36, %v636_v34  ;;  %v986_v32 = vld [vmem:[%s7184_s5 + $0xd60] sm:$0xff]  ;;  %v956_v33 = vld [vmem:[%s7184_s5 + $0xc70] sm:$0xff]  ;;  %v3321_v34 = vpack.c.bf16 %v989_v27, %v957_v26 }
 0x267   : > { %v1019_v36 = vld [vmem:[%s7184_s5 + $0xe68] sm:$0xff] }
 0x268   : > { %3156 = vmatpush1.bf16.msra.mxu1 %v3155_v44  ;;  %v3241_v44 = vpack.c.bf16 %v731_v38, %v699_v37  ;;  %v1051_v37 = vld [vmem:[%s7184_s5 + $0xf68] sm:$0xff]  ;;  %v1021_v38 = vld [vmem:[%s7184_s5 + $0xe78] sm:$0xff] }
 0x269   : > { %3220 = vmatpush1.bf16.msra.mxu0 %v3219_v45  ;;  %3158 = vmatprep.subr.bf16.mxu1 %v3157_v46  ;;  %v698_v45 = vld [vmem:[%s7184_s5 + $0x460] sm:$0xff] }
 0x26a   : > { %3222 = vmatprep.subr.bf16.mxu0 %v3221_v50  ;;  %v730_v46 = vld [vmem:[%s7184_s5 + $0x560] sm:$0xff]  ;;  %v763_v50 = vld [vmem:[%s7184_s5 + $0x668] sm:$0xff] }
 0x26b   : > { %v3243_v54 = vpack.c.bf16 %v730_v46, %v698_v45  ;;  %v1020_v45 = vld [vmem:[%s7184_s5 + $0xe70] sm:$0xff] }
 0x26c   : > { %3160 = vmatpush1.bf16.msra.mxu1 %v3159_v56  ;;  %v3245_v56 = vpack.c.bf16 %v795_v51, %v763_v50  ;;  %v1085_v50 = vld [vmem:[%s7184_s5 + $0x1078] sm:$0xff]  ;;  %v3327_v53 = vpack.c.bf16 %v1052_v47, %v1020_v45  ;;  %v1372_v45 = vld [vmem:[%s7184_s5 + $0x1970] sm:$0xff]  ;;  %v1435_v47 = vld [vmem:[%s7184_s5 + $0x1b68] sm:$0xff] }
 0x26d   : > { %3224 = vmatpush1.bf16.msra.mxu0 %v3223_v57  ;;  %3162 = vmatprep.subr.bf16.mxu1 %v3161_v58  ;;  %v762_v57 = vld [vmem:[%s7184_s5 + $0x660] sm:$0xff]  ;;  %v1117_v51 = vld [vmem:[%s7184_s5 + $0x1178] sm:$0xff] }
 0x26e   : > { %3226 = vmatprep.subr.bf16.mxu0 %v3225_v62  ;;  %v794_v58 = vld [vmem:[%s7184_s5 + $0x760] sm:$0xff]  ;;  %v827_v62 = vld [vmem:[%s7184_s5 + $0x868] sm:$0xff] }
 0x26f   : > { %v3247_v2 = vpack.c.bf16 %v794_v58, %v762_v57  ;;  %v1084_v57 = vld [vmem:[%s7184_s5 + $0x1070] sm:$0xff]  ;;  %v3329_v58 = vpack.c.bf16 %v1117_v51, %v1085_v50 }
 0x270   : > { %3164 = vmatpush1.bf16.msra.mxu1 %v3163_v4  ;;  %v3249_v4 = vpack.c.bf16 %v859_v63, %v827_v62  ;;  %v1149_v62 = vld [vmem:[%s7184_s5 + $0x1278] sm:$0xff]  ;;  %v3331_v1 = vpack.c.bf16 %v1116_v59, %v1084_v57  ;;  %v1436_v57 = vld [vmem:[%s7184_s5 + $0x1b70] sm:$0xff]  ;;  %v1499_v59 = vld [vmem:[%s7184_s5 + $0x1d68] sm:$0xff] }
 0x271   : > { %3228 = vmatpush1.bf16.msra.mxu0 %v3227_v5  ;;  %3166 = vmatprep.subr.bf16.mxu1 %v3165_v6  ;;  %v826_v5 = vld [vmem:[%s7184_s5 + $0x860] sm:$0xff]  ;;  %v1181_v63 = vld [vmem:[%s7184_s5 + $0x1378] sm:$0xff] }
 0x272   : > { %3230 = vmatprep.subr.bf16.mxu0 %v3229_v10  ;;  %v858_v6 = vld [vmem:[%s7184_s5 + $0x960] sm:$0xff]  ;;  %v891_v10 = vld [vmem:[%s7184_s5 + $0xa68] sm:$0xff] }
 0x273   : > { %v3251_v14 = vpack.c.bf16 %v858_v6, %v826_v5  ;;  %v1148_v5 = vld [vmem:[%s7184_s5 + $0x1270] sm:$0xff]  ;;  %v3333_v6 = vpack.c.bf16 %v1181_v63, %v1149_v62 }
 0x274   : > { %3168 = vmatpush1.bf16.msra.mxu1 %v3167_v17  ;;  %v3253_v17 = vpack.c.bf16 %v923_v11, %v891_v10  ;;  %v1213_v10 = vld [vmem:[%s7184_s5 + $0x1478] sm:$0xff]  ;;  %v3335_v13 = vpack.c.bf16 %v1180_v7, %v1148_v5  ;;  %v1500_v5 = vld [vmem:[%s7184_s5 + $0x1d70] sm:$0xff]  ;;  %v1563_v7 = vld [vmem:[%s7184_s5 + $0x1f68] sm:$0xff] }
 0x275   : > { %3232 = vmatpush1.bf16.msra.mxu0 %v3231_v18  ;;  %3234 = vmatprep.subr.bf16.mxu1 %v3233_v19  ;;  %v890_v18 = vld [vmem:[%s7184_s5 + $0xa60] sm:$0xff]  ;;  %v1245_v11 = vld [vmem:[%s7184_s5 + $0x1578] sm:$0xff] }
 0x276   : > { %3298 = vmatprep.subr.bf16.mxu0 %v3297_v23  ;;  %v922_v19 = vld [vmem:[%s7184_s5 + $0xb60] sm:$0xff]  ;;  %v924_v23 = vld [vmem:[%s7184_s5 + $0xb70] sm:$0xff] }
 0x277   : > { %1931 = vmatmul.mubr.f32.vlgmr.msra.gmra.mrb[6].mxu1 %v4458_v21  ;;  %v3319_v29 = vpack.c.bf16 %v924_v23, %v892_v20  ;;  %v1244_v20 = vld [vmem:[%s7184_s5 + $0x1570] sm:$0xff]  ;;  %v1307_v23 = vld [vmem:[%s7184_s5 + $0x1768] sm:$0xff] }
 0x278   : > { %2002 = vmatmul.mubr.f32.vlgmr.msra.gmra.mrb[12].mxu0 %v4458_v21  ;;  %3236 = vmatpush1.bf16.msra.mxu1 %v3235_v28  ;;  %v3255_v28 = vpack.c.bf16 %v922_v19, %v890_v18  ;;  %v1212_v18 = vld [vmem:[%s7184_s5 + $0x1470] sm:$0xff]  ;;  %v3337_v19 = vpack.c.bf16 %v1245_v11, %v1213_v10 }
 0x279   : > { %2072 = vmatprep.mubr.f32.mxu1 %v4450_v16  ;;  %3300 = vmatpush1.bf16.msra.mxu0 %v3299_v31  ;;  %v954_v31 = vld [vmem:[%s7184_s5 + $0xc60] sm:$0xff]  ;;  %v3339_v27 = vpack.c.bf16 %v1244_v20, %v1212_v18  ;;  %v1564_v18 = vld [vmem:[%s7184_s5 + $0x1f70] sm:$0xff]  ;;  %v607_v20 = vld [vmem:[%s7184_s5 + $0x188] sm:$0xff] }
 0x27a   : > { %2143 = vmatprep.mubr.f32.mxu0 %v4450_v16  ;;  %3238 = vmatprep.subr.bf16.mxu1 %v3237_v35  ;;  %v988_v35 = vld [vmem:[%s7184_s5 + $0xd70] sm:$0xff]  ;;  %v3259_v40 = vpack.c.bf16 %v986_v32, %v954_v31  ;;  %v3341_v32 = vpack.c.bf16 %v1309_v25, %v1277_v24 }
 0x27b   : > { %3302 = vmatprep.subr.bf16.mxu0 %v3301_v39  ;;  %v1053_v39 = vld [vmem:[%s7184_s5 + $0xf78] sm:$0xff]  ;;  %v3323_v41 = vpack.c.bf16 %v988_v35, %v956_v33  ;;  %v1276_v31 = vld [vmem:[%s7184_s5 + $0x1670] sm:$0xff]  ;;  %v1371_v35 = vld [vmem:[%s7184_s5 + $0x1968] sm:$0xff] }
 0x27c   : > { %3240 = vmatpush1.bf16.msra.mxu1 %v3239_v42  ;;  %v3261_v42 = vpack.c.bf16 %v1051_v37, %v1019_v36  ;;  %v3325_v46 = vpack.c.bf16 %v1053_v39, %v1021_v38  ;;  %v1308_v33 = vld [vmem:[%s7184_s5 + $0x1770] sm:$0xff]  ;;  %v1341_v36 = vld [vmem:[%s7184_s5 + $0x1878] sm:$0xff] }
 0x27d   : > { %3304 = vmatpush1.bf16.msra.mxu0 %v3303_v43  ;;  %3242 = vmatprep.subr.bf16.mxu1 %v3241_v44  ;;  %v1018_v43 = vld [vmem:[%s7184_s5 + $0xe60] sm:$0xff]  ;;  %v1373_v37 = vld [vmem:[%s7184_s5 + $0x1978] sm:$0xff]  ;;  %v3343_v39 = vpack.c.bf16 %v1308_v33, %v1276_v31  ;;  %v608_v31 = vld [vmem:[%s7184_s5 + $0x190] sm:$0xff] }
 0x27e   : > { %3306 = vmatprep.subr.bf16.mxu0 %v3305_v48  ;;  %v1050_v44 = vld [vmem:[%s7184_s5 + $0xf60] sm:$0xff]  ;;  %v1083_v48 = vld [vmem:[%s7184_s5 + $0x1068] sm:$0xff] }
 0x27f   : > { %v3263_v52 = vpack.c.bf16 %v1050_v44, %v1018_v43  ;;  %v1340_v43 = vld [vmem:[%s7184_s5 + $0x1870] sm:$0xff]  ;;  %v3345_v44 = vpack.c.bf16 %v1373_v37, %v1341_v36  ;;  %v671_v33 = vld [vmem:[%s7184_s5 + $0x388] sm:$0xff]  ;;  %v673_v36 = vld [vmem:[%s7184_s5 + $0x398] sm:$0xff] }
 0x280   : > { %3244 = vmatpush1.bf16.msra.mxu1 %v3243_v54  ;;  %v3265_v54 = vpack.c.bf16 %v1115_v49, %v1083_v48  ;;  %v1405_v48 = vld [vmem:[%s7184_s5 + $0x1a78] sm:$0xff]  ;;  %v3347_v51 = vpack.c.bf16 %v1372_v45, %v1340_v43  ;;  %v703_v43 = vld [vmem:[%s7184_s5 + $0x488] sm:$0xff] }
 0x281   : > { %3308 = vmatpush1.bf16.msra.mxu0 %v3307_v55  ;;  %3246 = vmatprep.subr.bf16.mxu1 %v3245_v56  ;;  %v1082_v55 = vld [vmem:[%s7184_s5 + $0x1060] sm:$0xff]  ;;  %v1437_v49 = vld [vmem:[%s7184_s5 + $0x1b78] sm:$0xff] }
 0x282   : > { %3310 = vmatprep.subr.bf16.mxu0 %v3309_v60  ;;  %v1114_v56 = vld [vmem:[%s7184_s5 + $0x1160] sm:$0xff]  ;;  %v1147_v60 = vld [vmem:[%s7184_s5 + $0x1268] sm:$0xff] }
 0x283   : > { %v3267_v0 = vpack.c.bf16 %v1114_v56, %v1082_v55  ;;  %v1404_v55 = vld [vmem:[%s7184_s5 + $0x1a70] sm:$0xff]  ;;  %v3349_v56 = vpack.c.bf16 %v1437_v49, %v1405_v48 }
 0x284   : > { %3248 = vmatpush1.bf16.msra.mxu1 %v3247_v2  ;;  %v3269_v2 = vpack.c.bf16 %v1179_v61, %v1147_v60  ;;  %v1469_v60 = vld [vmem:[%s7184_s5 + $0x1c78] sm:$0xff]  ;;  %v3351_v63 = vpack.c.bf16 %v1436_v57, %v1404_v55  ;;  %v736_v55 = vld [vmem:[%s7184_s5 + $0x590] sm:$0xff]  ;;  %v799_v57 = vld [vmem:[%s7184_s5 + $0x788] sm:$0xff] }
 0x285   : > { %3312 = vmatpush1.bf16.msra.mxu0 %v3311_v3  ;;  %3250 = vmatprep.subr.bf16.mxu1 %v3249_v4  ;;  %v1146_v3 = vld [vmem:[%s7184_s5 + $0x1260] sm:$0xff]  ;;  %v1501_v61 = vld [vmem:[%s7184_s5 + $0x1d78] sm:$0xff] }
 0x286   : > { %3314 = vmatprep.subr.bf16.mxu0 %v3313_v8  ;;  %v1178_v4 = vld [vmem:[%s7184_s5 + $0x1360] sm:$0xff]  ;;  %v1211_v8 = vld [vmem:[%s7184_s5 + $0x1468] sm:$0xff] }
 0x287   : > { %v3271_v12 = vpack.c.bf16 %v1178_v4, %v1146_v3  ;;  %v1468_v3 = vld [vmem:[%s7184_s5 + $0x1c70] sm:$0xff]  ;;  %v3353_v4 = vpack.c.bf16 %v1501_v61, %v1469_v60 }
 0x288   : > { %3252 = vmatpush1.bf16.msra.mxu1 %v3251_v14  ;;  %v3273_v14 = vpack.c.bf16 %v1243_v9, %v1211_v8  ;;  %v1533_v8 = vld [vmem:[%s7184_s5 + $0x1e78] sm:$0xff]  ;;  %v3355_v11 = vpack.c.bf16 %v1500_v5, %v1468_v3  ;;  %v800_v3 = vld [vmem:[%s7184_s5 + $0x790] sm:$0xff]  ;;  %v863_v5 = vld [vmem:[%s7184_s5 + $0x988] sm:$0xff] }
 0x289   : > { %3316 = vmatpush1.bf16.msra.mxu0 %v3315_v15  ;;  %3254 = vmatprep.subr.bf16.mxu1 %v3253_v17  ;;  %v1210_v15 = vld [vmem:[%s7184_s5 + $0x1460] sm:$0xff]  ;;  %v1565_v9 = vld [vmem:[%s7184_s5 + $0x1f78] sm:$0xff] }
 0x28a   : > { %3318 = vmatprep.subr.bf16.mxu0 %v3317_v22  ;;  %v1242_v17 = vld [vmem:[%s7184_s5 + $0x1560] sm:$0xff]  ;;  %v1275_v22 = vld [vmem:[%s7184_s5 + $0x1668] sm:$0xff] }
 0x28b   : > { %v3275_v26 = vpack.c.bf16 %v1242_v17, %v1210_v15  ;;  %v1532_v15 = vld [vmem:[%s7184_s5 + $0x1e70] sm:$0xff]  ;;  %v3357_v17 = vpack.c.bf16 %v1565_v9, %v1533_v8 }
 0x28c   : > { %3256 = vmatpush1.bf16.msra.mxu1 %v3255_v28  ;;  %v3277_v28 = vpack.c.bf16 %v1307_v23, %v1275_v22  ;;  %v577_v22 = vld [vmem:[%s7184_s5 + $0x98] sm:$0xff]  ;;  %v3359_v25 = vpack.c.bf16 %v1564_v18, %v1532_v15  ;;  %v864_v15 = vld [vmem:[%s7184_s5 + $0x990] sm:$0xff]  ;;  %v927_v18 = vld [vmem:[%s7184_s5 + $0xb88] sm:$0xff] }
 0x28d   : > { %3320 = vmatpush1.bf16.msra.mxu0 %v3319_v29  ;;  %3258 = vmatprep.subr.bf16.mxu1 %v3257_v30  ;;  %v1274_v29 = vld [vmem:[%s7184_s5 + $0x1660] sm:$0xff]  ;;  %v609_v23 = vld [vmem:[%s7184_s5 + $0x198] sm:$0xff] }
 0x28e   : > { %3322 = vmatprep.subr.bf16.mxu0 %v3321_v34  ;;  %v1306_v30 = vld [vmem:[%s7184_s5 + $0x1760] sm:$0xff]  ;;  %v1339_v34 = vld [vmem:[%s7184_s5 + $0x1868] sm:$0xff] }
 0x28f   : > { %v3279_v38 = vpack.c.bf16 %v1306_v30, %v1274_v29  ;;  %v3425_v29 = vpack.c.bf16 %v609_v23, %v577_v22  ;;  %v576_v30 = vld [vmem:[%s7184_s5 + $0x90] sm:$0xff] }
 0x290   : > { %3260 = vmatpush1.bf16.msra.mxu1 %v3259_v40  ;;  %v3281_v40 = vpack.c.bf16 %v1371_v35, %v1339_v34  ;;  %v641_v35 = vld [vmem:[%s7184_s5 + $0x298] sm:$0xff]  ;;  %v3427_v37 = vpack.c.bf16 %v608_v31, %v576_v30  ;;  %v959_v30 = vld [vmem:[%s7184_s5 + $0xc88] sm:$0xff] }
 0x291   : > { %3324 = vmatpush1.bf16.msra.mxu0 %v3323_v41  ;;  %3262 = vmatprep.subr.bf16.mxu1 %v3261_v42  ;;  %v1338_v41 = vld [vmem:[%s7184_s5 + $0x1860] sm:$0xff]  ;;  %v3429_v45 = vpack.c.bf16 %v673_v36, %v641_v35  ;;  %v991_v31 = vld [vmem:[%s7184_s5 + $0xd88] sm:$0xff] }
 0x292   : > { %3326 = vmatprep.subr.bf16.mxu0 %v3325_v46  ;;  %v1370_v42 = vld [vmem:[%s7184_s5 + $0x1960] sm:$0xff]  ;;  %v1403_v46 = vld [vmem:[%s7184_s5 + $0x1a68] sm:$0xff]  ;;  %v3385_v36 = vpack.c.bf16 %v991_v31, %v959_v30  ;;  %v1248_v31 = vld [vmem:[%s7184_s5 + $0x1590] sm:$0xff] }
 0x293   : > { %v3283_v50 = vpack.c.bf16 %v1370_v42, %v1338_v41  ;;  %v672_v42 = vld [vmem:[%s7184_s5 + $0x390] sm:$0xff] }
 0x294   : > { %3264 = vmatpush1.bf16.msra.mxu1 %v3263_v52  ;;  %v3285_v52 = vpack.c.bf16 %v1435_v47, %v1403_v46  ;;  %v705_v46 = vld [vmem:[%s7184_s5 + $0x498] sm:$0xff] }
 0x295   : > { %3328 = vmatpush1.bf16.msra.mxu0 %v3327_v53  ;;  %3266 = vmatprep.subr.bf16.mxu1 %v3265_v54  ;;  %v1402_v53 = vld [vmem:[%s7184_s5 + $0x1a60] sm:$0xff]  ;;  %v737_v47 = vld [vmem:[%s7184_s5 + $0x598] sm:$0xff] }
 0x296   : > { %3330 = vmatprep.subr.bf16.mxu0 %v3329_v58  ;;  %v1434_v54 = vld [vmem:[%s7184_s5 + $0x1b60] sm:$0xff]  ;;  %v1467_v58 = vld [vmem:[%s7184_s5 + $0x1c68] sm:$0xff] }
 0x297   : > { %v3287_v62 = vpack.c.bf16 %v1434_v54, %v1402_v53  ;;  %v704_v53 = vld [vmem:[%s7184_s5 + $0x490] sm:$0xff]  ;;  %v3433_v54 = vpack.c.bf16 %v737_v47, %v705_v46 }
 0x298   : > { %3268 = vmatpush1.bf16.msra.mxu1 %v3267_v0  ;;  %v3289_v0 = vpack.c.bf16 %v1499_v59, %v1467_v58  ;;  %v769_v58 = vld [vmem:[%s7184_s5 + $0x698] sm:$0xff]  ;;  %v3435_v61 = vpack.c.bf16 %v736_v55, %v704_v53  ;;  %v1022_v53 = vld [vmem:[%s7184_s5 + $0xe80] sm:$0xff]  ;;  %v1024_v55 = vld [vmem:[%s7184_s5 + $0xe90] sm:$0xff] }
 0x299   : > { %3332 = vmatpush1.bf16.msra.mxu0 %v3331_v1  ;;  %3270 = vmatprep.subr.bf16.mxu1 %v3269_v2  ;;  %v1466_v1 = vld [vmem:[%s7184_s5 + $0x1c60] sm:$0xff]  ;;  %v801_v59 = vld [vmem:[%s7184_s5 + $0x798] sm:$0xff] }
 0x29a   : > { %3334 = vmatprep.subr.bf16.mxu0 %v3333_v6  ;;  %v1498_v2 = vld [vmem:[%s7184_s5 + $0x1d60] sm:$0xff]  ;;  %v1531_v6 = vld [vmem:[%s7184_s5 + $0x1e68] sm:$0xff] }
 0x29b   : > { %v3291_v10 = vpack.c.bf16 %v1498_v2, %v1466_v1  ;;  %v768_v1 = vld [vmem:[%s7184_s5 + $0x690] sm:$0xff]  ;;  %v3437_v2 = vpack.c.bf16 %v801_v59, %v769_v58  ;;  %v1087_v58 = vld [vmem:[%s7184_s5 + $0x1088] sm:$0xff] }
 0x29c   : > { %3272 = vmatpush1.bf16.msra.mxu1 %v3271_v12  ;;  %v3293_v12 = vpack.c.bf16 %v1563_v7, %v1531_v6  ;;  %v833_v6 = vld [vmem:[%s7184_s5 + $0x898] sm:$0xff]  ;;  %v3439_v9 = vpack.c.bf16 %v800_v3, %v768_v1  ;;  %v1119_v59 = vld [vmem:[%s7184_s5 + $0x1188] sm:$0xff]  ;;  %v1086_v1 = vld [vmem:[%s7184_s5 + $0x1080] sm:$0xff] }
 0x29d   : > { %3336 = vmatpush1.bf16.msra.mxu0 %v3335_v13  ;;  %3274 = vmatprep.subr.bf16.mxu1 %v3273_v14  ;;  %v1530_v13 = vld [vmem:[%s7184_s5 + $0x1e60] sm:$0xff]  ;;  %v865_v7 = vld [vmem:[%s7184_s5 + $0x998] sm:$0xff]  ;;  %v1088_v3 = vld [vmem:[%s7184_s5 + $0x1090] sm:$0xff] }
 0x29e   : > { %3338 = vmatprep.subr.bf16.mxu0 %v3337_v19  ;;  %v1562_v14 = vld [vmem:[%s7184_s5 + $0x1f60] sm:$0xff]  ;;  %v575_v19 = vld [vmem:[%s7184_s5 + $0x88] sm:$0xff] }
 0x29f   : > { %v3295_v24 = vpack.c.bf16 %v1562_v14, %v1530_v13  ;;  %v832_v13 = vld [vmem:[%s7184_s5 + $0x890] sm:$0xff]  ;;  %v3441_v14 = vpack.c.bf16 %v865_v7, %v833_v6  ;;  %v1151_v6 = vld [vmem:[%s7184_s5 + $0x1288] sm:$0xff] }
 0x2a0   : > { %3276 = vmatpush1.bf16.msra.mxu1 %v3275_v26  ;;  %v3361_v26 = vpack.c.bf16 %v607_v20, %v575_v19  ;;  %v897_v19 = vld [vmem:[%s7184_s5 + $0xa98] sm:$0xff]  ;;  %v3443_v23 = vpack.c.bf16 %v864_v15, %v832_v13  ;;  %v1183_v7 = vld [vmem:[%s7184_s5 + $0x1388] sm:$0xff]  ;;  %v1150_v13 = vld [vmem:[%s7184_s5 + $0x1280] sm:$0xff] }
 0x2a1   : > { %3340 = vmatpush1.bf16.msra.mxu0 %v3339_v27  ;;  %3278 = vmatprep.subr.bf16.mxu1 %v3277_v28  ;;  %v574_v27 = vld [vmem:[%s7184_s5 + $0x80] sm:$0xff]  ;;  %v929_v20 = vld [vmem:[%s7184_s5 + $0xb98] sm:$0xff]  ;;  %v1152_v15 = vld [vmem:[%s7184_s5 + $0x1290] sm:$0xff] }
 0x2a2   : > { %3342 = vmatprep.subr.bf16.mxu0 %v3341_v32  ;;  %v606_v28 = vld [vmem:[%s7184_s5 + $0x180] sm:$0xff]  ;;  %v639_v32 = vld [vmem:[%s7184_s5 + $0x288] sm:$0xff] }
 0x2a3   : > { %v3363_v34 = vpack.c.bf16 %v606_v28, %v574_v27  ;;  %v3365_v41 = vpack.c.bf16 %v671_v33, %v639_v32  ;;  %v896_v27 = vld [vmem:[%s7184_s5 + $0xa90] sm:$0xff]  ;;  %v3445_v28 = vpack.c.bf16 %v929_v20, %v897_v19  ;;  %v961_v32 = vld [vmem:[%s7184_s5 + $0xc98] sm:$0xff]  ;;  %v1215_v19 = vld [vmem:[%s7184_s5 + $0x1488] sm:$0xff] }
 0x2a4   : > { %3280 = vmatpush1.bf16.msra.mxu1 %v3279_v38  ;;  %v638_v38 = vld [vmem:[%s7184_s5 + $0x280] sm:$0xff]  ;;  %v993_v33 = vld [vmem:[%s7184_s5 + $0xd98] sm:$0xff]  ;;  %v1247_v20 = vld [vmem:[%s7184_s5 + $0x1588] sm:$0xff] }
 0x2a5   : > { %3344 = vmatpush1.bf16.msra.mxu0 %v3343_v39  ;;  %3282 = vmatprep.subr.bf16.mxu1 %v3281_v40  ;;  %v670_v39 = vld [vmem:[%s7184_s5 + $0x380] sm:$0xff]  ;;  %v640_v40 = vld [vmem:[%s7184_s5 + $0x290] sm:$0xff] }
 0x2a6   : > { %3346 = vmatprep.subr.bf16.mxu0 %v3345_v44  ;;  %v735_v44 = vld [vmem:[%s7184_s5 + $0x588] sm:$0xff]  ;;  %v3367_v48 = vpack.c.bf16 %v670_v39, %v638_v38  ;;  %v3431_v49 = vpack.c.bf16 %v672_v42, %v640_v40  ;;  %v990_v38 = vld [vmem:[%s7184_s5 + $0xd80] sm:$0xff]  ;;  %v960_v39 = vld [vmem:[%s7184_s5 + $0xc90] sm:$0xff]  ;;  %v3449_v42 = vpack.c.bf16 %v993_v33, %v961_v32 }
 0x2a7   : > { %v1279_v32 = vld [vmem:[%s7184_s5 + $0x1688] sm:$0xff] }
 0x2a8   : > { %3284 = vmatpush1.bf16.msra.mxu1 %v3283_v50  ;;  %v3369_v50 = vpack.c.bf16 %v735_v44, %v703_v43  ;;  %v992_v43 = vld [vmem:[%s7184_s5 + $0xd90] sm:$0xff]  ;;  %v1023_v44 = vld [vmem:[%s7184_s5 + $0xe88] sm:$0xff] }
 0x2a9   : > { %3348 = vmatpush1.bf16.msra.mxu0 %v3347_v51  ;;  %3286 = vmatprep.subr.bf16.mxu1 %v3285_v52  ;;  %v702_v51 = vld [vmem:[%s7184_s5 + $0x480] sm:$0xff]  ;;  %v1311_v33 = vld [vmem:[%s7184_s5 + $0x1788] sm:$0xff] }
 0x2aa   : > { %3350 = vmatprep.subr.bf16.mxu0 %v3349_v56  ;;  %v734_v52 = vld [vmem:[%s7184_s5 + $0x580] sm:$0xff]  ;;  %v767_v56 = vld [vmem:[%s7184_s5 + $0x688] sm:$0xff] }
 0x2ab   : > { %v3371_v60 = vpack.c.bf16 %v734_v52, %v702_v51  ;;  %v3451_v51 = vpack.c.bf16 %v992_v43, %v960_v39  ;;  %v1278_v39 = vld [vmem:[%s7184_s5 + $0x1680] sm:$0xff]  ;;  %v1312_v43 = vld [vmem:[%s7184_s5 + $0x1790] sm:$0xff] }
 0x2ac   : > { %3288 = vmatpush1.bf16.msra.mxu1 %v3287_v62  ;;  %v3373_v62 = vpack.c.bf16 %v799_v57, %v767_v56  ;;  %v1056_v57 = vld [vmem:[%s7184_s5 + $0xf90] sm:$0xff] }
 0x2ad   : > { %3352 = vmatpush1.bf16.msra.mxu0 %v3351_v63  ;;  %3290 = vmatprep.subr.bf16.mxu1 %v3289_v0  ;;  %v766_v63 = vld [vmem:[%s7184_s5 + $0x680] sm:$0xff] }
 0x2ae   : > { %3354 = vmatprep.subr.bf16.mxu0 %v3353_v4  ;;  %v798_v0 = vld [vmem:[%s7184_s5 + $0x780] sm:$0xff]  ;;  %v831_v4 = vld [vmem:[%s7184_s5 + $0x888] sm:$0xff] }
 0x2af   : > { %v3375_v8 = vpack.c.bf16 %v798_v0, %v766_v63  ;;  %v3455_v63 = vpack.c.bf16 %v1056_v57, %v1024_v55  ;;  %v3393_v0 = vpack.c.bf16 %v1119_v59, %v1087_v58  ;;  %v1376_v55 = vld [vmem:[%s7184_s5 + $0x1990] sm:$0xff]  ;;  %v1439_v57 = vld [vmem:[%s7184_s5 + $0x1b88] sm:$0xff]  ;;  %v1409_v58 = vld [vmem:[%s7184_s5 + $0x1a98] sm:$0xff] }
 0x2b0   : > { %3292 = vmatpush1.bf16.msra.mxu1 %v3291_v10  ;;  %v3377_v10 = vpack.c.bf16 %v863_v5, %v831_v4  ;;  %v1120_v5 = vld [vmem:[%s7184_s5 + $0x1190] sm:$0xff]  ;;  %v1441_v59 = vld [vmem:[%s7184_s5 + $0x1b98] sm:$0xff] }
 0x2b1   : > { %3356 = vmatpush1.bf16.msra.mxu0 %v3355_v11  ;;  %3294 = vmatprep.subr.bf16.mxu1 %v3293_v12  ;;  %v830_v11 = vld [vmem:[%s7184_s5 + $0x880] sm:$0xff] }
 0x2b2   : > { %3358 = vmatprep.subr.bf16.mxu0 %v3357_v17  ;;  %v862_v12 = vld [vmem:[%s7184_s5 + $0x980] sm:$0xff]  ;;  %v895_v17 = vld [vmem:[%s7184_s5 + $0xa88] sm:$0xff] }
 0x2b3   : > { %v3379_v22 = vpack.c.bf16 %v862_v12, %v830_v11  ;;  %v3459_v11 = vpack.c.bf16 %v1120_v5, %v1088_v3  ;;  %v3397_v12 = vpack.c.bf16 %v1183_v7, %v1151_v6  ;;  %v1440_v3 = vld [vmem:[%s7184_s5 + $0x1b90] sm:$0xff]  ;;  %v1503_v5 = vld [vmem:[%s7184_s5 + $0x1d88] sm:$0xff]  ;;  %v1473_v6 = vld [vmem:[%s7184_s5 + $0x1c98] sm:$0xff] }
 0x2b4   : > { %3296 = vmatpush1.bf16.msra.mxu1 %v3295_v24  ;;  %v3381_v24 = vpack.c.bf16 %v927_v18, %v895_v17  ;;  %v1184_v18 = vld [vmem:[%s7184_s5 + $0x1390] sm:$0xff]  ;;  %v1505_v7 = vld [vmem:[%s7184_s5 + $0x1d98] sm:$0xff] }
 0x2b5   : > { %3360 = vmatpush1.bf16.msra.mxu0 %v3359_v25  ;;  %3362 = vmatprep.subr.bf16.mxu1 %v3361_v26  ;;  %v894_v25 = vld [vmem:[%s7184_s5 + $0xa80] sm:$0xff] }
 0x2b6   : > { %3426 = vmatprep.subr.bf16.mxu0 %v3425_v29  ;;  %v926_v26 = vld [vmem:[%s7184_s5 + $0xb80] sm:$0xff]  ;;  %v928_v29 = vld [vmem:[%s7184_s5 + $0xb90] sm:$0xff] }
 0x2b7   : > { %2073 = vmatmul.mubr.f32.vlgmr.msra.gmra.mrb[8].mxu1 %v4458_v21  ;;  %v3447_v35 = vpack.c.bf16 %v928_v29, %v896_v27  ;;  %v1214_v27 = vld [vmem:[%s7184_s5 + $0x1480] sm:$0xff]  ;;  %v1216_v29 = vld [vmem:[%s7184_s5 + $0x1490] sm:$0xff] }
 0x2b8   : > { %2144 = vmatmul.mubr.f32.vlgmr.msra.gmra.mrb[14].mxu0 %v4458_v21  ;;  %3364 = vmatpush1.bf16.msra.mxu1 %v3363_v34  ;;  %v3383_v34 = vpack.c.bf16 %v926_v26, %v894_v25  ;;  %v3463_v25 = vpack.c.bf16 %v1184_v18, %v1152_v15  ;;  %v3401_v26 = vpack.c.bf16 %v1247_v20, %v1215_v19  ;;  %v1504_v15 = vld [vmem:[%s7184_s5 + $0x1d90] sm:$0xff]  ;;  %v1567_v18 = vld [vmem:[%s7184_s5 + $0x1f88] sm:$0xff]  ;;  %v1537_v19 = vld [vmem:[%s7184_s5 + $0x1e98] sm:$0xff] }
 0x2b9   : > { %2214 = vmatprep.mubr.f32.mxu1 %v4450_v16  ;;  %3428 = vmatpush1.bf16.msra.mxu0 %v3427_v37  ;;  %v958_v37 = vld [vmem:[%s7184_s5 + $0xc80] sm:$0xff]  ;;  %v1569_v20 = vld [vmem:[%s7184_s5 + $0x1f98] sm:$0xff] }
 0x2ba   : > { %2285 = vmatprep.mubr.f32.mxu0 %v4450_v16  ;;  %3366 = vmatprep.subr.bf16.mxu1 %v3365_v41 }
 0x2bb   : > { %3430 = vmatprep.subr.bf16.mxu0 %v3429_v45  ;;  %v1055_v45 = vld [vmem:[%s7184_s5 + $0xf88] sm:$0xff] }
 0x2bc   : > { %3368 = vmatpush1.bf16.msra.mxu1 %v3367_v48  ;;  %v1025_v48 = vld [vmem:[%s7184_s5 + $0xe98] sm:$0xff]  ;;  %v3389_v52 = vpack.c.bf16 %v1055_v45, %v1023_v44  ;;  %v1343_v44 = vld [vmem:[%s7184_s5 + $0x1888] sm:$0xff] }
 0x2bd   : > { %3432 = vmatpush1.bf16.msra.mxu0 %v3431_v49  ;;  %3370 = vmatprep.subr.bf16.mxu1 %v3369_v50  ;;  %v1057_v49 = vld [vmem:[%s7184_s5 + $0xf98] sm:$0xff]  ;;  %v3387_v50 = vpack.c.bf16 %v990_v38, %v958_v37  ;;  %v3467_v37 = vpack.c.bf16 %v1248_v31, %v1216_v29  ;;  %v3405_v38 = vpack.c.bf16 %v1311_v33, %v1279_v32  ;;  %v1375_v45 = vld [vmem:[%s7184_s5 + $0x1988] sm:$0xff]  ;;  %v1568_v29 = vld [vmem:[%s7184_s5 + $0x1f90] sm:$0xff] }
 0x2be   : > { %3434 = vmatprep.subr.bf16.mxu0 %v3433_v54  ;;  %v1054_v54 = vld [vmem:[%s7184_s5 + $0xf80] sm:$0xff]  ;;  %v3453_v56 = vpack.c.bf16 %v1057_v49, %v1025_v48  ;;  %v611_v31 = vld [vmem:[%s7184_s5 + $0x1a8] sm:$0xff]  ;;  %v581_v32 = vld [vmem:[%s7184_s5 + $0xb8] sm:$0xff] }
 0x2bf   : > { %v613_v33 = vld [vmem:[%s7184_s5 + $0x1b8] sm:$0xff] }
 0x2c0   : > { %3372 = vmatpush1.bf16.msra.mxu1 %v3371_v60  ;;  %v1089_v60 = vld [vmem:[%s7184_s5 + $0x1098] sm:$0xff] }
 0x2c1   : > { %3436 = vmatpush1.bf16.msra.mxu0 %v3435_v61  ;;  %3374 = vmatprep.subr.bf16.mxu1 %v3373_v62  ;;  %v1121_v61 = vld [vmem:[%s7184_s5 + $0x1198] sm:$0xff]  ;;  %v3391_v62 = vpack.c.bf16 %v1054_v54, %v1022_v53  ;;  %v1344_v53 = vld [vmem:[%s7184_s5 + $0x1890] sm:$0xff] }
 0x2c2   : > { %3438 = vmatprep.subr.bf16.mxu0 %v3437_v2  ;;  %v1118_v2 = vld [vmem:[%s7184_s5 + $0x1180] sm:$0xff]  ;;  %v3457_v4 = vpack.c.bf16 %v1121_v61, %v1089_v60  ;;  %v3475_v61 = vpack.c.bf16 %v1376_v55, %v1344_v53  ;;  %v707_v53 = vld [vmem:[%s7184_s5 + $0x4a8] sm:$0xff] }
 0x2c4   : > { %3376 = vmatpush1.bf16.msra.mxu1 %v3375_v8  ;;  %v1153_v8 = vld [vmem:[%s7184_s5 + $0x1298] sm:$0xff] }
 0x2c5   : > { %3440 = vmatpush1.bf16.msra.mxu0 %v3439_v9  ;;  %3378 = vmatprep.subr.bf16.mxu1 %v3377_v10  ;;  %v1185_v9 = vld [vmem:[%s7184_s5 + $0x1398] sm:$0xff]  ;;  %v3395_v10 = vpack.c.bf16 %v1118_v2, %v1086_v1  ;;  %v1408_v1 = vld [vmem:[%s7184_s5 + $0x1a90] sm:$0xff]  ;;  %v3477_v2 = vpack.c.bf16 %v1441_v59, %v1409_v58 }
 0x2c6   : > { %3442 = vmatprep.subr.bf16.mxu0 %v3441_v14  ;;  %v1182_v14 = vld [vmem:[%s7184_s5 + $0x1380] sm:$0xff]  ;;  %v3461_v17 = vpack.c.bf16 %v1185_v9, %v1153_v8  ;;  %v3479_v9 = vpack.c.bf16 %v1440_v3, %v1408_v1  ;;  %v740_v1 = vld [vmem:[%s7184_s5 + $0x5b0] sm:$0xff]  ;;  %v803_v3 = vld [vmem:[%s7184_s5 + $0x7a8] sm:$0xff] }
 0x2c8   : > { %3380 = vmatpush1.bf16.msra.mxu1 %v3379_v22  ;;  %v1217_v22 = vld [vmem:[%s7184_s5 + $0x1498] sm:$0xff] }
 0x2c9   : > { %3444 = vmatpush1.bf16.msra.mxu0 %v3443_v23  ;;  %3382 = vmatprep.subr.bf16.mxu1 %v3381_v24  ;;  %v1249_v23 = vld [vmem:[%s7184_s5 + $0x1598] sm:$0xff]  ;;  %v3399_v24 = vpack.c.bf16 %v1182_v14, %v1150_v13  ;;  %v1472_v13 = vld [vmem:[%s7184_s5 + $0x1c90] sm:$0xff]  ;;  %v3481_v14 = vpack.c.bf16 %v1505_v7, %v1473_v6 }
 0x2ca   : > { %v1648_v40 = vpop.f32.mrb[2].mxu1  ;;  %v1719_v41 = vpop.f32.mrb[8].mxu0  ;;  %3446 = vmatprep.subr.bf16.mxu0 %v3445_v28  ;;  %v1246_v28 = vld [vmem:[%s7184_s5 + $0x1580] sm:$0xff]  ;;  %v3465_v30 = vpack.c.bf16 %v1249_v23, %v1217_v22  ;;  %v3483_v23 = vpack.c.bf16 %v1504_v15, %v1472_v13  ;;  %v804_v13 = vld [vmem:[%s7184_s5 + $0x7b0] sm:$0xff]  ;;  %v867_v15 = vld [vmem:[%s7184_s5 + $0x9a8] sm:$0xff] }
 0x2cb   : > { %2718 = vst [vmem:[%s5748_s9] sm:$0x1f] %v1648_v40  ;;  %2720 = vst [vmem:[%s5748_s9 + $0x10] sm:$0x1f] %v1719_v41  ;;  %v1650_v46 = vpop.f32.mrb[3].mxu1  ;;  %v1721_v47 = vpop.f32.mrb[9].mxu0  ;;  %v1310_v40 = vld [vmem:[%s7184_s5 + $0x1780] sm:$0xff] }
 0x2cc   : > { %2719 = vst [vmem:[%s5748_s9 + $0x8] sm:$0x1f] %v1650_v46  ;;  %2721 = vst [vmem:[%s5748_s9 + $0x18] sm:$0x1f] %v1721_v47  ;;  %3384 = vmatpush1.bf16.msra.mxu1 %v3383_v34  ;;  %v1281_v34 = vld [vmem:[%s7184_s5 + $0x1698] sm:$0xff]  ;;  %v1280_v41 = vld [vmem:[%s7184_s5 + $0x1690] sm:$0xff]  ;;  %v3407_v48 = vpack.c.bf16 %v1310_v40, %v1278_v39  ;;  %v3553_v39 = vpack.c.bf16 %v613_v33, %v581_v32 }
 0x2cd   : > { %3448 = vmatpush1.bf16.msra.mxu0 %v3447_v35  ;;  %3386 = vmatprep.subr.bf16.mxu1 %v3385_v36  ;;  %v1313_v35 = vld [vmem:[%s7184_s5 + $0x1798] sm:$0xff]  ;;  %v3403_v36 = vpack.c.bf16 %v1246_v28, %v1214_v27  ;;  %v3471_v49 = vpack.c.bf16 %v1312_v43, %v1280_v41  ;;  %v1536_v27 = vld [vmem:[%s7184_s5 + $0x1e90] sm:$0xff]  ;;  %v3485_v28 = vpack.c.bf16 %v1569_v20, %v1537_v19  ;;  %v675_v43 = vld [vmem:[%s7184_s5 + $0x3a8] sm:$0xff] }
 0x2ce   : > { %3450 = vmatprep.subr.bf16.mxu0 %v3449_v42  ;;  %v3469_v42 = vpack.c.bf16 %v1313_v35, %v1281_v34  ;;  %v1345_v46 = vld [vmem:[%s7184_s5 + $0x1898] sm:$0xff]  ;;  %v3487_v35 = vpack.c.bf16 %v1568_v29, %v1536_v27  ;;  %v580_v40 = vld [vmem:[%s7184_s5 + $0xb0] sm:$0xff]  ;;  %v931_v29 = vld [vmem:[%s7184_s5 + $0xba8] sm:$0xff] }
 0x2cf   : > { %v1377_v47 = vld [vmem:[%s7184_s5 + $0x1998] sm:$0xff]  ;;  %v612_v41 = vld [vmem:[%s7184_s5 + $0x1b0] sm:$0xff] }
 0x2d0   : > { %3388 = vmatpush1.bf16.msra.mxu1 %v3387_v50  ;;  %v3409_v50 = vpack.c.bf16 %v1375_v45, %v1343_v44  ;;  %v3473_v54 = vpack.c.bf16 %v1377_v47, %v1345_v46  ;;  %v645_v45 = vld [vmem:[%s7184_s5 + $0x2b8] sm:$0xff]  ;;  %v3555_v47 = vpack.c.bf16 %v612_v41, %v580_v40  ;;  %v868_v27 = vld [vmem:[%s7184_s5 + $0x9b0] sm:$0xff]  ;;  %v963_v40 = vld [vmem:[%s7184_s5 + $0xca8] sm:$0xff] }
 0x2d1   : > { %3452 = vmatpush1.bf16.msra.mxu0 %v3451_v51  ;;  %3390 = vmatprep.subr.bf16.mxu1 %v3389_v52  ;;  %v1342_v51 = vld [vmem:[%s7184_s5 + $0x1880] sm:$0xff]  ;;  %v677_v46 = vld [vmem:[%s7184_s5 + $0x3b8] sm:$0xff]  ;;  %v995_v41 = vld [vmem:[%s7184_s5 + $0xda8] sm:$0xff] }
 0x2d2   : > { %3454 = vmatprep.subr.bf16.mxu0 %v3453_v56  ;;  %v1374_v52 = vld [vmem:[%s7184_s5 + $0x1980] sm:$0xff]  ;;  %v1407_v56 = vld [vmem:[%s7184_s5 + $0x1a88] sm:$0xff]  ;;  %v3557_v55 = vpack.c.bf16 %v677_v46, %v645_v45  ;;  %v3513_v46 = vpack.c.bf16 %v995_v41, %v963_v40  ;;  %v1252_v41 = vld [vmem:[%s7184_s5 + $0x15b0] sm:$0xff] }
 0x2d3   : > { %v3411_v60 = vpack.c.bf16 %v1374_v52, %v1342_v51  ;;  %v676_v52 = vld [vmem:[%s7184_s5 + $0x3b0] sm:$0xff] }
 0x2d4   : > { %3392 = vmatpush1.bf16.msra.mxu1 %v3391_v62  ;;  %v3413_v62 = vpack.c.bf16 %v1439_v57, %v1407_v56  ;;  %v709_v56 = vld [vmem:[%s7184_s5 + $0x4b8] sm:$0xff] }
 0x2d5   : > { %3456 = vmatpush1.bf16.msra.mxu0 %v3455_v63  ;;  %3394 = vmatprep.subr.bf16.mxu1 %v3393_v0  ;;  %v1406_v63 = vld [vmem:[%s7184_s5 + $0x1a80] sm:$0xff]  ;;  %v741_v57 = vld [vmem:[%s7184_s5 + $0x5b8] sm:$0xff] }
 0x2d6   : > { %3458 = vmatprep.subr.bf16.mxu0 %v3457_v4  ;;  %v1438_v0 = vld [vmem:[%s7184_s5 + $0x1b80] sm:$0xff]  ;;  %v1471_v4 = vld [vmem:[%s7184_s5 + $0x1c88] sm:$0xff] }
 0x2d7   : > { %v3415_v8 = vpack.c.bf16 %v1438_v0, %v1406_v63  ;;  %v708_v63 = vld [vmem:[%s7184_s5 + $0x4b0] sm:$0xff]  ;;  %v3561_v0 = vpack.c.bf16 %v741_v57, %v709_v56 }
 0x2d8   : > { %3396 = vmatpush1.bf16.msra.mxu1 %v3395_v10  ;;  %v3417_v10 = vpack.c.bf16 %v1503_v5, %v1471_v4  ;;  %v773_v4 = vld [vmem:[%s7184_s5 + $0x6b8] sm:$0xff]  ;;  %v3563_v7 = vpack.c.bf16 %v740_v1, %v708_v63  ;;  %v1026_v63 = vld [vmem:[%s7184_s5 + $0xea0] sm:$0xff]  ;;  %v1028_v1 = vld [vmem:[%s7184_s5 + $0xeb0] sm:$0xff] }
 0x2d9   : > { %3460 = vmatpush1.bf16.msra.mxu0 %v3459_v11  ;;  %3398 = vmatprep.subr.bf16.mxu1 %v3397_v12  ;;  %v1470_v11 = vld [vmem:[%s7184_s5 + $0x1c80] sm:$0xff]  ;;  %v805_v5 = vld [vmem:[%s7184_s5 + $0x7b8] sm:$0xff] }
 0x2da   : > { %3462 = vmatprep.subr.bf16.mxu0 %v3461_v17  ;;  %v1502_v12 = vld [vmem:[%s7184_s5 + $0x1d80] sm:$0xff]  ;;  %v1535_v17 = vld [vmem:[%s7184_s5 + $0x1e88] sm:$0xff] }
 0x2db   : > { %v3419_v22 = vpack.c.bf16 %v1502_v12, %v1470_v11  ;;  %v772_v11 = vld [vmem:[%s7184_s5 + $0x6b0] sm:$0xff]  ;;  %v3565_v12 = vpack.c.bf16 %v805_v5, %v773_v4  ;;  %v1091_v4 = vld [vmem:[%s7184_s5 + $0x10a8] sm:$0xff] }
 0x2dc   : > { %3400 = vmatpush1.bf16.msra.mxu1 %v3399_v24  ;;  %v3421_v24 = vpack.c.bf16 %v1567_v18, %v1535_v17  ;;  %v837_v17 = vld [vmem:[%s7184_s5 + $0x8b8] sm:$0xff]  ;;  %v3567_v20 = vpack.c.bf16 %v804_v13, %v772_v11  ;;  %v1123_v5 = vld [vmem:[%s7184_s5 + $0x11a8] sm:$0xff]  ;;  %v1090_v11 = vld [vmem:[%s7184_s5 + $0x10a0] sm:$0xff] }
 0x2dd   : > { %3464 = vmatpush1.bf16.msra.mxu0 %v3463_v25  ;;  %3402 = vmatprep.subr.bf16.mxu1 %v3401_v26  ;;  %v1534_v25 = vld [vmem:[%s7184_s5 + $0x1e80] sm:$0xff]  ;;  %v869_v18 = vld [vmem:[%s7184_s5 + $0x9b8] sm:$0xff]  ;;  %v1092_v13 = vld [vmem:[%s7184_s5 + $0x10b0] sm:$0xff] }
 0x2de   : > { %3466 = vmatprep.subr.bf16.mxu0 %v3465_v30  ;;  %v1566_v26 = vld [vmem:[%s7184_s5 + $0x1f80] sm:$0xff]  ;;  %v579_v30 = vld [vmem:[%s7184_s5 + $0xa8] sm:$0xff] }
 0x2df   : > { %v3423_v34 = vpack.c.bf16 %v1566_v26, %v1534_v25  ;;  %v836_v25 = vld [vmem:[%s7184_s5 + $0x8b0] sm:$0xff]  ;;  %v3569_v26 = vpack.c.bf16 %v869_v18, %v837_v17  ;;  %v1155_v17 = vld [vmem:[%s7184_s5 + $0x12a8] sm:$0xff] }
 0x2e0   : > { %3404 = vmatpush1.bf16.msra.mxu1 %v3403_v36  ;;  %v3489_v36 = vpack.c.bf16 %v611_v31, %v579_v30  ;;  %v901_v30 = vld [vmem:[%s7184_s5 + $0xab8] sm:$0xff]  ;;  %v3571_v33 = vpack.c.bf16 %v868_v27, %v836_v25  ;;  %v1187_v18 = vld [vmem:[%s7184_s5 + $0x13a8] sm:$0xff]  ;;  %v1154_v25 = vld [vmem:[%s7184_s5 + $0x12a0] sm:$0xff] }
 0x2e1   : > { %3468 = vmatpush1.bf16.msra.mxu0 %v3467_v37  ;;  %3406 = vmatprep.subr.bf16.mxu1 %v3405_v38  ;;  %v578_v37 = vld [vmem:[%s7184_s5 + $0xa0] sm:$0xff]  ;;  %v933_v31 = vld [vmem:[%s7184_s5 + $0xbb8] sm:$0xff]  ;;  %v1156_v27 = vld [vmem:[%s7184_s5 + $0x12b0] sm:$0xff] }
 0x2e2   : > { %3470 = vmatprep.subr.bf16.mxu0 %v3469_v42  ;;  %v610_v38 = vld [vmem:[%s7184_s5 + $0x1a0] sm:$0xff]  ;;  %v643_v42 = vld [vmem:[%s7184_s5 + $0x2a8] sm:$0xff] }
 0x2e3   : > { %v3491_v44 = vpack.c.bf16 %v610_v38, %v578_v37  ;;  %v3493_v51 = vpack.c.bf16 %v675_v43, %v643_v42  ;;  %v900_v37 = vld [vmem:[%s7184_s5 + $0xab0] sm:$0xff]  ;;  %v3573_v38 = vpack.c.bf16 %v933_v31, %v901_v30  ;;  %v965_v42 = vld [vmem:[%s7184_s5 + $0xcb8] sm:$0xff]  ;;  %v1219_v30 = vld [vmem:[%s7184_s5 + $0x14a8] sm:$0xff] }
 0x2e4   : > { %3408 = vmatpush1.bf16.msra.mxu1 %v3407_v48  ;;  %v642_v48 = vld [vmem:[%s7184_s5 + $0x2a0] sm:$0xff]  ;;  %v997_v43 = vld [vmem:[%s7184_s5 + $0xdb8] sm:$0xff]  ;;  %v1251_v31 = vld [vmem:[%s7184_s5 + $0x15a8] sm:$0xff] }
 0x2e5   : > { %3472 = vmatpush1.bf16.msra.mxu0 %v3471_v49  ;;  %3410 = vmatprep.subr.bf16.mxu1 %v3409_v50  ;;  %v674_v49 = vld [vmem:[%s7184_s5 + $0x3a0] sm:$0xff]  ;;  %v644_v50 = vld [vmem:[%s7184_s5 + $0x2b0] sm:$0xff] }
 0x2e6   : > { %3474 = vmatprep.subr.bf16.mxu0 %v3473_v54  ;;  %v739_v54 = vld [vmem:[%s7184_s5 + $0x5a8] sm:$0xff]  ;;  %v3495_v58 = vpack.c.bf16 %v674_v49, %v642_v48  ;;  %v3559_v59 = vpack.c.bf16 %v676_v52, %v644_v50  ;;  %v994_v48 = vld [vmem:[%s7184_s5 + $0xda0] sm:$0xff]  ;;  %v964_v49 = vld [vmem:[%s7184_s5 + $0xcb0] sm:$0xff]  ;;  %v3577_v52 = vpack.c.bf16 %v997_v43, %v965_v42 }
 0x2e7   : > { %v1283_v42 = vld [vmem:[%s7184_s5 + $0x16a8] sm:$0xff] }
 0x2e8   : > { %3412 = vmatpush1.bf16.msra.mxu1 %v3411_v60  ;;  %v3497_v60 = vpack.c.bf16 %v739_v54, %v707_v53  ;;  %v996_v53 = vld [vmem:[%s7184_s5 + $0xdb0] sm:$0xff]  ;;  %v1027_v54 = vld [vmem:[%s7184_s5 + $0xea8] sm:$0xff] }
 0x2e9   : > { %3476 = vmatpush1.bf16.msra.mxu0 %v3475_v61  ;;  %3414 = vmatprep.subr.bf16.mxu1 %v3413_v62  ;;  %v706_v61 = vld [vmem:[%s7184_s5 + $0x4a0] sm:$0xff]  ;;  %v1315_v43 = vld [vmem:[%s7184_s5 + $0x17a8] sm:$0xff] }
 0x2ea   : > { %3478 = vmatprep.subr.bf16.mxu0 %v3477_v2  ;;  %v738_v62 = vld [vmem:[%s7184_s5 + $0x5a0] sm:$0xff]  ;;  %v771_v2 = vld [vmem:[%s7184_s5 + $0x6a8] sm:$0xff] }
 0x2eb   : > { %v3499_v6 = vpack.c.bf16 %v738_v62, %v706_v61  ;;  %v3579_v61 = vpack.c.bf16 %v996_v53, %v964_v49  ;;  %v1282_v49 = vld [vmem:[%s7184_s5 + $0x16a0] sm:$0xff]  ;;  %v1316_v53 = vld [vmem:[%s7184_s5 + $0x17b0] sm:$0xff] }
 0x2ec   : > { %3416 = vmatpush1.bf16.msra.mxu1 %v3415_v8  ;;  %v3501_v8 = vpack.c.bf16 %v803_v3, %v771_v2  ;;  %v1060_v3 = vld [vmem:[%s7184_s5 + $0xfb0] sm:$0xff] }
 0x2ed   : > { %3480 = vmatpush1.bf16.msra.mxu0 %v3479_v9  ;;  %3418 = vmatprep.subr.bf16.mxu1 %v3417_v10  ;;  %v770_v9 = vld [vmem:[%s7184_s5 + $0x6a0] sm:$0xff] }
 0x2ee   : > { %3482 = vmatprep.subr.bf16.mxu0 %v3481_v14  ;;  %v802_v10 = vld [vmem:[%s7184_s5 + $0x7a0] sm:$0xff]  ;;  %v835_v14 = vld [vmem:[%s7184_s5 + $0x8a8] sm:$0xff] }
 0x2ef   : > { %v3503_v19 = vpack.c.bf16 %v802_v10, %v770_v9  ;;  %v3583_v9 = vpack.c.bf16 %v1060_v3, %v1028_v1  ;;  %v3521_v10 = vpack.c.bf16 %v1123_v5, %v1091_v4  ;;  %v1380_v1 = vld [vmem:[%s7184_s5 + $0x19b0] sm:$0xff]  ;;  %v1443_v3 = vld [vmem:[%s7184_s5 + $0x1ba8] sm:$0xff]  ;;  %v1413_v4 = vld [vmem:[%s7184_s5 + $0x1ab8] sm:$0xff] }
 0x2f0   : > { %3420 = vmatpush1.bf16.msra.mxu1 %v3419_v22  ;;  %v3505_v22 = vpack.c.bf16 %v867_v15, %v835_v14  ;;  %v1124_v15 = vld [vmem:[%s7184_s5 + $0x11b0] sm:$0xff]  ;;  %v1445_v5 = vld [vmem:[%s7184_s5 + $0x1bb8] sm:$0xff] }
 0x2f1   : > { %3484 = vmatpush1.bf16.msra.mxu0 %v3483_v23  ;;  %3422 = vmatprep.subr.bf16.mxu1 %v3421_v24  ;;  %v834_v23 = vld [vmem:[%s7184_s5 + $0x8a0] sm:$0xff] }
 0x2f2   : > { %3486 = vmatprep.subr.bf16.mxu0 %v3485_v28  ;;  %v866_v24 = vld [vmem:[%s7184_s5 + $0x9a0] sm:$0xff]  ;;  %v899_v28 = vld [vmem:[%s7184_s5 + $0xaa8] sm:$0xff] }
 0x2f3   : > { %v3507_v32 = vpack.c.bf16 %v866_v24, %v834_v23  ;;  %v3587_v23 = vpack.c.bf16 %v1124_v15, %v1092_v13  ;;  %v3525_v24 = vpack.c.bf16 %v1187_v18, %v1155_v17  ;;  %v1444_v13 = vld [vmem:[%s7184_s5 + $0x1bb0] sm:$0xff]  ;;  %v1507_v15 = vld [vmem:[%s7184_s5 + $0x1da8] sm:$0xff]  ;;  %v1477_v17 = vld [vmem:[%s7184_s5 + $0x1cb8] sm:$0xff] }
 0x2f4   : > { %3424 = vmatpush1.bf16.msra.mxu1 %v3423_v34  ;;  %v3509_v34 = vpack.c.bf16 %v931_v29, %v899_v28  ;;  %v1188_v29 = vld [vmem:[%s7184_s5 + $0x13b0] sm:$0xff]  ;;  %v1509_v18 = vld [vmem:[%s7184_s5 + $0x1db8] sm:$0xff] }
 0x2f5   : > { %3488 = vmatpush1.bf16.msra.mxu0 %v3487_v35  ;;  %3490 = vmatprep.subr.bf16.mxu1 %v3489_v36  ;;  %v898_v35 = vld [vmem:[%s7184_s5 + $0xaa0] sm:$0xff] }
 0x2f6   : > { %3554 = vmatprep.subr.bf16.mxu0 %v3553_v39  ;;  %v930_v36 = vld [vmem:[%s7184_s5 + $0xba0] sm:$0xff]  ;;  %v932_v39 = vld [vmem:[%s7184_s5 + $0xbb0] sm:$0xff] }
 0x2f7   : > { %2215 = vmatmul.mubr.f32.vlgmr.msra.gmra.mrb[10].mxu1 %v4458_v21  ;;  %v3575_v45 = vpack.c.bf16 %v932_v39, %v900_v37  ;;  %v1218_v37 = vld [vmem:[%s7184_s5 + $0x14a0] sm:$0xff]  ;;  %v1220_v39 = vld [vmem:[%s7184_s5 + $0x14b0] sm:$0xff] }
 0x2f8   : > { %2286 = vmatmul.mubr.f32.vlgmr.msra.gmra.mrb[16].mxu0 %v4458_v21  ;;  %3492 = vmatpush1.bf16.msra.mxu1 %v3491_v44  ;;  %v3511_v44 = vpack.c.bf16 %v930_v36, %v898_v35  ;;  %v3591_v35 = vpack.c.bf16 %v1188_v29, %v1156_v27  ;;  %v3529_v36 = vpack.c.bf16 %v1251_v31, %v1219_v30  ;;  %v1508_v27 = vld [vmem:[%s7184_s5 + $0x1db0] sm:$0xff]  ;;  %v1571_v29 = vld [vmem:[%s7184_s5 + $0x1fa8] sm:$0xff]  ;;  %v1541_v30 = vld [vmem:[%s7184_s5 + $0x1eb8] sm:$0xff] }
 0x2f9   : > { %2356 = vmatprep.mubr.f32.mxu1 %v4450_v16  ;;  %3556 = vmatpush1.bf16.msra.mxu0 %v3555_v47  ;;  %v962_v47 = vld [vmem:[%s7184_s5 + $0xca0] sm:$0xff]  ;;  %v1573_v31 = vld [vmem:[%s7184_s5 + $0x1fb8] sm:$0xff] }
 0x2fa   : > { %2427 = vmatprep.mubr.f32.mxu0 %v4450_v16  ;;  %3494 = vmatprep.subr.bf16.mxu1 %v3493_v51 }
 0x2fb   : > { %3558 = vmatprep.subr.bf16.mxu0 %v3557_v55  ;;  %v1059_v55 = vld [vmem:[%s7184_s5 + $0xfa8] sm:$0xff] }
 0x2fc   : > { %3496 = vmatpush1.bf16.msra.mxu1 %v3495_v58  ;;  %v1029_v58 = vld [vmem:[%s7184_s5 + $0xeb8] sm:$0xff]  ;;  %v3517_v62 = vpack.c.bf16 %v1059_v55, %v1027_v54  ;;  %v1347_v54 = vld [vmem:[%s7184_s5 + $0x18a8] sm:$0xff] }
 0x2fd   : > { %3560 = vmatpush1.bf16.msra.mxu0 %v3559_v59  ;;  %3498 = vmatprep.subr.bf16.mxu1 %v3497_v60  ;;  %v1061_v59 = vld [vmem:[%s7184_s5 + $0xfb8] sm:$0xff]  ;;  %v3515_v60 = vpack.c.bf16 %v994_v48, %v962_v47  ;;  %v3595_v47 = vpack.c.bf16 %v1252_v41, %v1220_v39  ;;  %v3533_v48 = vpack.c.bf16 %v1315_v43, %v1283_v42  ;;  %v1379_v55 = vld [vmem:[%s7184_s5 + $0x19a8] sm:$0xff]  ;;  %v1572_v39 = vld [vmem:[%s7184_s5 + $0x1fb0] sm:$0xff] }
 0x2fe   : > { %3562 = vmatprep.subr.bf16.mxu0 %v3561_v0  ;;  %v1058_v0 = vld [vmem:[%s7184_s5 + $0xfa0] sm:$0xff]  ;;  %v3581_v2 = vpack.c.bf16 %v1061_v59, %v1029_v58  ;;  %v615_v41 = vld [vmem:[%s7184_s5 + $0x1c8] sm:$0xff]  ;;  %v585_v42 = vld [vmem:[%s7184_s5 + $0xd8] sm:$0xff] }
 0x2ff   : > { %v617_v43 = vld [vmem:[%s7184_s5 + $0x1d8] sm:$0xff] }
 0x300   : > { %3500 = vmatpush1.bf16.msra.mxu1 %v3499_v6  ;;  %v1093_v6 = vld [vmem:[%s7184_s5 + $0x10b8] sm:$0xff] }
 0x301   : > { %3564 = vmatpush1.bf16.msra.mxu0 %v3563_v7  ;;  %3502 = vmatprep.subr.bf16.mxu1 %v3501_v8  ;;  %v1125_v7 = vld [vmem:[%s7184_s5 + $0x11b8] sm:$0xff]  ;;  %v3519_v8 = vpack.c.bf16 %v1058_v0, %v1026_v63  ;;  %v1348_v63 = vld [vmem:[%s7184_s5 + $0x18b0] sm:$0xff] }
 0x302   : > { %3566 = vmatprep.subr.bf16.mxu0 %v3565_v12  ;;  %v1122_v12 = vld [vmem:[%s7184_s5 + $0x11a0] sm:$0xff]  ;;  %v3585_v14 = vpack.c.bf16 %v1125_v7, %v1093_v6  ;;  %v3603_v7 = vpack.c.bf16 %v1380_v1, %v1348_v63  ;;  %v711_v63 = vld [vmem:[%s7184_s5 + $0x4c8] sm:$0xff] }
 0x304   : > { %3504 = vmatpush1.bf16.msra.mxu1 %v3503_v19  ;;  %v1157_v19 = vld [vmem:[%s7184_s5 + $0x12b8] sm:$0xff] }
 0x305   : > { %3568 = vmatpush1.bf16.msra.mxu0 %v3567_v20  ;;  %3506 = vmatprep.subr.bf16.mxu1 %v3505_v22  ;;  %v1189_v20 = vld [vmem:[%s7184_s5 + $0x13b8] sm:$0xff]  ;;  %v3523_v22 = vpack.c.bf16 %v1122_v12, %v1090_v11  ;;  %v1412_v11 = vld [vmem:[%s7184_s5 + $0x1ab0] sm:$0xff]  ;;  %v3605_v12 = vpack.c.bf16 %v1445_v5, %v1413_v4 }
 0x306   : > { %3570 = vmatprep.subr.bf16.mxu0 %v3569_v26  ;;  %v1186_v26 = vld [vmem:[%s7184_s5 + $0x13a0] sm:$0xff]  ;;  %v3589_v28 = vpack.c.bf16 %v1189_v20, %v1157_v19  ;;  %v3607_v20 = vpack.c.bf16 %v1444_v13, %v1412_v11  ;;  %v744_v11 = vld [vmem:[%s7184_s5 + $0x5d0] sm:$0xff]  ;;  %v807_v13 = vld [vmem:[%s7184_s5 + $0x7c8] sm:$0xff] }
 0x308   : > { %3508 = vmatpush1.bf16.msra.mxu1 %v3507_v32  ;;  %v1221_v32 = vld [vmem:[%s7184_s5 + $0x14b8] sm:$0xff] }
 0x309   : > { %3572 = vmatpush1.bf16.msra.mxu0 %v3571_v33  ;;  %3510 = vmatprep.subr.bf16.mxu1 %v3509_v34  ;;  %v1253_v33 = vld [vmem:[%s7184_s5 + $0x15b8] sm:$0xff]  ;;  %v3527_v34 = vpack.c.bf16 %v1186_v26, %v1154_v25  ;;  %v1476_v25 = vld [vmem:[%s7184_s5 + $0x1cb0] sm:$0xff]  ;;  %v3609_v26 = vpack.c.bf16 %v1509_v18, %v1477_v17 }
 0x30a   : > { %v1790_v50 = vpop.f32.mrb[4].mxu1  ;;  %v1861_v51 = vpop.f32.mrb[10].mxu0  ;;  %3574 = vmatprep.subr.bf16.mxu0 %v3573_v38  ;;  %v1250_v38 = vld [vmem:[%s7184_s5 + $0x15a0] sm:$0xff]  ;;  %v3593_v40 = vpack.c.bf16 %v1253_v33, %v1221_v32  ;;  %v3611_v33 = vpack.c.bf16 %v1508_v27, %v1476_v25  ;;  %v808_v25 = vld [vmem:[%s7184_s5 + $0x7d0] sm:$0xff]  ;;  %v871_v27 = vld [vmem:[%s7184_s5 + $0x9c8] sm:$0xff] }
 0x30b   : > { %2722 = vst [vmem:[%s5748_s9 + $0x20] sm:$0x1f] %v1790_v50  ;;  %2724 = vst [vmem:[%s5748_s9 + $0x30] sm:$0x1f] %v1861_v51  ;;  %v1792_v56 = vpop.f32.mrb[5].mxu1  ;;  %v1863_v57 = vpop.f32.mrb[11].mxu0 }
 0x30c   : > { %2723 = vst [vmem:[%s5748_s9 + $0x28] sm:$0x1f] %v1792_v56  ;;  %2725 = vst [vmem:[%s5748_s9 + $0x38] sm:$0x1f] %v1863_v57  ;;  %3512 = vmatpush1.bf16.msra.mxu1 %v3511_v44  ;;  %v1285_v44 = vld [vmem:[%s7184_s5 + $0x16b8] sm:$0xff]  ;;  %v1314_v50 = vld [vmem:[%s7184_s5 + $0x17a0] sm:$0xff] }
 0x30d   : > { %3576 = vmatpush1.bf16.msra.mxu0 %v3575_v45  ;;  %3514 = vmatprep.subr.bf16.mxu1 %v3513_v46  ;;  %v1317_v45 = vld [vmem:[%s7184_s5 + $0x17b8] sm:$0xff]  ;;  %v3531_v46 = vpack.c.bf16 %v1250_v38, %v1218_v37  ;;  %v1284_v51 = vld [vmem:[%s7184_s5 + $0x16b0] sm:$0xff]  ;;  %v3535_v58 = vpack.c.bf16 %v1314_v50, %v1282_v49  ;;  %v3613_v38 = vpack.c.bf16 %v1573_v31, %v1541_v30 }
 0x30e   : > { %3578 = vmatprep.subr.bf16.mxu0 %v3577_v52  ;;  %v3597_v52 = vpack.c.bf16 %v1317_v45, %v1285_v44  ;;  %v1349_v56 = vld [vmem:[%s7184_s5 + $0x18b8] sm:$0xff]  ;;  %v3599_v59 = vpack.c.bf16 %v1316_v53, %v1284_v51  ;;  %v1540_v37 = vld [vmem:[%s7184_s5 + $0x1eb0] sm:$0xff]  ;;  %v3681_v49 = vpack.c.bf16 %v617_v43, %v585_v42  ;;  %v679_v53 = vld [vmem:[%s7184_s5 + $0x3c8] sm:$0xff] }
 0x30f   : > { %v1381_v57 = vld [vmem:[%s7184_s5 + $0x19b8] sm:$0xff]  ;;  %v3615_v45 = vpack.c.bf16 %v1572_v39, %v1540_v37  ;;  %v584_v50 = vld [vmem:[%s7184_s5 + $0xd0] sm:$0xff]  ;;  %v935_v39 = vld [vmem:[%s7184_s5 + $0xbc8] sm:$0xff] }
 0x310   : > { %3516 = vmatpush1.bf16.msra.mxu1 %v3515_v60  ;;  %v3537_v60 = vpack.c.bf16 %v1379_v55, %v1347_v54  ;;  %v3601_v0 = vpack.c.bf16 %v1381_v57, %v1349_v56  ;;  %v616_v51 = vld [vmem:[%s7184_s5 + $0x1d0] sm:$0xff]  ;;  %v649_v55 = vld [vmem:[%s7184_s5 + $0x2d8] sm:$0xff] }
 0x311   : > { %3580 = vmatpush1.bf16.msra.mxu0 %v3579_v61  ;;  %3518 = vmatprep.subr.bf16.mxu1 %v3517_v62  ;;  %v1346_v61 = vld [vmem:[%s7184_s5 + $0x18a0] sm:$0xff]  ;;  %v681_v56 = vld [vmem:[%s7184_s5 + $0x3d8] sm:$0xff]  ;;  %v3683_v57 = vpack.c.bf16 %v616_v51, %v584_v50  ;;  %v872_v37 = vld [vmem:[%s7184_s5 + $0x9d0] sm:$0xff] }
 0x312   : > { %3582 = vmatprep.subr.bf16.mxu0 %v3581_v2  ;;  %v1378_v62 = vld [vmem:[%s7184_s5 + $0x19a0] sm:$0xff]  ;;  %v1411_v2 = vld [vmem:[%s7184_s5 + $0x1aa8] sm:$0xff]  ;;  %v3685_v1 = vpack.c.bf16 %v681_v56, %v649_v55 }
 0x313   : > { %v3539_v6 = vpack.c.bf16 %v1378_v62, %v1346_v61  ;;  %v680_v62 = vld [vmem:[%s7184_s5 + $0x3d0] sm:$0xff]  ;;  %v967_v50 = vld [vmem:[%s7184_s5 + $0xcc8] sm:$0xff] }
 0x314   : > { %3520 = vmatpush1.bf16.msra.mxu1 %v3519_v8  ;;  %v3541_v8 = vpack.c.bf16 %v1443_v3, %v1411_v2  ;;  %v713_v2 = vld [vmem:[%s7184_s5 + $0x4d8] sm:$0xff]  ;;  %v999_v51 = vld [vmem:[%s7184_s5 + $0xdc8] sm:$0xff] }
 0x315   : > { %3584 = vmatpush1.bf16.msra.mxu0 %v3583_v9  ;;  %3522 = vmatprep.subr.bf16.mxu1 %v3521_v10  ;;  %v1410_v9 = vld [vmem:[%s7184_s5 + $0x1aa0] sm:$0xff]  ;;  %v745_v3 = vld [vmem:[%s7184_s5 + $0x5d8] sm:$0xff]  ;;  %v3641_v56 = vpack.c.bf16 %v999_v51, %v967_v50  ;;  %v1256_v51 = vld [vmem:[%s7184_s5 + $0x15d0] sm:$0xff] }
 0x316   : > { %3586 = vmatprep.subr.bf16.mxu0 %v3585_v14  ;;  %v1442_v10 = vld [vmem:[%s7184_s5 + $0x1ba0] sm:$0xff]  ;;  %v1475_v14 = vld [vmem:[%s7184_s5 + $0x1ca8] sm:$0xff] }
 0x317   : > { %v3543_v19 = vpack.c.bf16 %v1442_v10, %v1410_v9  ;;  %v712_v9 = vld [vmem:[%s7184_s5 + $0x4d0] sm:$0xff]  ;;  %v3689_v10 = vpack.c.bf16 %v745_v3, %v713_v2  ;;  %v1033_v3 = vld [vmem:[%s7184_s5 + $0xed8] sm:$0xff] }
 0x318   : > { %3524 = vmatpush1.bf16.msra.mxu1 %v3523_v22  ;;  %v3545_v22 = vpack.c.bf16 %v1507_v15, %v1475_v14  ;;  %v777_v14 = vld [vmem:[%s7184_s5 + $0x6d8] sm:$0xff]  ;;  %v3691_v18 = vpack.c.bf16 %v744_v11, %v712_v9  ;;  %v1030_v9 = vld [vmem:[%s7184_s5 + $0xec0] sm:$0xff]  ;;  %v1032_v11 = vld [vmem:[%s7184_s5 + $0xed0] sm:$0xff] }
 0x319   : > { %3588 = vmatpush1.bf16.msra.mxu0 %v3587_v23  ;;  %3526 = vmatprep.subr.bf16.mxu1 %v3525_v24  ;;  %v1474_v23 = vld [vmem:[%s7184_s5 + $0x1ca0] sm:$0xff]  ;;  %v809_v15 = vld [vmem:[%s7184_s5 + $0x7d8] sm:$0xff] }
 0x31a   : > { %3590 = vmatprep.subr.bf16.mxu0 %v3589_v28  ;;  %v1506_v24 = vld [vmem:[%s7184_s5 + $0x1da0] sm:$0xff]  ;;  %v1539_v28 = vld [vmem:[%s7184_s5 + $0x1ea8] sm:$0xff] }
 0x31b   : > { %v3547_v32 = vpack.c.bf16 %v1506_v24, %v1474_v23  ;;  %v776_v23 = vld [vmem:[%s7184_s5 + $0x6d0] sm:$0xff]  ;;  %v3693_v24 = vpack.c.bf16 %v809_v15, %v777_v14  ;;  %v1095_v14 = vld [vmem:[%s7184_s5 + $0x10c8] sm:$0xff] }
 0x31c   : > { %3528 = vmatpush1.bf16.msra.mxu1 %v3527_v34  ;;  %v3549_v34 = vpack.c.bf16 %v1571_v29, %v1539_v28  ;;  %v841_v28 = vld [vmem:[%s7184_s5 + $0x8d8] sm:$0xff]  ;;  %v3695_v31 = vpack.c.bf16 %v808_v25, %v776_v23  ;;  %v1127_v15 = vld [vmem:[%s7184_s5 + $0x11c8] sm:$0xff]  ;;  %v1094_v23 = vld [vmem:[%s7184_s5 + $0x10c0] sm:$0xff] }
 0x31d   : > { %3592 = vmatpush1.bf16.msra.mxu0 %v3591_v35  ;;  %3530 = vmatprep.subr.bf16.mxu1 %v3529_v36  ;;  %v1538_v35 = vld [vmem:[%s7184_s5 + $0x1ea0] sm:$0xff]  ;;  %v873_v29 = vld [vmem:[%s7184_s5 + $0x9d8] sm:$0xff]  ;;  %v1096_v25 = vld [vmem:[%s7184_s5 + $0x10d0] sm:$0xff] }
 0x31e   : > { %3594 = vmatprep.subr.bf16.mxu0 %v3593_v40  ;;  %v1570_v36 = vld [vmem:[%s7184_s5 + $0x1fa0] sm:$0xff]  ;;  %v583_v40 = vld [vmem:[%s7184_s5 + $0xc8] sm:$0xff] }
 0x31f   : > { %v3551_v44 = vpack.c.bf16 %v1570_v36, %v1538_v35  ;;  %v840_v35 = vld [vmem:[%s7184_s5 + $0x8d0] sm:$0xff]  ;;  %v3697_v36 = vpack.c.bf16 %v873_v29, %v841_v28  ;;  %v1159_v28 = vld [vmem:[%s7184_s5 + $0x12c8] sm:$0xff] }
 0x320   : > { %3532 = vmatpush1.bf16.msra.mxu1 %v3531_v46  ;;  %v3617_v46 = vpack.c.bf16 %v615_v41, %v583_v40  ;;  %v905_v40 = vld [vmem:[%s7184_s5 + $0xad8] sm:$0xff]  ;;  %v3699_v43 = vpack.c.bf16 %v872_v37, %v840_v35  ;;  %v1191_v29 = vld [vmem:[%s7184_s5 + $0x13c8] sm:$0xff]  ;;  %v1158_v35 = vld [vmem:[%s7184_s5 + $0x12c0] sm:$0xff] }
 0x321   : > { %3596 = vmatpush1.bf16.msra.mxu0 %v3595_v47  ;;  %3534 = vmatprep.subr.bf16.mxu1 %v3533_v48  ;;  %v582_v47 = vld [vmem:[%s7184_s5 + $0xc0] sm:$0xff]  ;;  %v937_v41 = vld [vmem:[%s7184_s5 + $0xbd8] sm:$0xff]  ;;  %v1160_v37 = vld [vmem:[%s7184_s5 + $0x12d0] sm:$0xff] }
 0x322   : > { %3598 = vmatprep.subr.bf16.mxu0 %v3597_v52  ;;  %v614_v48 = vld [vmem:[%s7184_s5 + $0x1c0] sm:$0xff]  ;;  %v647_v52 = vld [vmem:[%s7184_s5 + $0x2c8] sm:$0xff] }
 0x323   : > { %v3619_v54 = vpack.c.bf16 %v614_v48, %v582_v47  ;;  %v3621_v61 = vpack.c.bf16 %v679_v53, %v647_v52  ;;  %v904_v47 = vld [vmem:[%s7184_s5 + $0xad0] sm:$0xff]  ;;  %v3701_v48 = vpack.c.bf16 %v937_v41, %v905_v40  ;;  %v969_v52 = vld [vmem:[%s7184_s5 + $0xcd8] sm:$0xff]  ;;  %v1223_v40 = vld [vmem:[%s7184_s5 + $0x14c8] sm:$0xff] }
 0x324   : > { %3536 = vmatpush1.bf16.msra.mxu1 %v3535_v58  ;;  %v646_v58 = vld [vmem:[%s7184_s5 + $0x2c0] sm:$0xff]  ;;  %v1001_v53 = vld [vmem:[%s7184_s5 + $0xdd8] sm:$0xff]  ;;  %v1255_v41 = vld [vmem:[%s7184_s5 + $0x15c8] sm:$0xff] }
 0x325   : > { %3600 = vmatpush1.bf16.msra.mxu0 %v3599_v59  ;;  %3538 = vmatprep.subr.bf16.mxu1 %v3537_v60  ;;  %v678_v59 = vld [vmem:[%s7184_s5 + $0x3c0] sm:$0xff]  ;;  %v648_v60 = vld [vmem:[%s7184_s5 + $0x2d0] sm:$0xff] }
 0x326   : > { %3602 = vmatprep.subr.bf16.mxu0 %v3601_v0  ;;  %v743_v0 = vld [vmem:[%s7184_s5 + $0x5c8] sm:$0xff]  ;;  %v3623_v4 = vpack.c.bf16 %v678_v59, %v646_v58  ;;  %v3687_v5 = vpack.c.bf16 %v680_v62, %v648_v60  ;;  %v998_v58 = vld [vmem:[%s7184_s5 + $0xdc0] sm:$0xff]  ;;  %v968_v59 = vld [vmem:[%s7184_s5 + $0xcd0] sm:$0xff] }
 0x327   : > { %v1000_v62 = vld [vmem:[%s7184_s5 + $0xdd0] sm:$0xff] }
 0x328   : > { %3540 = vmatpush1.bf16.msra.mxu1 %v3539_v6  ;;  %v3625_v6 = vpack.c.bf16 %v743_v0, %v711_v63  ;;  %v1031_v63 = vld [vmem:[%s7184_s5 + $0xec8] sm:$0xff] }
 0x329   : > { %3604 = vmatpush1.bf16.msra.mxu0 %v3603_v7  ;;  %3542 = vmatprep.subr.bf16.mxu1 %v3541_v8  ;;  %v710_v7 = vld [vmem:[%s7184_s5 + $0x4c0] sm:$0xff]  ;;  %v1063_v0 = vld [vmem:[%s7184_s5 + $0xfc8] sm:$0xff] }
 0x32a   : > { %3606 = vmatprep.subr.bf16.mxu0 %v3605_v12  ;;  %v742_v8 = vld [vmem:[%s7184_s5 + $0x5c0] sm:$0xff]  ;;  %v775_v12 = vld [vmem:[%s7184_s5 + $0x6c8] sm:$0xff] }
 0x32b   : > { %v3627_v17 = vpack.c.bf16 %v742_v8, %v710_v7  ;;  %v3707_v7 = vpack.c.bf16 %v1000_v62, %v968_v59  ;;  %v3645_v8 = vpack.c.bf16 %v1063_v0, %v1031_v63  ;;  %v1286_v59 = vld [vmem:[%s7184_s5 + $0x16c0] sm:$0xff]  ;;  %v1320_v63 = vld [vmem:[%s7184_s5 + $0x17d0] sm:$0xff]  ;;  %v1351_v0 = vld [vmem:[%s7184_s5 + $0x18c8] sm:$0xff] }
 0x32c   : > { %3544 = vmatpush1.bf16.msra.mxu1 %v3543_v19  ;;  %v3629_v19 = vpack.c.bf16 %v807_v13, %v775_v12  ;;  %v1064_v13 = vld [vmem:[%s7184_s5 + $0xfd0] sm:$0xff] }
 0x32d   : > { %3608 = vmatpush1.bf16.msra.mxu0 %v3607_v20  ;;  %3546 = vmatprep.subr.bf16.mxu1 %v3545_v22  ;;  %v774_v20 = vld [vmem:[%s7184_s5 + $0x6c0] sm:$0xff] }
 0x32e   : > { %3610 = vmatprep.subr.bf16.mxu0 %v3609_v26  ;;  %v806_v22 = vld [vmem:[%s7184_s5 + $0x7c0] sm:$0xff]  ;;  %v839_v26 = vld [vmem:[%s7184_s5 + $0x8c8] sm:$0xff] }
 0x32f   : > { %v3631_v30 = vpack.c.bf16 %v806_v22, %v774_v20  ;;  %v3711_v20 = vpack.c.bf16 %v1064_v13, %v1032_v11  ;;  %v3649_v22 = vpack.c.bf16 %v1127_v15, %v1095_v14  ;;  %v1384_v11 = vld [vmem:[%s7184_s5 + $0x19d0] sm:$0xff]  ;;  %v1447_v13 = vld [vmem:[%s7184_s5 + $0x1bc8] sm:$0xff]  ;;  %v1417_v14 = vld [vmem:[%s7184_s5 + $0x1ad8] sm:$0xff] }
 0x330   : > { %3548 = vmatpush1.bf16.msra.mxu1 %v3547_v32  ;;  %v3633_v32 = vpack.c.bf16 %v871_v27, %v839_v26  ;;  %v1128_v27 = vld [vmem:[%s7184_s5 + $0x11d0] sm:$0xff]  ;;  %v1449_v15 = vld [vmem:[%s7184_s5 + $0x1bd8] sm:$0xff] }
 0x331   : > { %3612 = vmatpush1.bf16.msra.mxu0 %v3611_v33  ;;  %3550 = vmatprep.subr.bf16.mxu1 %v3549_v34  ;;  %v838_v33 = vld [vmem:[%s7184_s5 + $0x8c0] sm:$0xff] }
 0x332   : > { %3614 = vmatprep.subr.bf16.mxu0 %v3613_v38  ;;  %v870_v34 = vld [vmem:[%s7184_s5 + $0x9c0] sm:$0xff]  ;;  %v903_v38 = vld [vmem:[%s7184_s5 + $0xac8] sm:$0xff] }
 0x333   : > { %v3635_v42 = vpack.c.bf16 %v870_v34, %v838_v33  ;;  %v3715_v33 = vpack.c.bf16 %v1128_v27, %v1096_v25  ;;  %v3653_v34 = vpack.c.bf16 %v1191_v29, %v1159_v28  ;;  %v1448_v25 = vld [vmem:[%s7184_s5 + $0x1bd0] sm:$0xff]  ;;  %v1511_v27 = vld [vmem:[%s7184_s5 + $0x1dc8] sm:$0xff]  ;;  %v1481_v28 = vld [vmem:[%s7184_s5 + $0x1cd8] sm:$0xff] }
 0x334   : > { %3552 = vmatpush1.bf16.msra.mxu1 %v3551_v44  ;;  %v3637_v44 = vpack.c.bf16 %v935_v39, %v903_v38  ;;  %v1192_v39 = vld [vmem:[%s7184_s5 + $0x13d0] sm:$0xff]  ;;  %v1513_v29 = vld [vmem:[%s7184_s5 + $0x1dd8] sm:$0xff] }
 0x335   : > { %3616 = vmatpush1.bf16.msra.mxu0 %v3615_v45  ;;  %3618 = vmatprep.subr.bf16.mxu1 %v3617_v46  ;;  %v902_v45 = vld [vmem:[%s7184_s5 + $0xac0] sm:$0xff] }
 0x336   : > { %3682 = vmatprep.subr.bf16.mxu0 %v3681_v49  ;;  %v934_v46 = vld [vmem:[%s7184_s5 + $0xbc0] sm:$0xff]  ;;  %v936_v49 = vld [vmem:[%s7184_s5 + $0xbd0] sm:$0xff] }
 0x337   : > { %2357 = vmatmul.mubr.f32.vlgmr.msra.gmra.mrb[12].mxu1 %v4458_v21  ;;  %v3703_v55 = vpack.c.bf16 %v936_v49, %v904_v47  ;;  %v1222_v47 = vld [vmem:[%s7184_s5 + $0x14c0] sm:$0xff]  ;;  %v1224_v49 = vld [vmem:[%s7184_s5 + $0x14d0] sm:$0xff] }
 0x338   : > { %2428 = vmatmul.mubr.f32.vlgmr.msra.gmra.mrb[18].mxu0 %v4458_v21  ;;  %3620 = vmatpush1.bf16.msra.mxu1 %v3619_v54  ;;  %v3639_v54 = vpack.c.bf16 %v934_v46, %v902_v45  ;;  %v3719_v45 = vpack.c.bf16 %v1192_v39, %v1160_v37  ;;  %v3657_v46 = vpack.c.bf16 %v1255_v41, %v1223_v40  ;;  %v1512_v37 = vld [vmem:[%s7184_s5 + $0x1dd0] sm:$0xff]  ;;  %v1575_v39 = vld [vmem:[%s7184_s5 + $0x1fc8] sm:$0xff]  ;;  %v1545_v40 = vld [vmem:[%s7184_s5 + $0x1ed8] sm:$0xff] }
 0x339   : > { %2498 = vmatprep.mubr.f32.mxu1 %v4450_v16  ;;  %3684 = vmatpush1.bf16.msra.mxu0 %v3683_v57  ;;  %v966_v57 = vld [vmem:[%s7184_s5 + $0xcc0] sm:$0xff]  ;;  %v1577_v41 = vld [vmem:[%s7184_s5 + $0x1fd8] sm:$0xff] }
 0x33a   : > { %2569 = vmatprep.mubr.f32.mxu0 %v4450_v16  ;;  %3622 = vmatprep.subr.bf16.mxu1 %v3621_v61  ;;  %v3705_v61 = vpack.c.bf16 %v1001_v53, %v969_v52  ;;  %v1287_v52 = vld [vmem:[%s7184_s5 + $0x16c8] sm:$0xff] }
 0x33b   : > { %3686 = vmatprep.subr.bf16.mxu0 %v3685_v1  ;;  %v1319_v53 = vld [vmem:[%s7184_s5 + $0x17c8] sm:$0xff] }
 0x33c   : > { %3624 = vmatpush1.bf16.msra.mxu1 %v3623_v4  ;;  %v1065_v4 = vld [vmem:[%s7184_s5 + $0xfd8] sm:$0xff] }
 0x33d   : > { %3688 = vmatpush1.bf16.msra.mxu0 %v3687_v5  ;;  %3626 = vmatprep.subr.bf16.mxu1 %v3625_v6  ;;  %v3643_v6 = vpack.c.bf16 %v998_v58, %v966_v57  ;;  %v3709_v12 = vpack.c.bf16 %v1065_v4, %v1033_v3  ;;  %v3723_v57 = vpack.c.bf16 %v1256_v51, %v1224_v49  ;;  %v1385_v3 = vld [vmem:[%s7184_s5 + $0x19d8] sm:$0xff]  ;;  %v1576_v49 = vld [vmem:[%s7184_s5 + $0x1fd0] sm:$0xff]  ;;  %v619_v51 = vld [vmem:[%s7184_s5 + $0x1e8] sm:$0xff] }
 0x33e   : > { %3690 = vmatprep.subr.bf16.mxu0 %v3689_v10  ;;  %v1062_v10 = vld [vmem:[%s7184_s5 + $0xfc0] sm:$0xff]  ;;  %v3661_v58 = vpack.c.bf16 %v1319_v53, %v1287_v52  ;;  %v589_v52 = vld [vmem:[%s7184_s5 + $0xf8] sm:$0xff] }
 0x33f   : > { %v621_v53 = vld [vmem:[%s7184_s5 + $0x1f8] sm:$0xff] }
 0x340   : > { %3628 = vmatpush1.bf16.msra.mxu1 %v3627_v17  ;;  %v1097_v17 = vld [vmem:[%s7184_s5 + $0x10d8] sm:$0xff] }
 0x341   : > { %3692 = vmatpush1.bf16.msra.mxu0 %v3691_v18  ;;  %3630 = vmatprep.subr.bf16.mxu1 %v3629_v19  ;;  %v1129_v18 = vld [vmem:[%s7184_s5 + $0x11d8] sm:$0xff]  ;;  %v3647_v19 = vpack.c.bf16 %v1062_v10, %v1030_v9  ;;  %v1352_v9 = vld [vmem:[%s7184_s5 + $0x18d0] sm:$0xff] }
 0x342   : > { %3694 = vmatprep.subr.bf16.mxu0 %v3693_v24  ;;  %v1126_v24 = vld [vmem:[%s7184_s5 + $0x11c0] sm:$0xff]  ;;  %v3713_v26 = vpack.c.bf16 %v1129_v18, %v1097_v17  ;;  %v3731_v18 = vpack.c.bf16 %v1384_v11, %v1352_v9  ;;  %v715_v9 = vld [vmem:[%s7184_s5 + $0x4e8] sm:$0xff] }
 0x344   : > { %3632 = vmatpush1.bf16.msra.mxu1 %v3631_v30  ;;  %v1161_v30 = vld [vmem:[%s7184_s5 + $0x12d8] sm:$0xff] }
 0x345   : > { %3696 = vmatpush1.bf16.msra.mxu0 %v3695_v31  ;;  %3634 = vmatprep.subr.bf16.mxu1 %v3633_v32  ;;  %v1193_v31 = vld [vmem:[%s7184_s5 + $0x13d8] sm:$0xff]  ;;  %v3651_v32 = vpack.c.bf16 %v1126_v24, %v1094_v23  ;;  %v1416_v23 = vld [vmem:[%s7184_s5 + $0x1ad0] sm:$0xff]  ;;  %v3733_v24 = vpack.c.bf16 %v1449_v15, %v1417_v14 }
 0x346   : > { %3698 = vmatprep.subr.bf16.mxu0 %v3697_v36  ;;  %v1190_v36 = vld [vmem:[%s7184_s5 + $0x13c0] sm:$0xff]  ;;  %v3717_v38 = vpack.c.bf16 %v1193_v31, %v1161_v30  ;;  %v3735_v31 = vpack.c.bf16 %v1448_v25, %v1416_v23  ;;  %v748_v23 = vld [vmem:[%s7184_s5 + $0x5f0] sm:$0xff]  ;;  %v811_v25 = vld [vmem:[%s7184_s5 + $0x7e8] sm:$0xff] }
 0x348   : > { %3636 = vmatpush1.bf16.msra.mxu1 %v3635_v42  ;;  %v1225_v42 = vld [vmem:[%s7184_s5 + $0x14d8] sm:$0xff] }
 0x349   : > { %3700 = vmatpush1.bf16.msra.mxu0 %v3699_v43  ;;  %3638 = vmatprep.subr.bf16.mxu1 %v3637_v44  ;;  %v1257_v43 = vld [vmem:[%s7184_s5 + $0x15d8] sm:$0xff]  ;;  %v3655_v44 = vpack.c.bf16 %v1190_v36, %v1158_v35  ;;  %v1480_v35 = vld [vmem:[%s7184_s5 + $0x1cd0] sm:$0xff]  ;;  %v3737_v36 = vpack.c.bf16 %v1513_v29, %v1481_v28 }
 0x34a   : > { %v1932_v60 = vpop.f32.mrb[6].mxu1  ;;  %3702 = vmatprep.subr.bf16.mxu0 %v3701_v48  ;;  %v1254_v48 = vld [vmem:[%s7184_s5 + $0x15c0] sm:$0xff]  ;;  %v3721_v50 = vpack.c.bf16 %v1257_v43, %v1225_v42  ;;  %v3739_v43 = vpack.c.bf16 %v1512_v37, %v1480_v35  ;;  %v843_v35 = vld [vmem:[%s7184_s5 + $0x8e8] sm:$0xff]  ;;  %v845_v37 = vld [vmem:[%s7184_s5 + $0x8f8] sm:$0xff] }
 0x34b   : > { %2726 = vst [vmem:[%s5748_s9 + $0x40] sm:$0x1f] %v1932_v60  ;;  %v2003_v1 = vpop.f32.mrb[12].mxu0  ;;  %v1934_v2 = vpop.f32.mrb[7].mxu1  ;;  %v1318_v60 = vld [vmem:[%s7184_s5 + $0x17c0] sm:$0xff] }
 0x34c   : > { %2728 = vst [vmem:[%s5748_s9 + $0x50] sm:$0x1f] %v2003_v1  ;;  %2727 = vst [vmem:[%s5748_s9 + $0x48] sm:$0x1f] %v1934_v2  ;;  %v2005_v5 = vpop.f32.mrb[13].mxu0  ;;  %3640 = vmatpush1.bf16.msra.mxu1 %v3639_v54  ;;  %v1289_v54 = vld [vmem:[%s7184_s5 + $0x16d8] sm:$0xff]  ;;  %v3663_v4 = vpack.c.bf16 %v1318_v60, %v1286_v59  ;;  %v3809_v59 = vpack.c.bf16 %v621_v53, %v589_v52 }
 0x34d   : > { %2729 = vst [vmem:[%s5748_s9 + $0x58] sm:$0x1f] %v2005_v5  ;;  %3704 = vmatpush1.bf16.msra.mxu0 %v3703_v55  ;;  %3642 = vmatprep.subr.bf16.mxu1 %v3641_v56  ;;  %v1321_v55 = vld [vmem:[%s7184_s5 + $0x17d8] sm:$0xff]  ;;  %v3659_v56 = vpack.c.bf16 %v1254_v48, %v1222_v47  ;;  %v1383_v1 = vld [vmem:[%s7184_s5 + $0x19c8] sm:$0xff]  ;;  %v1544_v47 = vld [vmem:[%s7184_s5 + $0x1ed0] sm:$0xff]  ;;  %v3741_v48 = vpack.c.bf16 %v1577_v41, %v1545_v40 }
 0x34e   : > { %3706 = vmatprep.subr.bf16.mxu0 %v3705_v61  ;;  %v1288_v61 = vld [vmem:[%s7184_s5 + $0x16d0] sm:$0xff]  ;;  %v3725_v62 = vpack.c.bf16 %v1321_v55, %v1289_v54  ;;  %v1353_v2 = vld [vmem:[%s7184_s5 + $0x18d8] sm:$0xff]  ;;  %v3743_v55 = vpack.c.bf16 %v1576_v49, %v1544_v47  ;;  %v907_v47 = vld [vmem:[%s7184_s5 + $0xae8] sm:$0xff] }
 0x34f   : > { %v3727_v5 = vpack.c.bf16 %v1320_v63, %v1288_v61  ;;  %v3729_v10 = vpack.c.bf16 %v1385_v3, %v1353_v2  ;;  %v588_v60 = vld [vmem:[%s7184_s5 + $0xf0] sm:$0xff]  ;;  %v683_v63 = vld [vmem:[%s7184_s5 + $0x3e8] sm:$0xff]  ;;  %v685_v2 = vld [vmem:[%s7184_s5 + $0x3f8] sm:$0xff] }
 0x350   : > { %3644 = vmatpush1.bf16.msra.mxu1 %v3643_v6  ;;  %v3665_v6 = vpack.c.bf16 %v1383_v1, %v1351_v0  ;;  %v620_v61 = vld [vmem:[%s7184_s5 + $0x1f0] sm:$0xff]  ;;  %v653_v1 = vld [vmem:[%s7184_s5 + $0x2f8] sm:$0xff] }
 0x351   : > { %3708 = vmatpush1.bf16.msra.mxu0 %v3707_v7  ;;  %3646 = vmatprep.subr.bf16.mxu1 %v3645_v8  ;;  %v1350_v7 = vld [vmem:[%s7184_s5 + $0x18c0] sm:$0xff]  ;;  %v3811_v3 = vpack.c.bf16 %v620_v61, %v588_v60  ;;  %v3813_v11 = vpack.c.bf16 %v685_v2, %v653_v1  ;;  %v909_v49 = vld [vmem:[%s7184_s5 + $0xaf8] sm:$0xff]  ;;  %v1003_v60 = vld [vmem:[%s7184_s5 + $0xde8] sm:$0xff] }
 0x352   : > { %3710 = vmatprep.subr.bf16.mxu0 %v3709_v12  ;;  %v1382_v8 = vld [vmem:[%s7184_s5 + $0x19c0] sm:$0xff]  ;;  %v1415_v12 = vld [vmem:[%s7184_s5 + $0x1ac8] sm:$0xff]  ;;  %v973_v61 = vld [vmem:[%s7184_s5 + $0xcf8] sm:$0xff] }
 0x353   : > { %v3667_v17 = vpack.c.bf16 %v1382_v8, %v1350_v7  ;;  %v684_v8 = vld [vmem:[%s7184_s5 + $0x3f0] sm:$0xff]  ;;  %v970_v2 = vld [vmem:[%s7184_s5 + $0xce0] sm:$0xff] }
 0x354   : > { %3648 = vmatpush1.bf16.msra.mxu1 %v3647_v19  ;;  %v3669_v19 = vpack.c.bf16 %v1447_v13, %v1415_v12  ;;  %v717_v12 = vld [vmem:[%s7184_s5 + $0x4f8] sm:$0xff] }
 0x355   : > { %3712 = vmatpush1.bf16.msra.mxu0 %v3711_v20  ;;  %3650 = vmatprep.subr.bf16.mxu1 %v3649_v22  ;;  %v1414_v20 = vld [vmem:[%s7184_s5 + $0x1ac0] sm:$0xff]  ;;  %v749_v13 = vld [vmem:[%s7184_s5 + $0x5f8] sm:$0xff] }
 0x356   : > { %3714 = vmatprep.subr.bf16.mxu0 %v3713_v26  ;;  %v1446_v22 = vld [vmem:[%s7184_s5 + $0x1bc0] sm:$0xff]  ;;  %v1479_v26 = vld [vmem:[%s7184_s5 + $0x1cc8] sm:$0xff] }
 0x357   : > { %v3671_v30 = vpack.c.bf16 %v1446_v22, %v1414_v20  ;;  %v716_v20 = vld [vmem:[%s7184_s5 + $0x4f0] sm:$0xff]  ;;  %v3817_v22 = vpack.c.bf16 %v749_v13, %v717_v12  ;;  %v1037_v12 = vld [vmem:[%s7184_s5 + $0xef8] sm:$0xff] }
 0x358   : > { %3652 = vmatpush1.bf16.msra.mxu1 %v3651_v32  ;;  %v3673_v32 = vpack.c.bf16 %v1511_v27, %v1479_v26  ;;  %v781_v26 = vld [vmem:[%s7184_s5 + $0x6f8] sm:$0xff]  ;;  %v3819_v28 = vpack.c.bf16 %v748_v23, %v716_v20  ;;  %v1066_v20 = vld [vmem:[%s7184_s5 + $0xfe0] sm:$0xff] }
 0x359   : > { %3716 = vmatpush1.bf16.msra.mxu0 %v3715_v33  ;;  %3654 = vmatprep.subr.bf16.mxu1 %v3653_v34  ;;  %v1478_v33 = vld [vmem:[%s7184_s5 + $0x1cc0] sm:$0xff]  ;;  %v1069_v13 = vld [vmem:[%s7184_s5 + $0xff8] sm:$0xff] }
 0x35a   : > { %3718 = vmatprep.subr.bf16.mxu0 %v3717_v38  ;;  %v1510_v34 = vld [vmem:[%s7184_s5 + $0x1dc0] sm:$0xff]  ;;  %v1543_v38 = vld [vmem:[%s7184_s5 + $0x1ec8] sm:$0xff]  ;;  %v3837_v23 = vpack.c.bf16 %v1069_v13, %v1037_v12 }
 0x35b   : > { %v3675_v42 = vpack.c.bf16 %v1510_v34, %v1478_v33  ;;  %v812_v34 = vld [vmem:[%s7184_s5 + $0x7f0] sm:$0xff] }
 0x35c   : > { %3656 = vmatpush1.bf16.msra.mxu1 %v3655_v44  ;;  %v3677_v44 = vpack.c.bf16 %v1575_v39, %v1543_v38  ;;  %v877_v38 = vld [vmem:[%s7184_s5 + $0x9f8] sm:$0xff] }
 0x35d   : > { %3720 = vmatpush1.bf16.msra.mxu0 %v3719_v45  ;;  %3658 = vmatprep.subr.bf16.mxu1 %v3657_v46  ;;  %v1542_v45 = vld [vmem:[%s7184_s5 + $0x1ec0] sm:$0xff] }
 0x35e   : > { %3722 = vmatprep.subr.bf16.mxu0 %v3721_v50  ;;  %v1574_v46 = vld [vmem:[%s7184_s5 + $0x1fc0] sm:$0xff]  ;;  %v587_v50 = vld [vmem:[%s7184_s5 + $0xe8] sm:$0xff] }
 0x35f   : > { %v3679_v54 = vpack.c.bf16 %v1574_v46, %v1542_v45  ;;  %v3825_v45 = vpack.c.bf16 %v877_v38, %v845_v37  ;;  %v876_v46 = vld [vmem:[%s7184_s5 + $0x9f0] sm:$0xff]  ;;  %v1195_v37 = vld [vmem:[%s7184_s5 + $0x13e8] sm:$0xff]  ;;  %v1165_v38 = vld [vmem:[%s7184_s5 + $0x12f8] sm:$0xff] }
 0x360   : > { %3660 = vmatpush1.bf16.msra.mxu1 %v3659_v56  ;;  %v3745_v56 = vpack.c.bf16 %v619_v51, %v587_v50  ;;  %v941_v50 = vld [vmem:[%s7184_s5 + $0xbf8] sm:$0xff] }
 0x361   : > { %3724 = vmatpush1.bf16.msra.mxu0 %v3723_v57  ;;  %3662 = vmatprep.subr.bf16.mxu1 %v3661_v58  ;;  %v586_v57 = vld [vmem:[%s7184_s5 + $0xe0] sm:$0xff] }
 0x362   : > { %3726 = vmatprep.subr.bf16.mxu0 %v3725_v62  ;;  %v618_v58 = vld [vmem:[%s7184_s5 + $0x1e0] sm:$0xff]  ;;  %v651_v62 = vld [vmem:[%s7184_s5 + $0x2e8] sm:$0xff] }
 0x363   : > { %v3747_v0 = vpack.c.bf16 %v618_v58, %v586_v57  ;;  %v3749_v7 = vpack.c.bf16 %v683_v63, %v651_v62  ;;  %v3829_v57 = vpack.c.bf16 %v941_v50, %v909_v49  ;;  %v940_v58 = vld [vmem:[%s7184_s5 + $0xbf0] sm:$0xff]  ;;  %v1005_v62 = vld [vmem:[%s7184_s5 + $0xdf8] sm:$0xff]  ;;  %v1259_v49 = vld [vmem:[%s7184_s5 + $0x15e8] sm:$0xff] }
 0x364   : > { %3664 = vmatpush1.bf16.msra.mxu1 %v3663_v4  ;;  %v650_v4 = vld [vmem:[%s7184_s5 + $0x2e0] sm:$0xff]  ;;  %v1229_v50 = vld [vmem:[%s7184_s5 + $0x14f8] sm:$0xff] }
 0x365   : > { %3728 = vmatpush1.bf16.msra.mxu0 %v3727_v5  ;;  %3666 = vmatprep.subr.bf16.mxu1 %v3665_v6  ;;  %v682_v5 = vld [vmem:[%s7184_s5 + $0x3e0] sm:$0xff]  ;;  %v652_v6 = vld [vmem:[%s7184_s5 + $0x2f0] sm:$0xff] }
 0x366   : > { %3730 = vmatprep.subr.bf16.mxu0 %v3729_v10  ;;  %v747_v10 = vld [vmem:[%s7184_s5 + $0x5e8] sm:$0xff]  ;;  %v3751_v14 = vpack.c.bf16 %v682_v5, %v650_v4  ;;  %v3815_v15 = vpack.c.bf16 %v684_v8, %v652_v6  ;;  %v972_v4 = vld [vmem:[%s7184_s5 + $0xcf0] sm:$0xff]  ;;  %v3833_v6 = vpack.c.bf16 %v1005_v62, %v973_v61  ;;  %v1293_v62 = vld [vmem:[%s7184_s5 + $0x16f8] sm:$0xff] }
 0x367   : > { %v1035_v8 = vld [vmem:[%s7184_s5 + $0xee8] sm:$0xff] }
 0x368   : > { %3668 = vmatpush1.bf16.msra.mxu1 %v3667_v17  ;;  %v3753_v17 = vpack.c.bf16 %v747_v10, %v715_v9  ;;  %v1067_v9 = vld [vmem:[%s7184_s5 + $0xfe8] sm:$0xff] }
 0x369   : > { %3732 = vmatpush1.bf16.msra.mxu0 %v3731_v18  ;;  %3670 = vmatprep.subr.bf16.mxu1 %v3669_v19  ;;  %v714_v18 = vld [vmem:[%s7184_s5 + $0x4e0] sm:$0xff]  ;;  %v1323_v61 = vld [vmem:[%s7184_s5 + $0x17e8] sm:$0xff] }
 0x36a   : > { %3734 = vmatprep.subr.bf16.mxu0 %v3733_v24  ;;  %v746_v19 = vld [vmem:[%s7184_s5 + $0x5e0] sm:$0xff]  ;;  %v779_v24 = vld [vmem:[%s7184_s5 + $0x6e8] sm:$0xff] }
 0x36b   : > { %v3755_v27 = vpack.c.bf16 %v746_v19, %v714_v18  ;;  %v3757_v29 = vpack.c.bf16 %v811_v25, %v779_v24  ;;  %v3773_v18 = vpack.c.bf16 %v1067_v9, %v1035_v8  ;;  %v1034_v19 = vld [vmem:[%s7184_s5 + $0xee0] sm:$0xff]  ;;  %v1068_v24 = vld [vmem:[%s7184_s5 + $0xff0] sm:$0xff]  ;;  %v1099_v25 = vld [vmem:[%s7184_s5 + $0x10e8] sm:$0xff] }
 0x36c   : > { %3672 = vmatpush1.bf16.msra.mxu1 %v3671_v30  ;;  %v778_v30 = vld [vmem:[%s7184_s5 + $0x6e0] sm:$0xff]  ;;  %v1355_v8 = vld [vmem:[%s7184_s5 + $0x18e8] sm:$0xff] }
 0x36d   : > { %3736 = vmatpush1.bf16.msra.mxu0 %v3735_v31  ;;  %3674 = vmatprep.subr.bf16.mxu1 %v3673_v32  ;;  %v810_v31 = vld [vmem:[%s7184_s5 + $0x7e0] sm:$0xff]  ;;  %v780_v32 = vld [vmem:[%s7184_s5 + $0x6f0] sm:$0xff]  ;;  %v1387_v9 = vld [vmem:[%s7184_s5 + $0x19e8] sm:$0xff] }
 0x36e   : > { %3738 = vmatprep.subr.bf16.mxu0 %v3737_v36  ;;  %v875_v36 = vld [vmem:[%s7184_s5 + $0x9e8] sm:$0xff]  ;;  %v3759_v39 = vpack.c.bf16 %v810_v31, %v778_v30  ;;  %v3823_v40 = vpack.c.bf16 %v812_v34, %v780_v32  ;;  %v1098_v31 = vld [vmem:[%s7184_s5 + $0x10e0] sm:$0xff] }
 0x36f   : > { %v3761_v41 = vpack.c.bf16 %v875_v36, %v843_v35  ;;  %v1130_v32 = vld [vmem:[%s7184_s5 + $0x11e0] sm:$0xff]  ;;  %v1132_v35 = vld [vmem:[%s7184_s5 + $0x11f0] sm:$0xff]  ;;  %v1163_v36 = vld [vmem:[%s7184_s5 + $0x12e8] sm:$0xff] }
 0x370   : > { %3676 = vmatpush1.bf16.msra.mxu1 %v3675_v42  ;;  %v842_v42 = vld [vmem:[%s7184_s5 + $0x8e0] sm:$0xff] }
 0x371   : > { %3740 = vmatpush1.bf16.msra.mxu0 %v3739_v43  ;;  %3678 = vmatprep.subr.bf16.mxu1 %v3677_v44  ;;  %v874_v43 = vld [vmem:[%s7184_s5 + $0x9e0] sm:$0xff]  ;;  %v844_v44 = vld [vmem:[%s7184_s5 + $0x8f0] sm:$0xff] }
 0x372   : > { %3742 = vmatprep.subr.bf16.mxu0 %v3741_v48  ;;  %v939_v48 = vld [vmem:[%s7184_s5 + $0xbe8] sm:$0xff]  ;;  %v3763_v51 = vpack.c.bf16 %v874_v43, %v842_v42  ;;  %v3827_v52 = vpack.c.bf16 %v876_v46, %v844_v44  ;;  %v3781_v42 = vpack.c.bf16 %v1195_v37, %v1163_v36  ;;  %v1162_v43 = vld [vmem:[%s7184_s5 + $0x12e0] sm:$0xff]  ;;  %v1517_v36 = vld [vmem:[%s7184_s5 + $0x1df8] sm:$0xff] }
 0x373   : > { %v3765_v53 = vpack.c.bf16 %v939_v48, %v907_v47  ;;  %v1194_v44 = vld [vmem:[%s7184_s5 + $0x13e0] sm:$0xff]  ;;  %v1196_v47 = vld [vmem:[%s7184_s5 + $0x13f0] sm:$0xff]  ;;  %v1227_v48 = vld [vmem:[%s7184_s5 + $0x14e8] sm:$0xff] }
 0x374   : > { %3680 = vmatpush1.bf16.msra.mxu1 %v3679_v54  ;;  %v906_v54 = vld [vmem:[%s7184_s5 + $0xae0] sm:$0xff] }
 0x375   : > { %3744 = vmatpush1.bf16.msra.mxu0 %v3743_v55  ;;  %3746 = vmatprep.subr.bf16.mxu1 %v3745_v56  ;;  %v938_v55 = vld [vmem:[%s7184_s5 + $0xbe0] sm:$0xff]  ;;  %v908_v56 = vld [vmem:[%s7184_s5 + $0xaf0] sm:$0xff] }
 0x376   : > { %3810 = vmatprep.subr.bf16.mxu0 %v3809_v59  ;;  %v971_v59 = vld [vmem:[%s7184_s5 + $0xce8] sm:$0xff]  ;;  %v3767_v63 = vpack.c.bf16 %v938_v55, %v906_v54  ;;  %v3785_v54 = vpack.c.bf16 %v1259_v49, %v1227_v48  ;;  %v1226_v55 = vld [vmem:[%s7184_s5 + $0x14e0] sm:$0xff]  ;;  %v1581_v48 = vld [vmem:[%s7184_s5 + $0x1ff8] sm:$0xff] }
 0x377   : > { %2499 = vmatmul.mubr.f32.vlgmr.msra.gmra.mrb[14].mxu1 %v4458_v21  ;;  %v3769_v1 = vpack.c.bf16 %v1003_v60, %v971_v59  ;;  %v1260_v59 = vld [vmem:[%s7184_s5 + $0x15f0] sm:$0xff]  ;;  %v1291_v60 = vld [vmem:[%s7184_s5 + $0x16e8] sm:$0xff] }
 0x378   : > { %2570 = vmatmul.mubr.f32.vlgmr.msra.gmra.mrb[20].mxu0 %v4458_v21  ;;  %3748 = vmatpush1.bf16.msra.mxu1 %v3747_v0  ;;  %v3831_v0 = vpack.c.bf16 %v940_v58, %v908_v56  ;;  %v1258_v56 = vld [vmem:[%s7184_s5 + $0x15e0] sm:$0xff] }
 0x379   : > { %2640 = vmatprep.mubr.f32.mxu1 %v4450_v16  ;;  %3812 = vmatpush1.bf16.msra.mxu0 %v3811_v3  ;;  %v1002_v3 = vld [vmem:[%s7184_s5 + $0xde0] sm:$0xff] }
 0x37a   : > { %2711 = vmatprep.mubr.f32.mxu0 %v4450_v16  ;;  %3750 = vmatprep.subr.bf16.mxu1 %v3749_v7  ;;  %v813_v16 = vld [vmem:[%s7184_s5 + $0x7f8] sm:$0xff]  ;;  %v1004_v7 = vld [vmem:[%s7184_s5 + $0xdf0] sm:$0xff] }
 0x37b   : > { %3814 = vmatprep.subr.bf16.mxu0 %v3813_v11  ;;  %v3821_v33 = vpack.c.bf16 %v813_v16, %v781_v26  ;;  %v1131_v26 = vld [vmem:[%s7184_s5 + $0x11e8] sm:$0xff]  ;;  %v1101_v16 = vld [vmem:[%s7184_s5 + $0x10f8] sm:$0xff] }
 0x37c   : > { %3752 = vmatpush1.bf16.msra.mxu1 %v3751_v14  ;;  %v3777_v30 = vpack.c.bf16 %v1131_v26, %v1099_v25  ;;  %v1453_v25 = vld [vmem:[%s7184_s5 + $0x1bf8] sm:$0xff] }
 0x37d   : > { %3816 = vmatpush1.bf16.msra.mxu0 %v3815_v15  ;;  %3754 = vmatprep.subr.bf16.mxu1 %v3753_v17  ;;  %v3771_v15 = vpack.c.bf16 %v1002_v3, %v970_v2  ;;  %v3835_v17 = vpack.c.bf16 %v1004_v7, %v972_v4  ;;  %v3789_v2 = vpack.c.bf16 %v1323_v61, %v1291_v60  ;;  %v1290_v3 = vld [vmem:[%s7184_s5 + $0x16e0] sm:$0xff]  ;;  %v1324_v7 = vld [vmem:[%s7184_s5 + $0x17f0] sm:$0xff] }
 0x37e   : > { %3818 = vmatprep.subr.bf16.mxu0 %v3817_v22  ;;  %v1036_v22 = vld [vmem:[%s7184_s5 + $0xef0] sm:$0xff]  ;;  %v1322_v4 = vld [vmem:[%s7184_s5 + $0x17e0] sm:$0xff] }
 0x37f   : > { %v3791_v12 = vpack.c.bf16 %v1322_v4, %v1290_v3 }
 0x380   : > { %3756 = vmatpush1.bf16.msra.mxu1 %v3755_v27  ;;  %v1133_v27 = vld [vmem:[%s7184_s5 + $0x11f8] sm:$0xff] }
 0x381   : > { %3820 = vmatpush1.bf16.msra.mxu0 %v3819_v28  ;;  %3758 = vmatprep.subr.bf16.mxu1 %v3757_v29  ;;  %v3775_v28 = vpack.c.bf16 %v1066_v20, %v1034_v19  ;;  %v3839_v29 = vpack.c.bf16 %v1068_v24, %v1036_v22  ;;  %v3841_v34 = vpack.c.bf16 %v1133_v27, %v1101_v16  ;;  %v1388_v20 = vld [vmem:[%s7184_s5 + $0x19f0] sm:$0xff]  ;;  %v1419_v22 = vld [vmem:[%s7184_s5 + $0x1ae8] sm:$0xff]  ;;  %v1421_v24 = vld [vmem:[%s7184_s5 + $0x1af8] sm:$0xff] }
 0x382   : > { %3822 = vmatprep.subr.bf16.mxu0 %v3821_v33  ;;  %v1100_v33 = vld [vmem:[%s7184_s5 + $0x10f0] sm:$0xff] }
 0x384   : > { %3760 = vmatpush1.bf16.msra.mxu1 %v3759_v39  ;;  %v1197_v39 = vld [vmem:[%s7184_s5 + $0x13f8] sm:$0xff] }
 0x385   : > { %3824 = vmatpush1.bf16.msra.mxu0 %v3823_v40  ;;  %3762 = vmatprep.subr.bf16.mxu1 %v3761_v41  ;;  %v3779_v40 = vpack.c.bf16 %v1130_v32, %v1098_v31  ;;  %v3843_v41 = vpack.c.bf16 %v1132_v35, %v1100_v33  ;;  %v3845_v46 = vpack.c.bf16 %v1197_v39, %v1165_v38  ;;  %v1452_v32 = vld [vmem:[%s7184_s5 + $0x1bf0] sm:$0xff]  ;;  %v1483_v33 = vld [vmem:[%s7184_s5 + $0x1ce8] sm:$0xff]  ;;  %v1485_v35 = vld [vmem:[%s7184_s5 + $0x1cf8] sm:$0xff] }
 0x386   : > { %3826 = vmatprep.subr.bf16.mxu0 %v3825_v45  ;;  %v1164_v45 = vld [vmem:[%s7184_s5 + $0x12f0] sm:$0xff]  ;;  %v3861_v31 = vpack.c.bf16 %v1453_v25, %v1421_v24 }
 0x388   : > { %3764 = vmatpush1.bf16.msra.mxu1 %v3763_v51  ;;  %v1261_v51 = vld [vmem:[%s7184_s5 + $0x15f8] sm:$0xff] }
 0x389   : > { %3828 = vmatpush1.bf16.msra.mxu0 %v3827_v52  ;;  %3766 = vmatprep.subr.bf16.mxu1 %v3765_v53  ;;  %v3783_v52 = vpack.c.bf16 %v1194_v44, %v1162_v43  ;;  %v3847_v53 = vpack.c.bf16 %v1196_v47, %v1164_v45  ;;  %v3849_v58 = vpack.c.bf16 %v1261_v51, %v1229_v50  ;;  %v1516_v44 = vld [vmem:[%s7184_s5 + $0x1df0] sm:$0xff]  ;;  %v1547_v45 = vld [vmem:[%s7184_s5 + $0x1ee8] sm:$0xff]  ;;  %v1549_v47 = vld [vmem:[%s7184_s5 + $0x1ef8] sm:$0xff] }
 0x38a   : > { %v2074_v5 = vpop.f32.mrb[8].mxu1  ;;  %3830 = vmatprep.subr.bf16.mxu0 %v3829_v57  ;;  %v1228_v57 = vld [vmem:[%s7184_s5 + $0x14f0] sm:$0xff]  ;;  %v3865_v43 = vpack.c.bf16 %v1517_v36, %v1485_v35 }
 0x38b   : > { %2730 = vst [vmem:[%s5748_s9 + $0x60] sm:$0x1f] %v2074_v5  ;;  %v2145_v10 = vpop.f32.mrb[14].mxu0  ;;  %v2076_v11 = vpop.f32.mrb[9].mxu1  ;;  %v1292_v5 = vld [vmem:[%s7184_s5 + $0x16f0] sm:$0xff] }
 0x38c   : > { %2732 = vst [vmem:[%s5748_s9 + $0x70] sm:$0x1f] %v2145_v10  ;;  %2731 = vst [vmem:[%s5748_s9 + $0x68] sm:$0x1f] %v2076_v11  ;;  %v2147_v14 = vpop.f32.mrb[15].mxu0  ;;  %3768 = vmatpush1.bf16.msra.mxu1 %v3767_v63  ;;  %v1325_v63 = vld [vmem:[%s7184_s5 + $0x17f8] sm:$0xff]  ;;  %v3855_v13 = vpack.c.bf16 %v1324_v7, %v1292_v5 }
 0x38d   : > { %2733 = vst [vmem:[%s5748_s9 + $0x78] sm:$0x1f] %v2147_v14  ;;  %3832 = vmatpush1.bf16.msra.mxu0 %v3831_v0  ;;  %3770 = vmatprep.subr.bf16.mxu1 %v3769_v1  ;;  %v3787_v0 = vpack.c.bf16 %v1258_v56, %v1226_v55  ;;  %v3851_v1 = vpack.c.bf16 %v1260_v59, %v1228_v57  ;;  %v1357_v10 = vld [vmem:[%s7184_s5 + $0x18f8] sm:$0xff]  ;;  %v1548_v55 = vld [vmem:[%s7184_s5 + $0x1ef0] sm:$0xff] }
 0x38e   : > { %3834 = vmatprep.subr.bf16.mxu0 %v3833_v6  ;;  %v3853_v6 = vpack.c.bf16 %v1325_v63, %v1293_v62  ;;  %v1389_v11 = vld [vmem:[%s7184_s5 + $0x19f8] sm:$0xff]  ;;  %v3793_v14 = vpack.c.bf16 %v1387_v9, %v1355_v8  ;;  %v1580_v56 = vld [vmem:[%s7184_s5 + $0x1ff0] sm:$0xff] }
 0x38f   : > { %v3857_v19 = vpack.c.bf16 %v1389_v11, %v1357_v10 }
 0x390   : > { %3772 = vmatpush1.bf16.msra.mxu1 %v3771_v15  ;;  %v1354_v15 = vld [vmem:[%s7184_s5 + $0x18e0] sm:$0xff] }
 0x391   : > { %3836 = vmatpush1.bf16.msra.mxu0 %v3835_v17  ;;  %3774 = vmatprep.subr.bf16.mxu1 %v3773_v18  ;;  %v1386_v17 = vld [vmem:[%s7184_s5 + $0x19e0] sm:$0xff]  ;;  %v1356_v18 = vld [vmem:[%s7184_s5 + $0x18f0] sm:$0xff] }
 0x392   : > { %3838 = vmatprep.subr.bf16.mxu0 %v3837_v23  ;;  %v1451_v23 = vld [vmem:[%s7184_s5 + $0x1be8] sm:$0xff]  ;;  %v3795_v26 = vpack.c.bf16 %v1386_v17, %v1354_v15  ;;  %v3859_v16 = vpack.c.bf16 %v1388_v20, %v1356_v18 }
 0x393   : > { %v3797_v27 = vpack.c.bf16 %v1451_v23, %v1419_v22 }
 0x394   : > { %3776 = vmatpush1.bf16.msra.mxu1 %v3775_v28  ;;  %v1418_v28 = vld [vmem:[%s7184_s5 + $0x1ae0] sm:$0xff] }
 0x395   : > { %3840 = vmatpush1.bf16.msra.mxu0 %v3839_v29  ;;  %3778 = vmatprep.subr.bf16.mxu1 %v3777_v30  ;;  %v1450_v29 = vld [vmem:[%s7184_s5 + $0x1be0] sm:$0xff]  ;;  %v1420_v30 = vld [vmem:[%s7184_s5 + $0x1af0] sm:$0xff] }
 0x396   : > { %3842 = vmatprep.subr.bf16.mxu0 %v3841_v34  ;;  %v1515_v34 = vld [vmem:[%s7184_s5 + $0x1de8] sm:$0xff]  ;;  %v3799_v37 = vpack.c.bf16 %v1450_v29, %v1418_v28  ;;  %v3863_v38 = vpack.c.bf16 %v1452_v32, %v1420_v30 }
 0x397   : > { %v3801_v39 = vpack.c.bf16 %v1515_v34, %v1483_v33 }
 0x398   : > { %3780 = vmatpush1.bf16.msra.mxu1 %v3779_v40  ;;  %v1482_v40 = vld [vmem:[%s7184_s5 + $0x1ce0] sm:$0xff] }
 0x399   : > { %3844 = vmatpush1.bf16.msra.mxu0 %v3843_v41  ;;  %3782 = vmatprep.subr.bf16.mxu1 %v3781_v42  ;;  %v1514_v41 = vld [vmem:[%s7184_s5 + $0x1de0] sm:$0xff]  ;;  %v1484_v42 = vld [vmem:[%s7184_s5 + $0x1cf0] sm:$0xff] }
 0x39a   : > { %3846 = vmatprep.subr.bf16.mxu0 %v3845_v46  ;;  %v1579_v46 = vld [vmem:[%s7184_s5 + $0x1fe8] sm:$0xff]  ;;  %v3803_v49 = vpack.c.bf16 %v1514_v41, %v1482_v40  ;;  %v3867_v50 = vpack.c.bf16 %v1516_v44, %v1484_v42 }
 0x39b   : > { %v3805_v51 = vpack.c.bf16 %v1579_v46, %v1547_v45 }
 0x39c   : > { %3784 = vmatpush1.bf16.msra.mxu1 %v3783_v52  ;;  %v1546_v52 = vld [vmem:[%s7184_s5 + $0x1ee0] sm:$0xff] }
 0x39d   : > { %3848 = vmatpush1.bf16.msra.mxu0 %v3847_v53  ;;  %3786 = vmatprep.subr.bf16.mxu1 %v3785_v54  ;;  %v1578_v53 = vld [vmem:[%s7184_s5 + $0x1fe0] sm:$0xff]  ;;  %v3869_v54 = vpack.c.bf16 %v1581_v48, %v1549_v47 }
 0x39e   : > { %3850 = vmatprep.subr.bf16.mxu0 %v3849_v58  ;;  %v3807_v57 = vpack.c.bf16 %v1578_v53, %v1546_v52  ;;  %v3871_v58 = vpack.c.bf16 %v1580_v56, %v1548_v55 }
 0x3a0   : > { %3788 = vmatpush1.bf16.msra.mxu1 %v3787_v0 }
 0x3a1   : > { %3852 = vmatpush1.bf16.msra.mxu0 %v3851_v1  ;;  %3790 = vmatprep.subr.bf16.mxu1 %v3789_v2 }
 0x3a2   : > { %3854 = vmatprep.subr.bf16.mxu0 %v3853_v6 }
 0x3a4   : > { %3792 = vmatpush1.bf16.msra.mxu1 %v3791_v12 }
 0x3a5   : > { %3856 = vmatpush1.bf16.msra.mxu0 %v3855_v13  ;;  %3794 = vmatprep.subr.bf16.mxu1 %v3793_v14 }
 0x3a6   : > { %3858 = vmatprep.subr.bf16.mxu0 %v3857_v19 }
 0x3a8   : > { %3796 = vmatpush1.bf16.msra.mxu1 %v3795_v26 }
 0x3a9   : > { %3860 = vmatpush1.bf16.msra.mxu0 %v3859_v16  ;;  %3798 = vmatprep.subr.bf16.mxu1 %v3797_v27 }
 0x3aa   : > { %3862 = vmatprep.subr.bf16.mxu0 %v3861_v31 }
 0x3ac   : > { %3800 = vmatpush1.bf16.msra.mxu1 %v3799_v37 }
 0x3ad   : > { %3864 = vmatpush1.bf16.msra.mxu0 %v3863_v38  ;;  %3802 = vmatprep.subr.bf16.mxu1 %v3801_v39 }
 0x3ae   : > { %3866 = vmatprep.subr.bf16.mxu0 %v3865_v43 }
 0x3b0   : > { %3804 = vmatpush1.bf16.msra.mxu1 %v3803_v49 }
 0x3b1   : > { %3868 = vmatpush1.bf16.msra.mxu0 %v3867_v50  ;;  %3806 = vmatprep.subr.bf16.mxu1 %v3805_v51 }
 0x3b2   : > { %3870 = vmatprep.subr.bf16.mxu0 %v3869_v54 }
 0x3b4   : > { %3808 = vmatpush1.bf16.msra.mxu1 %v3807_v57 }
 0x3b5   : > { %3872 = vmatpush1.bf16.msra.mxu0 %v3871_v58 }
 0x3b7   : > { %2641 = vmatmul.mubr.f32.vlgmr.msra.gmra.mrb[16].mxu1 %v4458_v21 }
 0x3b8   : > { %2712 = vmatmul.mubr.f32.vlgmr.msra.gmra.mrb[22].mxu0 %v4458_v21 }
 0x3ca   : > { %v2216_v59 = vpop.f32.mrb[10].mxu1 }
 0x3cb   : > { %2734 = vst [vmem:[%s5748_s9 + $0x80] sm:$0x1f] %v2216_v59  ;;  %v2287_v60 = vpop.f32.mrb[16].mxu0  ;;  %v2218_v61 = vpop.f32.mrb[11].mxu1 }
 0x3cc   : > { %2736 = vst [vmem:[%s5748_s9 + $0x90] sm:$0x1f] %v2287_v60  ;;  %2735 = vst [vmem:[%s5748_s9 + $0x88] sm:$0x1f] %v2218_v61  ;;  %v2289_v62 = vpop.f32.mrb[17].mxu0 }
 0x3cd   : > { %2737 = vst [vmem:[%s5748_s9 + $0x98] sm:$0x1f] %v2289_v62 }
 0x40a   : > { %v2358_v63 = vpop.f32.mrb[12].mxu1 }
 0x40b   : > { %2738 = vst [vmem:[%s5748_s9 + $0xa0] sm:$0x1f] %v2358_v63  ;;  %v2429_v0 = vpop.f32.mrb[18].mxu0  ;;  %v2360_v1 = vpop.f32.mrb[13].mxu1 }
 0x40c   : > { %2740 = vst [vmem:[%s5748_s9 + $0xb0] sm:$0x1f] %v2429_v0  ;;  %2739 = vst [vmem:[%s5748_s9 + $0xa8] sm:$0x1f] %v2360_v1  ;;  %v2431_v21 = vpop.f32.mrb[19].mxu0 }
 0x40d   : > { %2741 = vst [vmem:[%s5748_s9 + $0xb8] sm:$0x1f] %v2431_v21 }
 0x44a   : > { %v2500_v2 = vpop.f32.mrb[14].mxu1 }
 0x44b   : > { %2742 = vst [vmem:[%s5748_s9 + $0xc0] sm:$0x1f] %v2500_v2  ;;  %v2571_v3 = vpop.f32.mrb[20].mxu0  ;;  %v2502_v4 = vpop.f32.mrb[15].mxu1 }
 0x44c   : > { %2744 = vst [vmem:[%s5748_s9 + $0xd0] sm:$0x1f] %v2571_v3  ;;  %2743 = vst [vmem:[%s5748_s9 + $0xc8] sm:$0x1f] %v2502_v4  ;;  %v2573_v5 = vpop.f32.mrb[21].mxu0 }
 0x44d   : > { %2745 = vst [vmem:[%s5748_s9 + $0xd8] sm:$0x1f] %v2573_v5 }
 0x48a   : > { %v2642_v6 = vpop.f32.mrb[16].mxu1 }
 0x48b   : > { %2746 = vst [vmem:[%s5748_s9 + $0xe0] sm:$0x1f] %v2642_v6  ;;  %v2713_v7 = vpop.f32.mrb[22].mxu0  ;;  %v2644_v8 = vpop.f32.mrb[17].mxu1 }
 0x48c   : > { %2748 = vst [vmem:[%s5748_s9 + $0xf0] sm:$0x1f] %v2713_v7  ;;  %2747 = vst [vmem:[%s5748_s9 + $0xe8] sm:$0x1f] %v2644_v8  ;;  %v2715_v9 = vpop.f32.mrb[23].mxu0 }
 0x48d   : > { %2749 = vst [vmem:[%s5748_s9 + $0xf8] sm:$0x1f] %v2715_v9 }
 0x48e PF: > { %s16_s21 = sadd.s32 1, %s3925_s21  }
 0x48f   : > { %p13_p4 = scmp.ge.s32.totalorder %s16_s21, 4  }
 0x491   :  { %15 = sbr.rel (!%p13_p4) target bundleno = 1 (0x1), region = 74 }

</bundles_post_ra>
